<compile_context>
chip_gen: v7x
topology: tpu7x:2x2x1
jax: 0.10.0
libtpu: 0.0.40
codegen_flags: <defaults>
</compile_context>

<pallas_src>
import functools

import jax
import jax.numpy as jnp
from jax import lax
from jax.experimental import pallas as pl
from jax.experimental.pallas import tpu as pltpu

WL = 128           # lane tile width; P3 + W2 and W3 must fit in one lane tile
K3 = 16            # depthwise conv3 kernel width (fixed by the module)
P3 = 7             # depthwise conv3 padding     (fixed by the module)

_REF_PREC = lax.Precision.HIGHEST


def _elu(v):
    # ELU(alpha=1): x if x > 0 else exp(x) - 1 (clamped exp arg for safety)
    return jnp.where(v > 0, v, jnp.exp(jnp.minimum(v, 0.0)) - 1.0)


def _block_diag(mat, n):
    """(r, c) -> (n*r, n*c) block-diagonal matrix with n copies of `mat`."""
    r, c = mat.shape
    eye = jnp.eye(n, dtype=mat.dtype)
    return (eye[:, None, :, None] * mat[None, :, None, :]).reshape(n * r, n * c)


def _make_kernel(f1, precision):
    def kernel(x_ref, mix_ref, band_ref, rmask_ref, bias2_ref, w3_ref,
               wp_ref, bias3_ref, fcw_ref, bsel_ref, fcb_ref, out_ref):
        dot = functools.partial(jnp.dot, preferred_element_type=jnp.float32,
                                precision=precision)
        xblk = x_ref[0]                                  # (TB*ch1, Tp1)

        # conv2 (grouped spatial conv) with bn1/bn2 scales folded in:
        # block-diagonal (over the packed batch) channel-mix matmul.
        z = dot(mix_ref[...], xblk)                      # (TB*C2, Tp1)

        # conv1 temporal filter evaluated directly at the stride-2 pool2
        # positions, all f1 filters at once; each filter occupies one 128-lane
        # block whose first P3 lanes are zero (conv3's zero padding baked in).
        vall = dot(z, band_ref[...])                     # (TB*C2, f1*WL)

        # pick filter block f = c2 // d for every row (grouped-conv selection)
        rmask = rmask_ref[...]                           # (TB*C2, f1)
        v = rmask[:, 0:1] * vall[:, 0:WL]
        for f in range(1, f1):
            v = v + rmask[:, f:f + 1] * vall[:, f * WL:(f + 1) * WL]

        # bn1/bn2 bias (masked to the valid lanes) + ELU; padded lanes stay 0.
        y2p = _elu(v + bias2_ref[...])                   # (TB*C2, WL)

        # depthwise (1,16) conv3 via lane rotations (XLU) + running FMA.
        w3t = w3_ref[...]                                # (TB*C2, K3)
        y3 = w3t[:, 0:1] * y2p
        for k in range(1, K3):
            y3 = y3 + w3t[:, k:k + 1] * pltpu.roll(y2p, WL - k, 1)

        # pointwise 1x1 conv + bn3 scale (block-diag matmul), bn3 bias, ELU.
        z3 = _elu(dot(wp_ref[...], y3) + bias3_ref[...])  # (TB*f2, WL)

        # AvgPool2d((1,2)) + flatten + fc1 folded into fcw_ref; its zero
        # columns past W3 also discard the rotation-garbage lanes.
        p = z3 * fcw_ref[...]                            # (TB*f2, WL)
        pm = dot(bsel_ref[...], p)                       # (TB, WL) per-batch row sum
        out_ref[0] = jnp.sum(pm, axis=1, keepdims=True) + fcb_ref[...]

    return kernel


def eegnet_forward(x, params, *, block_b=2, precision=lax.Precision.DEFAULT):
    """x: (B, 1, ch1, T) float32 (NCHW, like PyTorch). Returns (B, 1)."""
    B, _, ch1, T = x.shape
    f1, k1 = params["w1"].shape
    _, d, _ = params["w2"].shape
    f2, C2 = params["wp"].shape
    assert C2 == f1 * d and k1 % 2 == 1

    p1 = (k1 - 1) // 2
    Tp1 = T + 2 * p1
    W2 = (T - 1) // 2 + 1            # after AvgPool2d(1, 2)        -> 67
    W3 = W2 + 2 * P3 - K3 + 1        # after depthwise conv (1, 16) -> 66
    W4 = W3 // 2                     # after AvgPool2d((1, 2))      -> 33
    assert P3 + W2 <= WL and W3 <= WL, "time extent must fit one lane tile"
    assert params["fcw"].shape == (f2, W4)

    TB = max(1, min(block_b, B))     # batch elements packed per grid step
    NB = -(-B // TB)
    B_pad = NB * TB

    # ---- fold the (eval-mode, eps=0) BatchNorms into weights / biases
    def bn_fold(p):
        g, b, m, v = p[:, 0], p[:, 1], p[:, 2], p[:, 3]
        s = g * lax.rsqrt(v)
        return s, b - m * s

    s1, o1 = bn_fold(params["bn1"])                         # (f1,)
    s2, o2 = bn_fold(params["bn2"])                         # (C2,)
    s3, o3 = bn_fold(params["bn3"])                         # (f2,)

    w1 = params["w1"].astype(jnp.float32)                   # (f1, k1)
    w2 = params["w2"].astype(jnp.float32)                   # (f1, d, ch1)
    w3 = params["w3"].astype(jnp.float32)                   # (C2, K3)
    wp = params["wp"].astype(jnp.float32)                   # (f2, C2)
    fcw = params["fcw"].astype(jnp.float32)                 # (f2, W4)
    fcb = params["fcb"].reshape(1, 1).astype(jnp.float32)

    # conv2 channel mix with bn1/bn2 scales folded in: A[c2, c]
    A = (w2 * s1[:, None, None]).reshape(C2, ch1) * s2[:, None]
    # bn1 bias pushed through conv2, plus bn2 bias (per C2 channel)
    bias2 = s2 * jnp.repeat(o1, d) * w2.sum(axis=2).reshape(C2) + o2

    # conv1 band matrix (temporal taps evaluated at stride-2 positions); one
    # 128-lane block per filter f, data lanes shifted right by P3 zeros.
    tp_i = jnp.arange(Tp1)
    j_i = jnp.arange(k1)
    w_i = jnp.arange(W2)
    hit = (tp_i[None, :, None] ==
           (2 * w_i[None, None, :] + j_i[:, None, None])).astype(jnp.float32)
    band_core = jnp.einsum('fj,jpw->fpw', w1, hit)          # (f1, Tp1, W2)
    band = jnp.zeros((f1, Tp1, WL), jnp.float32).at[:, :, P3:P3 + W2].set(band_core)
    band_all = jnp.transpose(band, (1, 0, 2)).reshape(Tp1, f1 * WL)

    lane_valid = ((jnp.arange(WL) >= P3) &
                  (jnp.arange(WL) < P3 + W2)).astype(jnp.float32)

    # AvgPool2d((1,2)) + flatten + fc1 folded into one weighting tile
    fcw3 = jnp.zeros((f2, WL), jnp.float32).at[:, :2 * W4].set(
        0.5 * jnp.repeat(fcw, 2, axis=1)[:, :2 * W4])

    # batch-packed (block-diagonal / row-tiled) constants
    mix_blk = _block_diag(A, TB)                                        # (TB*C2, TB*ch1)
    wp_blk = _block_diag(wp * s3[:, None], TB)                          # (TB*f2, TB*C2)
    rmask = jnp.tile(jax.nn.one_hot(jnp.arange(C2) // d, f1,
                                    dtype=jnp.float32), (TB, 1))        # (TB*C2, f1)
    bias2_t = jnp.tile(bias2[:, None] * lane_valid[None, :], (TB, 1))   # (TB*C2, WL)
    w3_t = jnp.tile(w3, (TB, 1))                                        # (TB*C2, K3)
    bias3_t = jnp.tile(o3[:, None], (TB, 1))                            # (TB*f2, 1)
    fcw3_t = jnp.tile(fcw3, (TB, 1))                                    # (TB*f2, WL)
    bsel = _block_diag(jnp.ones((1, f2), jnp.float32), TB)              # (TB, TB*f2)

    # ---- input glue: zero-pad batch + time, pack TB batch elems into sublanes
    xb = x[:, 0, :, :].astype(jnp.float32)                              # (B, ch1, T)
    xb = jnp.pad(xb, ((0, B_pad - B), (0, 0), (p1, p1)))                # (B_pad, ch1, Tp1)
    x_slab = xb.reshape(NB, TB * ch1, Tp1)

    consts = (mix_blk, band_all, rmask, bias2_t, w3_t, wp_blk,
              bias3_t, fcw3_t, bsel, fcb)

    out = pl.pallas_call(
        _make_kernel(f1, precision),
        out_shape=jax.ShapeDtypeStruct((NB, TB, 1), jnp.float32),
        grid=(NB,),
        in_specs=[pl.BlockSpec((1, TB * ch1, Tp1), lambda i: (i, 0, 0))]
        + [pl.BlockSpec(c.shape, lambda i: (0, 0)) for c in consts],
        out_specs=pl.BlockSpec((1, TB, 1), lambda i: (i, 0, 0)),
        compiler_params=pltpu.CompilerParams(
            dimension_semantics=("parallel",)),
    )(x_slab, *consts)

    # TODO(synk): for large B, emit the output lane-dense (B on lanes) instead
    # of (B, 1) to avoid masked partial stores; irrelevant at this size.
    return out.reshape(B_pad, 1)[:B]


# ---------------------------------------------------------------------------
# Pure-JAX reference (mirrors PyTorch NCHW semantics) for validation.
# ---------------------------------------------------------------------------
def eegnet_reference(x, params):
    B, _, ch1, T = x.shape
    f1, k1 = params["w1"].shape
    _, d, _ = params["w2"].shape
    f2, C2 = params["wp"].shape
    p1 = (k1 - 1) // 2

    def conv(v, w, pad, groups=1):
        return lax.conv_general_dilated(
            v, w, window_strides=(1, 1), padding=pad,
            dimension_numbers=("NCHW", "OIHW", "NCHW"),
            feature_group_count=groups, precision=_REF_PREC)

    def bn(v, p):
        g, b, m, var = p[:, 0], p[:, 1], p[:, 2], p[:, 3]
        sc = (g * lax.rsqrt(var))[None, :, None, None]
        return (v - m[None, :, None, None]) * sc + b[None, :, None, None]

    y = conv(x, params["w1"][:, None, None, :], ((0, 0), (p1, p1)))
    y = bn(y, params["bn1"])
    y = conv(y, params["w2"].reshape(f1 * d, 1, ch1, 1), ((0, 0), (0, 0)), groups=f1)
    y = bn(y, params["bn2"])
    y = _elu(y)
    y = y[:, :, ::2, ::2]                                     # AvgPool2d(1, 2)
    y = conv(y, params["w3"][:, None, None, :], ((0, 0), (P3, P3)), groups=C2)
    y = conv(y, params["wp"][:, :, None, None], ((0, 0), (0, 0)))
    y = bn(y, params["bn3"])
    y = _elu(y)
    Bn, C, H, W = y.shape
    y = y.reshape(Bn, C, H, W // 2, 2).mean(axis=-1)          # AvgPool2d((1, 2))
    y = y.reshape(Bn, -1)
    fc_w = params["fcw"].reshape(1, -1)
    return y @ fc_w.T + params["fcb"].reshape(1, 1)


if __name__ == "__main__":
    # Small hyperparameters consistent with the module; T is fixed at 134 by fc1.
    B, ch1, T = 4, 4, 134
    f1, f2, k1, d = 4, 8, 5, 2
    C2, W4 = f1 * d, (T - 2) // 4

    key = jax.random.PRNGKey(0)
    ks = jax.random.split(key, 10)

    def make_bn(k, C):
        ka, kb, kc, kd = jax.random.split(k, 4)
        return jnp.stack([1.0 + 0.1 * jax.random.normal(ka, (C,)),
                          0.1 * jax.random.normal(kb, (C,)),
                          0.1 * jax.random.normal(kc, (C,)),
                          jax.random.uniform(kd, (C,), minval=0.5, maxval=1.5)],
                         axis=1).astype(jnp.float32)

    params = {
        "w1": 0.3 * jax.random.normal(ks[1], (f1, k1), jnp.float32),
        "bn1": make_bn(ks[2], f1),
        "w2": 0.3 * jax.random.normal(ks[3], (f1, d, ch1), jnp.float32),
        "bn2": make_bn(ks[4], C2),
        "w3": 0.2 * jax.random.normal(ks[5], (C2, K3), jnp.float32),
        "wp": 0.3 * jax.random.normal(ks[6], (f2, C2), jnp.float32),
        "bn3": make_bn(ks[7], f2),
        "fcw": 0.1 * jax.random.normal(ks[8], (f2, W4), jnp.float32),
        "fcb": 0.1 * jax.random.normal(ks[9], (1, 1), jnp.float32),
    }
    x = jax.random.normal(ks[0], (B, 1, ch1, T), jnp.float32)

    ref = eegnet_reference(x, params)

    # Exactness check of the restructuring / folds (full-precision matmuls).
    out_hi = eegnet_forward(x, params, block_b=2, precision=lax.Precision.HIGHEST)
    jax.block_until_ready(out_hi)
    assert out_hi.shape == (B, 1), out_hi.shape
    err_hi = float(jnp.max(jnp.abs(out_hi - ref)))
    assert err_hi < 1e-3, f"HIGHEST-precision mismatch: max abs err = {err_hi}"

    # Fast path: single-pass bf16 MXU matmuls (default).
    out = eegnet_forward(x, params, block_b=2, precision=lax.Precision.DEFAULT)
    jax.block_until_ready(out)
    err = float(jnp.max(jnp.abs(out - ref)))
    assert err < 2e-2, f"DEFAULT-precision mismatch: max abs err = {err}"

    print("KERNEL_OK")
</pallas_src>

<mosaic_0001>
module attributes {stable_mosaic.version = 11 : i64} {
  func.func @kernel(%arg0: i32, %arg1: memref<1x8x138xf32, #tpu.memory_space<vmem>>, %arg2: memref<16x8xf32, #tpu.memory_space<vmem>>, %arg3: memref<138x512xf32, #tpu.memory_space<vmem>>, %arg4: memref<16x4xf32, #tpu.memory_space<vmem>>, %arg5: memref<16x128xf32, #tpu.memory_space<vmem>>, %arg6: memref<16x16xf32, #tpu.memory_space<vmem>>, %arg7: memref<16x16xf32, #tpu.memory_space<vmem>>, %arg8: memref<16x1xf32, #tpu.memory_space<vmem>>, %arg9: memref<16x128xf32, #tpu.memory_space<vmem>>, %arg10: memref<2x16xf32, #tpu.memory_space<vmem>>, %arg11: memref<1x1xf32, #tpu.memory_space<vmem>>, %arg12: memref<1x2x1xf32, #tpu.memory_space<vmem>>) attributes {dimension_semantics = [#tpu.dimension_semantics<parallel>], iteration_bounds = array<i64: 2>, scalar_prefetch = 0 : i64, scratch_operands = 0 : i64, tpu.core_type = #tpu.core_type<tc>, window_params = [{transform_indices = @transform_0, window_bounds = array<i64: 1, 8, 138>}, {pipeline_mode = #tpu.pipeline_mode<synchronous>, transform_indices = @transform_1, window_bounds = array<i64: 16, 8>}, {pipeline_mode = #tpu.pipeline_mode<synchronous>, transform_indices = @transform_2, window_bounds = array<i64: 138, 512>}, {pipeline_mode = #tpu.pipeline_mode<synchronous>, transform_indices = @transform_3, window_bounds = array<i64: 16, 4>}, {pipeline_mode = #tpu.pipeline_mode<synchronous>, transform_indices = @transform_4, window_bounds = array<i64: 16, 128>}, {pipeline_mode = #tpu.pipeline_mode<synchronous>, transform_indices = @transform_5, window_bounds = array<i64: 16, 16>}, {pipeline_mode = #tpu.pipeline_mode<synchronous>, transform_indices = @transform_6, window_bounds = array<i64: 16, 16>}, {pipeline_mode = #tpu.pipeline_mode<synchronous>, transform_indices = @transform_7, window_bounds = array<i64: 16, 1>}, {pipeline_mode = #tpu.pipeline_mode<synchronous>, transform_indices = @transform_8, window_bounds = array<i64: 16, 128>}, {pipeline_mode = #tpu.pipeline_mode<synchronous>, transform_indices = @transform_9, window_bounds = array<i64: 2, 16>}, {pipeline_mode = #tpu.pipeline_mode<synchronous>, transform_indices = @transform_10, window_bounds = array<i64: 1, 1>}, {transform_indices = @transform_11, window_bounds = array<i64: 1, 2, 1>}]} {
    %c0 = arith.constant 0 : index
    %c0_0 = arith.constant 0 : index
    %c0_1 = arith.constant 0 : index
    %0 = vector.load %arg1[%c0, %c0_0, %c0_1] : memref<1x8x138xf32, #tpu.memory_space<vmem>>, vector<1x8x138xf32>
    %1 = vector.shape_cast %0 : vector<1x8x138xf32> to vector<8x138xf32>
    %c0_2 = arith.constant 0 : index
    %c0_3 = arith.constant 0 : index
    %2 = vector.load %arg2[%c0_2, %c0_3] : memref<16x8xf32, #tpu.memory_space<vmem>>, vector<16x8xf32>
    %cst = arith.constant dense<0.000000e+00> : vector<16x138xf32>
    %3 = tpu.matmul %2, %1, %cst {dimension_numbers = #tpu.dot_dimension_numbers<[1], [0], [0], [1], [0, 0, 1, 1], [], []>, precision = #tpu.contract_precision<fp32>} : vector<16x8xf32>, vector<8x138xf32>, vector<16x138xf32> -> vector<16x138xf32>
    %c0_4 = arith.constant 0 : index
    %c0_5 = arith.constant 0 : index
    %4 = vector.load %arg3[%c0_4, %c0_5] : memref<138x512xf32, #tpu.memory_space<vmem>>, vector<138x512xf32>
    %cst_6 = arith.constant dense<0.000000e+00> : vector<16x512xf32>
    %5 = tpu.matmul %3, %4, %cst_6 {dimension_numbers = #tpu.dot_dimension_numbers<[1], [0], [0], [1], [0, 0, 1, 1], [], []>, precision = #tpu.contract_precision<fp32>} : vector<16x138xf32>, vector<138x512xf32>, vector<16x512xf32> -> vector<16x512xf32>
    %c0_7 = arith.constant 0 : index
    %c0_8 = arith.constant 0 : index
    %6 = vector.load %arg4[%c0_7, %c0_8] : memref<16x4xf32, #tpu.memory_space<vmem>>, vector<16x4xf32>
    %7 = vector.extract_strided_slice %6 {offsets = [0, 0], sizes = [16, 1], strides = [1, 1]} : vector<16x4xf32> to vector<16x1xf32>
    %8 = vector.extract_strided_slice %5 {offsets = [0, 0], sizes = [16, 128], strides = [1, 1]} : vector<16x512xf32> to vector<16x128xf32>
    %9 = vector.broadcast %7 : vector<16x1xf32> to vector<16x128xf32>
    %10 = arith.mulf %9, %8 : vector<16x128xf32>
    %11 = vector.extract_strided_slice %6 {offsets = [0, 1], sizes = [16, 1], strides = [1, 1]} : vector<16x4xf32> to vector<16x1xf32>
    %12 = vector.extract_strided_slice %5 {offsets = [0, 128], sizes = [16, 128], strides = [1, 1]} : vector<16x512xf32> to vector<16x128xf32>
    %13 = vector.broadcast %11 : vector<16x1xf32> to vector<16x128xf32>
    %14 = arith.mulf %13, %12 : vector<16x128xf32>
    %15 = arith.addf %10, %14 : vector<16x128xf32>
    %16 = vector.extract_strided_slice %6 {offsets = [0, 2], sizes = [16, 1], strides = [1, 1]} : vector<16x4xf32> to vector<16x1xf32>
    %17 = vector.extract_strided_slice %5 {offsets = [0, 256], sizes = [16, 128], strides = [1, 1]} : vector<16x512xf32> to vector<16x128xf32>
    %18 = vector.broadcast %16 : vector<16x1xf32> to vector<16x128xf32>
    %19 = arith.mulf %18, %17 : vector<16x128xf32>
    %20 = arith.addf %15, %19 : vector<16x128xf32>
    %21 = vector.extract_strided_slice %6 {offsets = [0, 3], sizes = [16, 1], strides = [1, 1]} : vector<16x4xf32> to vector<16x1xf32>
    %22 = vector.extract_strided_slice %5 {offsets = [0, 384], sizes = [16, 128], strides = [1, 1]} : vector<16x512xf32> to vector<16x128xf32>
    %23 = vector.broadcast %21 : vector<16x1xf32> to vector<16x128xf32>
    %24 = arith.mulf %23, %22 : vector<16x128xf32>
    %25 = arith.addf %20, %24 : vector<16x128xf32>
    %c0_9 = arith.constant 0 : index
    %c0_10 = arith.constant 0 : index
    %26 = vector.load %arg5[%c0_9, %c0_10] : memref<16x128xf32, #tpu.memory_space<vmem>>, vector<16x128xf32>
    %27 = arith.addf %25, %26 : vector<16x128xf32>
    %cst_11 = arith.constant 0.000000e+00 : f32
    %28 = vector.broadcast %cst_11 : f32 to vector<16x128xf32>
    %29 = arith.cmpf ogt, %27, %28 : vector<16x128xf32>
    %cst_12 = arith.constant 0.000000e+00 : f32
    %30 = vector.broadcast %cst_12 : f32 to vector<16x128xf32>
    %31 = arith.minimumf %27, %30 : vector<16x128xf32>
    %32 = math.exp %31 : vector<16x128xf32>
    %cst_13 = arith.constant 1.000000e+00 : f32
    %33 = vector.broadcast %cst_13 : f32 to vector<16x128xf32>
    %34 = arith.subf %32, %33 : vector<16x128xf32>
    %35 = arith.select %29, %27, %34 : vector<16x128xi1>, vector<16x128xf32>
    %c0_14 = arith.constant 0 : index
    %c0_15 = arith.constant 0 : index
    %36 = vector.load %arg6[%c0_14, %c0_15] : memref<16x16xf32, #tpu.memory_space<vmem>>, vector<16x16xf32>
    %37 = vector.extract_strided_slice %36 {offsets = [0, 0], sizes = [16, 1], strides = [1, 1]} : vector<16x16xf32> to vector<16x1xf32>
    %38 = vector.broadcast %37 : vector<16x1xf32> to vector<16x128xf32>
    %39 = arith.mulf %38, %35 : vector<16x128xf32>
    %40 = vector.extract_strided_slice %36 {offsets = [0, 1], sizes = [16, 1], strides = [1, 1]} : vector<16x16xf32> to vector<16x1xf32>
    %c127_i32 = arith.constant 127 : i32
    %41 = tpu.dynamic_rotate %35 by %c127_i32 dim 1 : vector<16x128xf32>, i32 -> vector<16x128xf32>
    %42 = vector.broadcast %40 : vector<16x1xf32> to vector<16x128xf32>
    %43 = arith.mulf %42, %41 : vector<16x128xf32>
    %44 = arith.addf %39, %43 : vector<16x128xf32>
    %45 = vector.extract_strided_slice %36 {offsets = [0, 2], sizes = [16, 1], strides = [1, 1]} : vector<16x16xf32> to vector<16x1xf32>
    %c126_i32 = arith.constant 126 : i32
    %46 = tpu.dynamic_rotate %35 by %c126_i32 dim 1 : vector<16x128xf32>, i32 -> vector<16x128xf32>
    %47 = vector.broadcast %45 : vector<16x1xf32> to vector<16x128xf32>
    %48 = arith.mulf %47, %46 : vector<16x128xf32>
    %49 = arith.addf %44, %48 : vector<16x128xf32>
    %50 = vector.extract_strided_slice %36 {offsets = [0, 3], sizes = [16, 1], strides = [1, 1]} : vector<16x16xf32> to vector<16x1xf32>
    %c125_i32 = arith.constant 125 : i32
    %51 = tpu.dynamic_rotate %35 by %c125_i32 dim 1 : vector<16x128xf32>, i32 -> vector<16x128xf32>
    %52 = vector.broadcast %50 : vector<16x1xf32> to vector<16x128xf32>
    %53 = arith.mulf %52, %51 : vector<16x128xf32>
    %54 = arith.addf %49, %53 : vector<16x128xf32>
    %55 = vector.extract_strided_slice %36 {offsets = [0, 4], sizes = [16, 1], strides = [1, 1]} : vector<16x16xf32> to vector<16x1xf32>
    %c124_i32 = arith.constant 124 : i32
    %56 = tpu.dynamic_rotate %35 by %c124_i32 dim 1 : vector<16x128xf32>, i32 -> vector<16x128xf32>
    %57 = vector.broadcast %55 : vector<16x1xf32> to vector<16x128xf32>
    %58 = arith.mulf %57, %56 : vector<16x128xf32>
    %59 = arith.addf %54, %58 : vector<16x128xf32>
    %60 = vector.extract_strided_slice %36 {offsets = [0, 5], sizes = [16, 1], strides = [1, 1]} : vector<16x16xf32> to vector<16x1xf32>
    %c123_i32 = arith.constant 123 : i32
    %61 = tpu.dynamic_rotate %35 by %c123_i32 dim 1 : vector<16x128xf32>, i32 -> vector<16x128xf32>
    %62 = vector.broadcast %60 : vector<16x1xf32> to vector<16x128xf32>
    %63 = arith.mulf %62, %61 : vector<16x128xf32>
    %64 = arith.addf %59, %63 : vector<16x128xf32>
    %65 = vector.extract_strided_slice %36 {offsets = [0, 6], sizes = [16, 1], strides = [1, 1]} : vector<16x16xf32> to vector<16x1xf32>
    %c122_i32 = arith.constant 122 : i32
    %66 = tpu.dynamic_rotate %35 by %c122_i32 dim 1 : vector<16x128xf32>, i32 -> vector<16x128xf32>
    %67 = vector.broadcast %65 : vector<16x1xf32> to vector<16x128xf32>
    %68 = arith.mulf %67, %66 : vector<16x128xf32>
    %69 = arith.addf %64, %68 : vector<16x128xf32>
    %70 = vector.extract_strided_slice %36 {offsets = [0, 7], sizes = [16, 1], strides = [1, 1]} : vector<16x16xf32> to vector<16x1xf32>
    %c121_i32 = arith.constant 121 : i32
    %71 = tpu.dynamic_rotate %35 by %c121_i32 dim 1 : vector<16x128xf32>, i32 -> vector<16x128xf32>
    %72 = vector.broadcast %70 : vector<16x1xf32> to vector<16x128xf32>
    %73 = arith.mulf %72, %71 : vector<16x128xf32>
    %74 = arith.addf %69, %73 : vector<16x128xf32>
    %75 = vector.extract_strided_slice %36 {offsets = [0, 8], sizes = [16, 1], strides = [1, 1]} : vector<16x16xf32> to vector<16x1xf32>
    %c120_i32 = arith.constant 120 : i32
    %76 = tpu.dynamic_rotate %35 by %c120_i32 dim 1 : vector<16x128xf32>, i32 -> vector<16x128xf32>
    %77 = vector.broadcast %75 : vector<16x1xf32> to vector<16x128xf32>
    %78 = arith.mulf %77, %76 : vector<16x128xf32>
    %79 = arith.addf %74, %78 : vector<16x128xf32>
    %80 = vector.extract_strided_slice %36 {offsets = [0, 9], sizes = [16, 1], strides = [1, 1]} : vector<16x16xf32> to vector<16x1xf32>
    %c119_i32 = arith.constant 119 : i32
    %81 = tpu.dynamic_rotate %35 by %c119_i32 dim 1 : vector<16x128xf32>, i32 -> vector<16x128xf32>
    %82 = vector.broadcast %80 : vector<16x1xf32> to vector<16x128xf32>
    %83 = arith.mulf %82, %81 : vector<16x128xf32>
    %84 = arith.addf %79, %83 : vector<16x128xf32>
    %85 = vector.extract_strided_slice %36 {offsets = [0, 10], sizes = [16, 1], strides = [1, 1]} : vector<16x16xf32> to vector<16x1xf32>
    %c118_i32 = arith.constant 118 : i32
    %86 = tpu.dynamic_rotate %35 by %c118_i32 dim 1 : vector<16x128xf32>, i32 -> vector<16x128xf32>
    %87 = vector.broadcast %85 : vector<16x1xf32> to vector<16x128xf32>
    %88 = arith.mulf %87, %86 : vector<16x128xf32>
    %89 = arith.addf %84, %88 : vector<16x128xf32>
    %90 = vector.extract_strided_slice %36 {offsets = [0, 11], sizes = [16, 1], strides = [1, 1]} : vector<16x16xf32> to vector<16x1xf32>
    %c117_i32 = arith.constant 117 : i32
    %91 = tpu.dynamic_rotate %35 by %c117_i32 dim 1 : vector<16x128xf32>, i32 -> vector<16x128xf32>
    %92 = vector.broadcast %90 : vector<16x1xf32> to vector<16x128xf32>
    %93 = arith.mulf %92, %91 : vector<16x128xf32>
    %94 = arith.addf %89, %93 : vector<16x128xf32>
    %95 = vector.extract_strided_slice %36 {offsets = [0, 12], sizes = [16, 1], strides = [1, 1]} : vector<16x16xf32> to vector<16x1xf32>
    %c116_i32 = arith.constant 116 : i32
    %96 = tpu.dynamic_rotate %35 by %c116_i32 dim 1 : vector<16x128xf32>, i32 -> vector<16x128xf32>
    %97 = vector.broadcast %95 : vector<16x1xf32> to vector<16x128xf32>
    %98 = arith.mulf %97, %96 : vector<16x128xf32>
    %99 = arith.addf %94, %98 : vector<16x128xf32>
    %100 = vector.extract_strided_slice %36 {offsets = [0, 13], sizes = [16, 1], strides = [1, 1]} : vector<16x16xf32> to vector<16x1xf32>
    %c115_i32 = arith.constant 115 : i32
    %101 = tpu.dynamic_rotate %35 by %c115_i32 dim 1 : vector<16x128xf32>, i32 -> vector<16x128xf32>
    %102 = vector.broadcast %100 : vector<16x1xf32> to vector<16x128xf32>
    %103 = arith.mulf %102, %101 : vector<16x128xf32>
    %104 = arith.addf %99, %103 : vector<16x128xf32>
    %105 = vector.extract_strided_slice %36 {offsets = [0, 14], sizes = [16, 1], strides = [1, 1]} : vector<16x16xf32> to vector<16x1xf32>
    %c114_i32 = arith.constant 114 : i32
    %106 = tpu.dynamic_rotate %35 by %c114_i32 dim 1 : vector<16x128xf32>, i32 -> vector<16x128xf32>
    %107 = vector.broadcast %105 : vector<16x1xf32> to vector<16x128xf32>
    %108 = arith.mulf %107, %106 : vector<16x128xf32>
    %109 = arith.addf %104, %108 : vector<16x128xf32>
    %110 = vector.extract_strided_slice %36 {offsets = [0, 15], sizes = [16, 1], strides = [1, 1]} : vector<16x16xf32> to vector<16x1xf32>
    %c113_i32 = arith.constant 113 : i32
    %111 = tpu.dynamic_rotate %35 by %c113_i32 dim 1 : vector<16x128xf32>, i32 -> vector<16x128xf32>
    %112 = vector.broadcast %110 : vector<16x1xf32> to vector<16x128xf32>
    %113 = arith.mulf %112, %111 : vector<16x128xf32>
    %114 = arith.addf %109, %113 : vector<16x128xf32>
    %c0_16 = arith.constant 0 : index
    %c0_17 = arith.constant 0 : index
    %115 = vector.load %arg7[%c0_16, %c0_17] : memref<16x16xf32, #tpu.memory_space<vmem>>, vector<16x16xf32>
    %cst_18 = arith.constant dense<0.000000e+00> : vector<16x128xf32>
    %116 = tpu.matmul %115, %114, %cst_18 {dimension_numbers = #tpu.dot_dimension_numbers<[1], [0], [0], [1], [0, 0, 1, 1], [], []>, precision = #tpu.contract_precision<fp32>} : vector<16x16xf32>, vector<16x128xf32>, vector<16x128xf32> -> vector<16x128xf32>
    %c0_19 = arith.constant 0 : index
    %c0_20 = arith.constant 0 : index
    %117 = vector.load %arg8[%c0_19, %c0_20] : memref<16x1xf32, #tpu.memory_space<vmem>>, vector<16x1xf32>
    %118 = vector.broadcast %117 : vector<16x1xf32> to vector<16x128xf32>
    %119 = arith.addf %116, %118 : vector<16x128xf32>
    %cst_21 = arith.constant 0.000000e+00 : f32
    %120 = vector.broadcast %cst_21 : f32 to vector<16x128xf32>
    %121 = arith.cmpf ogt, %119, %120 : vector<16x128xf32>
    %cst_22 = arith.constant 0.000000e+00 : f32
    %122 = vector.broadcast %cst_22 : f32 to vector<16x128xf32>
    %123 = arith.minimumf %119, %122 : vector<16x128xf32>
    %124 = math.exp %123 : vector<16x128xf32>
    %cst_23 = arith.constant 1.000000e+00 : f32
    %125 = vector.broadcast %cst_23 : f32 to vector<16x128xf32>
    %126 = arith.subf %124, %125 : vector<16x128xf32>
    %127 = arith.select %121, %119, %126 : vector<16x128xi1>, vector<16x128xf32>
    %c0_24 = arith.constant 0 : index
    %c0_25 = arith.constant 0 : index
    %128 = vector.load %arg9[%c0_24, %c0_25] : memref<16x128xf32, #tpu.memory_space<vmem>>, vector<16x128xf32>
    %129 = arith.mulf %127, %128 : vector<16x128xf32>
    %c0_26 = arith.constant 0 : index
    %c0_27 = arith.constant 0 : index
    %130 = vector.load %arg10[%c0_26, %c0_27] : memref<2x16xf32, #tpu.memory_space<vmem>>, vector<2x16xf32>
    %cst_28 = arith.constant dense<0.000000e+00> : vector<2x128xf32>
    %131 = tpu.matmul %130, %129, %cst_28 {dimension_numbers = #tpu.dot_dimension_numbers<[1], [0], [0], [1], [0, 0, 1, 1], [], []>, precision = #tpu.contract_precision<fp32>} : vector<2x16xf32>, vector<16x128xf32>, vector<2x128xf32> -> vector<2x128xf32>
    %cst_29 = arith.constant dense<0.000000e+00> : vector<2xf32>
    %132 = vector.multi_reduction <add>, %131, %cst_29 [1] : vector<2x128xf32> to vector<2xf32>
    %133 = vector.shape_cast %132 : vector<2xf32> to vector<2x1xf32>
    %c0_30 = arith.constant 0 : index
    %c0_31 = arith.constant 0 : index
    %134 = vector.load %arg11[%c0_30, %c0_31] : memref<1x1xf32, #tpu.memory_space<vmem>>, vector<1x1xf32>
    %135 = vector.broadcast %134 : vector<1x1xf32> to vector<2x1xf32>
    %136 = arith.addf %133, %135 : vector<2x1xf32>
    %c0_32 = arith.constant 0 : index
    %c0_33 = arith.constant 0 : index
    %c0_34 = arith.constant 0 : index
    %137 = vector.load %arg12[%c0_32, %c0_33, %c0_34] : memref<1x2x1xf32, #tpu.memory_space<vmem>>, vector<1x2x1xf32>
    %138 = vector.shape_cast %137 : vector<1x2x1xf32> to vector<2x1xf32>
    %139 = vector.shape_cast %136 : vector<2x1xf32> to vector<1x2x1xf32>
    tpu.vector_store %arg12[%c0_32, %c0_33, %c0_34], %139 {strides = array<i32>} : memref<1x2x1xf32, #tpu.memory_space<vmem>>, vector<1x2x1xf32>,
    return
  }
  func.func @transform_0(%arg0: i32) -> (i32, i32, i32) {
    %c0_i32 = arith.constant 0 : i32
    %c0_i32_0 = arith.constant 0 : i32
    %c0_i32_1 = arith.constant 0 : i32
    return %arg0, %c0_i32, %c0_i32_0 : i32, i32, i32
  }
  func.func @transform_1(%arg0: i32) -> (i32, i32) {
    %c0_i32 = arith.constant 0 : i32
    %c0_i32_0 = arith.constant 0 : i32
    %c0_i32_1 = arith.constant 0 : i32
    return %c0_i32, %c0_i32_0 : i32, i32
  }
  func.func @transform_2(%arg0: i32) -> (i32, i32) {
    %c0_i32 = arith.constant 0 : i32
    %c0_i32_0 = arith.constant 0 : i32
    %c0_i32_1 = arith.constant 0 : i32
    return %c0_i32, %c0_i32_0 : i32, i32
  }
  func.func @transform_3(%arg0: i32) -> (i32, i32) {
    %c0_i32 = arith.constant 0 : i32
    %c0_i32_0 = arith.constant 0 : i32
    %c0_i32_1 = arith.constant 0 : i32
    return %c0_i32, %c0_i32_0 : i32, i32
  }
  func.func @transform_4(%arg0: i32) -> (i32, i32) {
    %c0_i32 = arith.constant 0 : i32
    %c0_i32_0 = arith.constant 0 : i32
    %c0_i32_1 = arith.constant 0 : i32
    return %c0_i32, %c0_i32_0 : i32, i32
  }
  func.func @transform_5(%arg0: i32) -> (i32, i32) {
    %c0_i32 = arith.constant 0 : i32
    %c0_i32_0 = arith.constant 0 : i32
    %c0_i32_1 = arith.constant 0 : i32
    return %c0_i32, %c0_i32_0 : i32, i32
  }
  func.func @transform_6(%arg0: i32) -> (i32, i32) {
    %c0_i32 = arith.constant 0 : i32
    %c0_i32_0 = arith.constant 0 : i32
    %c0_i32_1 = arith.constant 0 : i32
    return %c0_i32, %c0_i32_0 : i32, i32
  }
  func.func @transform_7(%arg0: i32) -> (i32, i32) {
    %c0_i32 = arith.constant 0 : i32
    %c0_i32_0 = arith.constant 0 : i32
    %c0_i32_1 = arith.constant 0 : i32
    return %c0_i32, %c0_i32_0 : i32, i32
  }
  func.func @transform_8(%arg0: i32) -> (i32, i32) {
    %c0_i32 = arith.constant 0 : i32
    %c0_i32_0 = arith.constant 0 : i32
    %c0_i32_1 = arith.constant 0 : i32
    return %c0_i32, %c0_i32_0 : i32, i32
  }
  func.func @transform_9(%arg0: i32) -> (i32, i32) {
    %c0_i32 = arith.constant 0 : i32
    %c0_i32_0 = arith.constant 0 : i32
    %c0_i32_1 = arith.constant 0 : i32
    return %c0_i32, %c0_i32_0 : i32, i32
  }
  func.func @transform_10(%arg0: i32) -> (i32, i32) {
    %c0_i32 = arith.constant 0 : i32
    %c0_i32_0 = arith.constant 0 : i32
    %c0_i32_1 = arith.constant 0 : i32
    return %c0_i32, %c0_i32_0 : i32, i32
  }
  func.func @transform_11(%arg0: i32) -> (i32, i32, i32) {
    %c0_i32 = arith.constant 0 : i32
    %c0_i32_0 = arith.constant 0 : i32
    %c0_i32_1 = arith.constant 0 : i32
    return %arg0, %c0_i32, %c0_i32_0 : i32, i32, i32
  }
}

</mosaic_0001>

<bundles_post_ra>
// kernel: tpu_custom_call.1
= control target key start
LH: loop header
LB: loop body
LE: loop exit
PB: predicated region body
PF: predicated region fallthrough
CT: control target
= control target key end

     0   :  { %s7111_s0 = inlined_call_operand.vmem [shape: f32[2,8,138], index: 0, kind: input, shape index: {}]   ;;  %s7112_s1 = inlined_call_operand.vmem [shape: f32[16,8], index: 1, kind: input, shape index: {}]   ;;  %s7113_s2 = inlined_call_operand.hbm [shape: f32[138,512], index: 2, kind: input, shape index: {}]   ;;  %s7114_s3 = inlined_call_operand.vmem [shape: f32[16,4], index: 3, kind: input, shape index: {}]   ;;  %s7115_s4 = inlined_call_operand.vmem [shape: f32[16,128], index: 4, kind: input, shape index: {}]   ;;  %s7116_s5 = inlined_call_operand.vmem [shape: f32[16,16], index: 5, kind: input, shape index: {}]   ;;  %s7117_s6 = inlined_call_operand.vmem [shape: f32[16,16], index: 6, kind: input, shape index: {}]   ;;  %s7118_s7 = inlined_call_operand.vmem [shape: f32[16,1], index: 7, kind: input, shape index: {}]   ;;  %s7119_s8 = inlined_call_operand.hbm [shape: f32[16,128], index: 8, kind: input, shape index: {}]   ;;  %s7120_s9 = inlined_call_operand.vmem [shape: f32[2,16], index: 9, kind: input, shape index: {}]   ;;  %s7121_s10 = inlined_call_operand.<no memory space> [shape: f32[1,1], index: 10, kind: input, shape index: {}]   ;;  %s7122_s11 = inlined_call_operand.vmem [shape: f32[2,2,1], index: 11, kind: output, shape index: {}]  }
   0x1   :  { %v16_v0 = vstv %s7121_s10 }
   0x2   :  { %17 = vst [vmem:[#allocation2] sm:$0x1] %v16_v0 }
   0x3   :  { %18 = vsyncpa [#allocation4], 0 }
   0x4   :  { %19 = vsyncpa [#allocation6], 0  ;;  %s5397_s19 = smov 0  }
   0x5 LB: > { %s5294_s20 = smov [#allocation3]   ;;  %s5403_s22 = sadd.s32 4294967295, %s5292_s19   ;;  %s5292_s19 = sphi %s5397_s19, %s25_s19  }
   0x6   : > { %s307_s21 = sshll.u32 %s5294_s20, 4  ;;  %p4410_p0 = scmp.ge.s32.totalorder %s5292_s19, 1  ;;  %s308_s21 = int_to_ptr.vmem [resolvable:$true] %s307_s21 }
   0x7   : > { %p292_p1 = scmp.lt.s32.totalorder %s5292_s19, 3  ;;  %p7123_p3 = scmp.eq.s32.totalorder %s5403_s22, 0 }
   0x8   : > { %s5295_s23 = smov [#allocation5]   ;;  %s5222_s28 = scalar_lea.hbm %s7113_s2, 9216 }
   0x9   : > { %p5407_p2 = pnand %p4410_p0, %p292_p1  ;;  %s335_s24 = sshll.u32 %s5295_s23, 4  ;;  %s5420_s24 = int_to_ptr.vmem [resolvable:$true] %s335_s24 }
   0xa   : > { %p5223_p6 = scmp.ne.s32.totalorder %s7113_s2, %s5222_s28  ;;  %p5229_p10 = scmp.lt.u32.totalorder %s5222_s28, %s7113_s2 }
   0xb   : > { %s7429_s10 = scalar_select %p5407_p2, 1, 0 }
   0xc   : > { %p5118_p4 = pneg %p5407_p2 }
   0xe   : > { %p5416_p5 = pnand %p7123_p3, %p5118_p4 }
  0x10   : > { %p5224_p7 = pneg %p5416_p5 }
  0x12   : > { %p5225_p8 = pnand %p5224_p7, %p5223_p6 }
  0x14   : > { %p5226_p9 = pneg %p5225_p8 }
  0x16   : > { %p5231_p11 = pnand %p5229_p10, %p5226_p9 }
  0x18   : > { %5234 = shalt.err (!%p5231_p11)
}
  0x19   : > { %s5235_s14 = scalar_lea.vmem %s308_s21, 9216  ;;  %p5243_p1 = scmp.lt.s32.totalorder %s308_s21, %s308_s21 }
  0x1a   : > { %p5236_p12 = scmp.ne.s32.totalorder %s308_s21, %s5235_s14  ;;  %p5244_p4 = scmp.lt.s32.totalorder %s5235_s14, %s5235_s14 }
  0x1c   : > { %p5238_p13 = pnand %p5236_p12, %p5224_p7  ;;  %p5245_p3 = por %p5244_p4, %p5243_p1 }
  0x1e   : > { %p5239_p0 = pneg %p5238_p13 }
  0x20   : > { %p5246_p2 = pnand %p5245_p3, %p5239_p0 }
  0x22   : > { %5249 = shalt.err (!%p5246_p2)
}
  0x23   : > { %s5296_s15 = smov 512   ;;  %s5297_s16 = smov 32  }
  0x24   : > { %5121 = dma.hbm_to_vmem [thread:$0]  (!%p5416_p5), %s7113_s2, 9216, %s308_s21, [#allocation4], %s5296_s15, %s5296_s15, %s5297_s16  }
  0x25   : > { %s5250_s26 = scalar_lea.hbm %s7119_s8, 256 }
  0x26   : > { %p5251_p6 = scmp.ne.s32.totalorder %s7119_s8, %s5250_s26  ;;  %p5257_p8 = scmp.lt.u32.totalorder %s5250_s26, %s7119_s8 }
  0x28   : > { %p5253_p2 = pnand %p5251_p6, %p5224_p7 }
  0x2a   : > { %p5254_p3 = pneg %p5253_p2 }
  0x2c   : > { %p5259_p9 = pnand %p5257_p8, %p5254_p3 }
  0x2e   : > { %5262 = shalt.err (!%p5259_p9)
}
  0x2f   : > { %s5263_s21 = scalar_lea.vmem %s5420_s24, 256  ;;  %p5271_p13 = scmp.lt.s32.totalorder %s5420_s24, %s5420_s24 }
  0x30   : > { %p5264_p10 = scmp.ne.s32.totalorder %s5420_s24, %s5263_s21  ;;  %p5272_p0 = scmp.lt.s32.totalorder %s5263_s21, %s5263_s21 }
  0x32   : > { %p5266_p11 = pnand %p5264_p10, %p5224_p7  ;;  %p5273_p1 = por %p5272_p0, %p5271_p13 }
  0x34   : > { %p5267_p12 = pneg %p5266_p11 }
  0x36   : > { %p5274_p4 = pnand %p5273_p1, %p5267_p12 }
  0x38   : > { %5277 = shalt.err (!%p5274_p4)
}
  0x39   : > { %s5298_s12 = smov 128   ;;  %s5299_s13 = smov 8  }
  0x3a   : > { %5124 = dma.hbm_to_vmem [thread:$0]  (!%p5416_p5), %s7119_s8, 256, %s5420_s24, [#allocation6], %s5298_s12, %s5298_s12, %s5299_s13  }
  0x3b   : > { %p7431_p6 = scmp.ne.s32.totalorder %s7429_s10, 0 }
  0x3d   : > { %365 = sbr.rel (%p7431_p6) target bundleno = 1665 (0x681), region = 64 }
  0x44   : > { %p7432_p7 = scmp.eq.s32.totalorder %s5403_s22, 0 }
  0x46   : > { %5283 = dma.done.wait (%p7432_p7), [#allocation4], 9216   ;;  %p7433_p2 = pmov %p7432_p7 }
  0x48   : > { %5285 = vsyncadd (%p7433_p2), [#allocation4], 4294958080  ;;  %p7434_p3 = pmov %p7433_p2 }
  0x49   : > { %p7435_p8 = pmov %p7433_p2 }
  0x4a   : > { %5287 = dma.done.wait (%p7434_p3), [#allocation6], 256  }
  0x4b   : > { %5289 = vsyncadd (%p7435_p8), [#allocation6], 4294967040  ;;  %p408_p9 = scmp.lt.s32.totalorder %s5403_s22, 1  ;;  %v7141_v1 = vmov 0.0   ;;  %vm421_vm0 = vcmask 64512   ;;  %v419_v4 = vld [vmem:[%s7112_s1] sm:$0xff] }
  0x4c   : > { %494 = vmatprep.mubr.f32.mxu0 %v7141_v1  ;;  %v423_v7 = vsel %vm421_vm0, %v419_v4, 0  ;;  %v420_v8 = vld [vmem:[%s7112_s1 + $0x8] sm:$0xff]  ;;  %v5500_v15 = vld [vmem:[#allocation3 + $0x18] sm:$0xff]  ;;  %v5544_v38 = vld [vmem:[#allocation3 + $0x10] sm:$0xff]  ;;  %vm1021_vm1 = vcmask 1041408   ;;  %vm1014_vm2 = vcmask 80896  }
  0x4d   : > { %s7937_s22 = smov (!%p408_p9, %s5403_s22), 1  ;;  %v943_v9 = vld [vmem:[#allocation3 + $0x8] sm:$0xff]  ;;  %v5498_v11 = vand.u32 4294901760, %v423_v7  ;;  %v426_v12 = vsel %vm421_vm0, %v420_v8, 0  ;;  %v5502_v16 = vld [vmem:[#allocation3 + $0x38] sm:$0xff]  ;;  %v7133_v20 = vand.u32 4294901760, %v5500_v15 }
  0x4e   : > { %s4427_s10 = sshll.u32 %s7937_s22, 4  ;;  %v947_v10 = vld [vmem:[#allocation3 + $0x28] sm:$0xff]  ;;  %v1034_v13 = vand.u32 4294901760, %v943_v9  ;;  %v5508_v18 = vand.u32 4294901760, %v426_v12  ;;  %v942_v21 = vld [vmem:[#allocation3] sm:$0xff]  ;;  %v7132_v30 = vand.u32 4294901760, %v5502_v16 }
  0x4f   : > { %s412_s16 = scalar_lea.vmem %s7111_s0, %s4427_s10  ;;  %v1038_v14 = vand.u32 4294901760, %v947_v10  ;;  %v946_v22 = vld [vmem:[#allocation3 + $0x20] sm:$0xff]  ;;  %v5516_v23 = vsub.f32 %v423_v7, %v5498_v11  ;;  %v5535_v32 = vsub.f32 %v5500_v15, %v7133_v20  ;;  %v1036_v33 = vand.u32 4294901760, %v942_v21  ;;  %v5546_v39 = vld [vmem:[#allocation3 + $0x30] sm:$0xff]  ;;  %v951_v40 = vld [vmem:[#allocation3 + $0x48] sm:$0xff]  ;;  %s5317_s25 = smov 115  }
  0x50   : > { %v418_v2 = vld [vmem:[%s412_s16 + $0x8] sm:$0xff]  ;;  %v417_v3 = vld [vmem:[%s412_s16] sm:$0xff]  ;;  %v5520_v25 = vsub.f32 %v943_v9, %v1034_v13  ;;  %v5525_v27 = vsub.f32 %v426_v12, %v5508_v18  ;;  %v1040_v34 = vand.u32 4294901760, %v946_v22  ;;  %v5554_v42 = vsub.f32 %v5502_v16, %v7132_v30  ;;  %v5573_v61 = vld [vmem:[#allocation3 + $0x50] sm:$0xff]  ;;  %s5318_s16 = smov 127   ;;  %s5319_s17 = smov 126  }
  0x51   : > { %v5491_v5 = vand.u32 4294901760, %v418_v2  ;;  %v5493_v6 = vand.u32 4294901760, %v417_v3  ;;  %v5518_v24 = vpack.c.bf16 %v1038_v14, %v1034_v13  ;;  %v5522_v26 = vsub.f32 %v947_v10, %v1038_v14  ;;  %v955_v45 = vld [vmem:[#allocation3 + $0x68] sm:$0xff]  ;;  %v5560_v46 = vld [vmem:[#allocation3 + $0x58] sm:$0xff]  ;;  %v950_v56 = vld [vmem:[#allocation3 + $0x40] sm:$0xff]  ;;  %s5320_s18 = smov 125  }
  0x52   : > { %7437 = vst [vmem:[#allocation10_spill] sm:$0xff] %v5520_v25  ;;  %v7136_v31 = vand.u32 4294901760, %v5516_v23  ;;  %v7134_v35 = vand.u32 4294901760, %v5525_v27  ;;  %v5556_v43 = vpack.c.bf16 %v1040_v34, %v1036_v33  ;;  %v5558_v44 = vsub.f32 %v942_v21, %v1036_v33  ;;  %v5567_v51 = vld [vmem:[#allocation3 + $0x78] sm:$0xff]  ;;  %v954_v60 = vld [vmem:[#allocation3 + $0x60] sm:$0xff]  ;;  %v959_v4 = vld [vmem:[#allocation3 + $0x88] sm:$0xff] }
  0x53   : > { %429 = vmatprep.subr.mxu0 %v5491_v5  ;;  %v5506_v17 = vsub.f32 %v417_v3, %v5493_v6  ;;  %v5511_v19 = vsub.f32 %v418_v2, %v5491_v5  ;;  %7436 = vst [vmem:[#allocation9_spill] sm:$0xff] %v5518_v24  ;;  %7438 = vst [vmem:[#allocation11_spill] sm:$0xff] %v5522_v26  ;;  %4555 = vmatprep.subr.bf16.mxu1 %v5518_v24  ;;  %v7130_v53 = vand.u32 4294901760, %v5544_v38  ;;  %v5588_v3 = vld [vmem:[#allocation3 + $0x70] sm:$0xff]  ;;  %v963_v7 = vld [vmem:[#allocation3 + $0xa8] sm:$0xff]  ;;  %s5321_s20 = smov 124  }
  0x54   : > { %431 = vmatpush1.msra.mxu0 %v5493_v6  ;;  %v498_v41 = vsub.f32 %v5516_v23, %v7136_v31  ;;  %7439 = vst [vmem:[#allocation12_spill] sm:$0xff] %v5556_v43  ;;  %v509_v47 = vsub.f32 %v5525_v27, %v7134_v35  ;;  %v5565_v50 = vsub.f32 %v946_v22, %v1040_v34  ;;  %v7129_v54 = vand.u32 4294901760, %v5546_v39  ;;  %v5595_v12 = vld [vmem:[#allocation3 + $0x98] sm:$0xff]  ;;  %v966_v35 = vld [vmem:[#allocation3 + $0xc0] sm:$0xff]  ;;  %s5322_s23 = smov 123   ;;  %s5323_s26 = smov 121  }
  0x55   : > { %v7137_v28 = vand.u32 4294901760, %v5511_v19  ;;  %v7135_v29 = vand.u32 4294901760, %v5506_v17  ;;  %4557 = vmatpush1.bf16.msra.mxu1 %v5556_v43  ;;  %v1042_v55 = vand.u32 4294901760, %v951_v40  ;;  %v1046_v58 = vand.u32 4294901760, %v955_v45  ;;  %v5661_v20 = vld [vmem:[#allocation3 + $0xf8] sm:$0xff]  ;;  %s5324_s27 = smov 122  }
  0x56   : > { %v499_v52 = vand.u32 4294901760, %v498_v41  ;;  %v510_v57 = vand.u32 4294901760, %v509_v47  ;;  %v7127_v59 = vand.u32 4294901760, %v5560_v46  ;;  %v5578_v62 = vsub.f32 %v5544_v38, %v7130_v53  ;;  %v958_v41 = vld [vmem:[#allocation3 + $0x80] sm:$0xff]  ;;  %s5325_s28 = smov 119   ;;  %s5326_s29 = smov 117  }
  0x57   : > { %v520_v36 = vsub.f32 %v5511_v19, %v7137_v28  ;;  %v526_v37 = vsub.f32 %v5506_v17, %v7135_v29  ;;  %v5583_v63 = vsub.f32 %v5546_v39, %v7129_v54  ;;  %v5585_v0 = vsub.f32 %v951_v40, %v1042_v55  ;;  %v5613_v40 = vld [vmem:[#allocation3 + $0xb8] sm:$0xff]  ;;  %v5687_v28 = vld [vmem:[#allocation3 + $0xf0] sm:$0xff]  ;;  %s5327_s30 = smov 120   ;;  %s5328_s21 = smov 114  }
  0x58   : > { %500 = vmatmul.mubr.f32.vlgmr.msra.gmra.mrb[0].mxu0 %v499_v52  ;;  %v7126_v2 = vand.u32 4294901760, %v5567_v51  ;;  %v5591_v8 = vpack.c.bf16 %v1046_v58, %v1042_v55  ;;  %v5593_v9 = vsub.f32 %v955_v45, %v1046_v58  ;;  %v1044_v10 = vand.u32 4294901760, %v950_v56  ;;  %v962_v52 = vld [vmem:[#allocation3 + $0xa0] sm:$0xff]  ;;  %v5625_v55 = vld [vmem:[#allocation3 + $0x90] sm:$0xff]  ;;  %v5648_v54 = vld [vmem:[#allocation3 + $0xd8] sm:$0xff]  ;;  %s5329_s12 = smov 113  }
  0x59   : > { %v521_v48 = vand.u32 4294901760, %v520_v36  ;;  %v527_v49 = vand.u32 4294901760, %v526_v37  ;;  %7440 = vst [vmem:[#allocation13_spill] sm:$0xff] %v5585_v0  ;;  %505 = vmatprep.mubr.f32.mxu0 %v7141_v1  ;;  %v5601_v13 = vsub.f32 %v5560_v46, %v7127_v59  ;;  %v1048_v21 = vand.u32 4294901760, %v954_v60  ;;  %s5330_s13 = smov 118   ;;  %s5331_s14 = smov 116  }
  0x5a   : > { %7441 = vst [vmem:[#allocation14_spill] sm:$0xff] %v5591_v8  ;;  %v5606_v14 = vsub.f32 %v5567_v51, %v7126_v2  ;;  %v7125_v22 = vand.u32 4294901760, %v5573_v61  ;;  %4559 = vmatprep.subr.bf16.mxu1 %v5591_v8  ;;  %v5610_v33 = vsub.f32 %v950_v56, %v1044_v10  ;;  %v7128_v34 = vand.u32 4294901760, %v5588_v3  ;;  %v967_v56 = vld [vmem:[#allocation3 + $0xc8] sm:$0xff] }
  0x5b   : > { %522 = vmatprep.subr.mxu0 %v521_v48  ;;  %7442 = vst [vmem:[#allocation15_spill] sm:$0xff] %v5601_v13  ;;  %v1050_v36 = vand.u32 4294901760, %v959_v4  ;;  %v1054_v37 = vand.u32 4294901760, %v963_v7  ;;  %v5615_v45 = vpack.c.bf16 %v1048_v21, %v1044_v10  ;;  %v5617_v47 = vsub.f32 %v954_v60, %v1048_v21  ;;  %v5637_v10 = vld [vmem:[#allocation3 + $0xb0] sm:$0xff]  ;;  %v971_v21 = vld [vmem:[#allocation3 + $0xe8] sm:$0xff] }
  0x5c   : > { %528 = vmatpush1.msra.mxu0 %v527_v49  ;;  %7443 = vst [vmem:[#allocation16_spill] sm:$0xff] %v5606_v14  ;;  %7444 = vst [vmem:[#allocation17_spill] sm:$0xff] %v5610_v33  ;;  %v5622_v48 = vsub.f32 %v5573_v61, %v7125_v22  ;;  %v7131_v49 = vand.u32 4294901760, %v5595_v12  ;;  %v7138_v2 = vand.u32 4294901760, %v5613_v40  ;;  %v1058_v53 = vand.u32 4294901760, %v967_v56 }
  0x5d   : > { %608 = vmatprep.subr.mxu0 %v5511_v19  ;;  %511 = vmatmul.mubr.f32.gmra.mrb[2].mxu0 %v510_v57  ;;  %7445 = vst [vmem:[#allocation18_spill] sm:$0xff] %v5615_v45  ;;  %7446 = vst [vmem:[#allocation19_spill] sm:$0xff] %v5617_v47  ;;  %v5631_v57 = vsub.f32 %v5588_v3, %v7128_v34  ;;  %v5633_v58 = vpack.c.bf16 %v1054_v37, %v1050_v36  ;;  %v1052_v34 = vand.u32 4294901760, %v958_v41  ;;  %vm3332_vm5 = vcmask 130048  }
  0x5e   : > { %7447 = vst [vmem:[#allocation20_spill] sm:$0xff] %v5622_v48  ;;  %591 = vmatprep.mubr.f32.mxu0 %v7141_v1  ;;  %v5635_v60 = vsub.f32 %v959_v4, %v1050_v36  ;;  %4561 = vmatpush1.bf16.msra.mxu1 %v5615_v45  ;;  %v5640_v22 = vsub.f32 %v963_v7, %v1054_v37  ;;  %v1056_v4 = vand.u32 4294901760, %v962_v52  ;;  %v1062_v30 = vand.u32 4294901760, %v971_v21  ;;  %v5670_v36 = vld [vmem:[#allocation3 + $0xd0] sm:$0xff]  ;;  %v979_v45 = vld [vmem:[#allocation3 + $0x128] sm:$0xff] }
  0x5f   : > { %7448 = vst [vmem:[#allocation21_spill] sm:$0xff] %v5631_v57  ;;  %7449 = vst [vmem:[#allocation22_spill] sm:$0xff] %v5633_v58  ;;  %v5646_v59 = vsub.f32 %v5595_v12, %v7131_v49  ;;  %4563 = vmatprep.subr.bf16.mxu1 %v5633_v58  ;;  %v5656_v7 = vsub.f32 %v5613_v40, %v7138_v2  ;;  %v5658_v37 = vsub.f32 %v958_v41, %v1052_v34  ;;  %v970_v2 = vld [vmem:[#allocation3 + $0xe0] sm:$0xff]  ;;  %v975_v41 = vld [vmem:[#allocation3 + $0x108] sm:$0xff]  ;;  %vm5333_vm6 = vmmov 0  }
  0x60   : > { %7450 = vst [vmem:[#allocation23_spill] sm:$0xff] %v5635_v60  ;;  %7451 = vst [vmem:[#allocation24_spill] sm:$0xff] %v5640_v22  ;;  %v5665_v29 = vpack.c.bf16 %v1056_v4, %v1052_v34  ;;  %v5667_v31 = vsub.f32 %v962_v52, %v1056_v4  ;;  %v7457_v49 = vand.u32 4294901760, %v5625_v55  ;;  %v5683_v52 = vpack.c.bf16 %v1062_v30, %v1058_v53  ;;  %v5761_v22 = vld [vmem:[#allocation3 + $0x178] sm:$0xff]  ;;  %v984_v57 = vld [vmem:[#allocation3 + $0x150] sm:$0xff] }
  0x61   : > { %7452 = vst [vmem:[#allocation25_spill] sm:$0xff] %v5646_v59  ;;  %593 = vmatmul.mubr.f32.vlgmr.msra.gmra.mrb[0].mxu0 %v5498_v11  ;;  %7453 = vst [vmem:[#allocation26_spill] sm:$0xff] %v5656_v7  ;;  %v5685_v4 = vsub.f32 %v967_v56, %v1058_v53  ;;  %v5690_v8 = vsub.f32 %v971_v21, %v1062_v30  ;;  %v7163_v43 = vand.u32 4294901760, %v5661_v20  ;;  %v1064_v53 = vand.u32 4294901760, %v970_v2 }
  0x62   : > { %7454 = vst [vmem:[#allocation27_spill] sm:$0xff] %v5658_v37  ;;  %598 = vmatprep.mubr.f32.mxu0 %v7141_v1  ;;  %611 = vmatpush1.msra.mxu0 %v5506_v17  ;;  %7455 = vst [vmem:[#allocation28_spill] sm:$0xff] %v5665_v29  ;;  %v5676_v58 = vsub.f32 %v5625_v55, %v7457_v49  ;;  %v7459_v1 = vand.u32 4294901760, %v5637_v10  ;;  %v7464_v49 = vand.u32 4294901760, %v5648_v54  ;;  %v7466_v30 = vmov 0.0  }
  0x63   : > { %7456 = vst [vmem:[#allocation29_spill] sm:$0xff] %v5667_v31  ;;  %692 = vmatprep.subr.mxu0 %v5491_v5  ;;  %7461 = vst [vmem:[#allocation32_spill] sm:$0xff] %v5683_v52  ;;  %4565 = vmatpush1.bf16.msra.mxu1 %v5665_v29  ;;  %v5707_v21 = vsub.f32 %v5661_v20, %v7163_v43  ;;  %v7168_v29 = vand.u32 4294901760, %v5687_v28  ;;  %v5716_v31 = vsub.f32 %v970_v2, %v1064_v53  ;;  %v983_v43 = vld [vmem:[#allocation3 + $0x148] sm:$0xff]  ;;  %v5734_v2 = vld [vmem:[#allocation3 + $0x110] sm:$0xff]  ;;  %vm4331_vm9 = vcmask 1024  }
  0x64   : > { %7458 = vst [vmem:[#allocation30_spill] sm:$0xff] %v5676_v58  ;;  %v5681_v34 = vsub.f32 %v5637_v10, %v7459_v1  ;;  %7462 = vst [vmem:[#allocation33_spill] sm:$0xff] %v5685_v4  ;;  %v5696_v24 = vsub.f32 %v5648_v54, %v7464_v49  ;;  %v1060_v1 = vand.u32 4294901760, %v966_v35  ;;  %4567 = vmatprep.subr.bf16.mxu1 %v5683_v52  ;;  %v1066_v4 = vand.u32 4294901760, %v975_v41  ;;  %v974_v52 = vld [vmem:[#allocation3 + $0x100] sm:$0xff] }
  0x65   : > { %7463 = vst [vmem:[#allocation34_spill] sm:$0xff] %v5690_v8  ;;  %600 = vmatmul.mubr.f32.gmra.mrb[2].mxu0 %v5508_v18  ;;  %7467 = vst [vmem:[#allocation36_spill] sm:$0xff] %v5707_v21  ;;  %v5712_v8 = vld [vmem:[#allocation3 + $0x138] sm:$0xff]  ;;  %v978_v58 = vld [vmem:[#allocation3 + $0x120] sm:$0xff]  ;;  %v7471_v37 = vand.u32 4294901760, %v5670_v36 }
  0x66   : > { %7460 = vst [vmem:[#allocation31_spill] sm:$0xff] %v5681_v34  ;;  %7465 = vst [vmem:[#allocation35_spill] sm:$0xff] %v5696_v24  ;;  %v5701_v34 = vld [vmem:[#allocation3 + $0x118] sm:$0xff]  ;;  %674 = vmatprep.mubr.f32.mxu0 %v7466_v30  ;;  %v5709_v49 = vsub.f32 %v966_v35, %v1060_v1  ;;  %v1070_v24 = vand.u32 4294901760, %v979_v45  ;;  %v5714_v56 = vpack.c.bf16 %v1064_v53, %v1060_v1  ;;  %v987_v21 = vld [vmem:[#allocation3 + $0x168] sm:$0xff] }
  0x67   : > { %7470 = vst [vmem:[#allocation39_spill] sm:$0xff] %v5716_v31  ;;  %v5721_v7 = vsub.f32 %v5670_v36, %v7471_v37  ;;  %v5726_v35 = vsub.f32 %v5687_v28, %v7168_v29  ;;  %v5730_v59 = vsub.f32 %v975_v41, %v1066_v4  ;;  %v5736_v53 = vld [vmem:[#allocation3 + $0x130] sm:$0xff]  ;;  %v7179_v37 = vand.u32 4294901760, %v5701_v34  ;;  %v5742_v31 = vld [vmem:[#allocation3 + $0x158] sm:$0xff] }
  0x68   : > { %7468 = vst [vmem:[#allocation37_spill] sm:$0xff] %v5709_v49  ;;  %7469 = vst [vmem:[#allocation38_spill] sm:$0xff] %v5714_v56  ;;  %v5728_v49 = vpack.c.bf16 %v1070_v24, %v1066_v4  ;;  %v5732_v1 = vsub.f32 %v979_v45, %v1070_v24  ;;  %4569 = vmatpush1.bf16.msra.mxu1 %v5714_v56  ;;  %v1068_v29 = vand.u32 4294901760, %v974_v52  ;;  %v1074_v24 = vand.u32 4294901760, %v983_v43 }
  0x69   : > { %7472 = vst [vmem:[#allocation40_spill] sm:$0xff] %v5721_v7  ;;  %7473 = vst [vmem:[#allocation41_spill] sm:$0xff] %v5726_v35  ;;  %677 = vmatmul.mubr.f32.vlgmr.msra.gmra.mrb[0].mxu0 %v5516_v23  ;;  %v7182_v7 = vand.u32 4294901760, %v5712_v8  ;;  %v1072_v35 = vand.u32 4294901760, %v978_v58  ;;  %v1078_v45 = vand.u32 4294901760, %v987_v21  ;;  %v7477_v41 = vand.u32 4294901760, %v5511_v19 }
  0x6a   : > { %7474 = vst [vmem:[#allocation42_spill] sm:$0xff] %v5728_v49  ;;  %7475 = vst [vmem:[#allocation43_spill] sm:$0xff] %v5730_v59  ;;  %682 = vmatprep.mubr.f32.mxu0 %v7466_v30  ;;  %694 = vmatpush1.msra.mxu0 %v5493_v6  ;;  %v5752_v4 = vsub.f32 %v5701_v34, %v7179_v37  ;;  %v7187_v59 = vand.u32 4294901760, %v5736_v53  ;;  %v982_v19 = vld [vmem:[#allocation3 + $0x140] sm:$0xff]  ;;  %v2056_v37 = vand.u32 4294901760, %v5742_v31 }
  0x6b   : > { %7476 = vst [vmem:[#allocation44_spill] sm:$0xff] %v5732_v1  ;;  %779 = vmatprep.subr.mxu0 %v7477_v41  ;;  %4571 = vmatprep.subr.bf16.mxu1 %v5728_v49  ;;  %v5757_v56 = vsub.f32 %v5712_v8, %v7182_v7  ;;  %v7185_v1 = vand.u32 4294901760, %v5734_v2  ;;  %v5763_v41 = vpack.c.bf16 %v1072_v35, %v1068_v29 }
  0x6c   : > { %7478 = vst [vmem:[#allocation45_spill] sm:$0xff] %v5752_v4  ;;  %v5765_v49 = vsub.f32 %v974_v52, %v1068_v29  ;;  %v5767_v60 = vsub.f32 %v978_v58, %v1072_v35  ;;  %v986_v4 = vld [vmem:[#allocation3 + $0x160] sm:$0xff]  ;;  %v5781_v29 = vpack.c.bf16 %v1078_v45, %v1074_v24  ;;  %v5783_v58 = vsub.f32 %v983_v43, %v1074_v24  ;;  %v988_v52 = vld [vmem:[#allocation3 + $0x170] sm:$0xff] }
  0x6d   : > { %7479 = vst [vmem:[#allocation46_spill] sm:$0xff] %v5757_v56  ;;  %7480 = vst [vmem:[#allocation47_spill] sm:$0xff] %v5763_v41  ;;  %685 = vmatmul.mubr.f32.gmra.mrb[2].mxu0 %v5525_v27  ;;  %v5774_v7 = vsub.f32 %v5734_v2, %v7185_v1  ;;  %v5779_v56 = vsub.f32 %v5736_v53, %v7187_v59  ;;  %4573 = vmatpush1.bf16.msra.mxu1 %v5763_v41  ;;  %v1080_v59 = vand.u32 4294901760, %v986_v4 }
  0x6e   : > { %7481 = vst [vmem:[#allocation48_spill] sm:$0xff] %v5765_v49  ;;  %7482 = vst [vmem:[#allocation49_spill] sm:$0xff] %v5767_v60  ;;  %757 = vmatprep.mubr.f32.mxu0 %v7466_v30  ;;  %v5787_v35 = vsub.f32 %v987_v21, %v1078_v45  ;;  %v2060_v60 = vand.u32 4294901760, %v5761_v22  ;;  %v5791_v1 = vsub.f32 %v5742_v31, %v2056_v37  ;;  %4575 = vmatprep.subr.bf16.mxu1 %v5781_v29 }
  0x6f   : > { %7483 = vst [vmem:[#allocation50_spill] sm:$0xff] %v5774_v7  ;;  %7484 = vst [vmem:[#allocation51_spill] sm:$0xff] %v5779_v56  ;;  %v1076_v7 = vand.u32 4294901760, %v982_v19  ;;  %v2058_v56 = vand.u32 4294901760, %v984_v57  ;;  %v7491_v41 = vand.u32 4294901760, %v5516_v23  ;;  %v5803_v45 = vsub.f32 %v986_v4, %v1080_v59 }
  0x70   : > { %7485 = vst [vmem:[#allocation52_spill] sm:$0xff] %v5781_v29  ;;  %7486 = vst [vmem:[#allocation53_spill] sm:$0xff] %v5783_v58  ;;  %v5795_v43 = vsub.f32 %v5761_v22, %v2060_v60  ;;  %v2062_v58 = vand.u32 4294901760, %v988_v52  ;;  %v7495_v29 = vand.u32 4294901760, %v5506_v17  ;;  %v7497_v23 = vand.u32 4294901760, %v5525_v27 }
  0x71   : > { %7487 = vst [vmem:[#allocation54_spill] sm:$0xff] %v5787_v35  ;;  %7488 = vst [vmem:[#allocation55_spill] sm:$0xff] %v5791_v1  ;;  %v5797_v24 = vsub.f32 %v982_v19, %v1076_v7  ;;  %761 = vmatmul.mubr.f32.vlgmr.msra.gmra.mrb[0].mxu0 %v7491_v41  ;;  %v5801_v21 = vpack.c.bf16 %v1080_v59, %v1076_v7  ;;  %v5805_v31 = vsub.f32 %v984_v57, %v2058_v56 }
  0x72   : > { %7489 = vst [vmem:[#allocation56_spill] sm:$0xff] %v5795_v43  ;;  %7493 = vst [vmem:[#allocation59_spill] sm:$0xff] %v5803_v45  ;;  %766 = vmatprep.mubr.f32.mxu0 %v7466_v30  ;;  %783 = vmatpush1.msra.mxu0 %v7495_v29  ;;  %v5810_v1 = vsub.f32 %v988_v52, %v2062_v58  ;;  %v7498_v59 = vand.u32 4294901760, %v5500_v15  ;;  %v7499_v22 = vand.u32 4294901760, %v5502_v16  ;;  %v7502_v15 = vand.u32 4294901760, %v5546_v39  ;;  %v1006_v45 = vld [vmem:[#allocation3 + $0x200] sm:$0xff] }
  0x73   : > { %7490 = vst [vmem:[#allocation57_spill] sm:$0xff] %v5797_v24  ;;  %7492 = vst [vmem:[#allocation58_spill] sm:$0xff] %v5801_v21  ;;  %862 = vmatprep.subr.mxu0 %v5491_v5  ;;  %4577 = vmatpush1.bf16.msra.mxu1 %v5801_v21  ;;  %v7501_v5 = vand.u32 4294901760, %v5544_v38  ;;  %v7504_v16 = vand.u32 4294901760, %v5560_v46  ;;  %v7505_v27 = vand.u32 4294901760, %v5567_v51  ;;  %v7508_v38 = vand.u32 4294901760, %v5588_v3 }
  0x74   : > { %7494 = vst [vmem:[#allocation60_spill] sm:$0xff] %v5805_v31  ;;  %7496 = vst [vmem:[#allocation61_spill] sm:$0xff] %v5810_v1  ;;  %v5821_v57 = vpack.c.bf16 %v7499_v22, %v7498_v59  ;;  %v7510_v39 = vand.u32 4294901760, %v5595_v12  ;;  %v7511_v46 = vand.u32 4294901760, %v5613_v40  ;;  %v7516_v3 = vand.u32 4294901760, %v5648_v54  ;;  %v993_v59 = vld [vmem:[#allocation3 + $0x198] sm:$0xff] }
  0x75   : > { %770 = vmatmul.mubr.f32.gmra.mrb[2].mxu0 %v7497_v23  ;;  %v5833_v17 = vpack.c.bf16 %v7502_v15, %v7501_v5  ;;  %v5839_v7 = vpack.c.bf16 %v7505_v27, %v7504_v16  ;;  %v7517_v12 = vand.u32 4294901760, %v5661_v20  ;;  %v7520_v40 = vand.u32 4294901760, %v5687_v28  ;;  %v990_v15 = vld [vmem:[#allocation3 + $0x180] sm:$0xff]  ;;  %v1009_v31 = vld [vmem:[#allocation3 + $0x218] sm:$0xff] }
  0x76   : > { %846 = vmatprep.mubr.f32.mxu0 %v7466_v30  ;;  %7500 = vst [vmem:[#allocation62_spill] sm:$0xff] %v5821_v57  ;;  %v5855_v51 = vpack.c.bf16 %v7511_v46, %v7510_v39  ;;  %v7525_v20 = vand.u32 4294901760, %v5734_v2  ;;  %v7526_v54 = vand.u32 4294901760, %v5736_v53  ;;  %v5894_v28 = vpack.c.bf16 %v2060_v60, %v2056_v37  ;;  %v997_v53 = vld [vmem:[#allocation3 + $0x1b8] sm:$0xff]  ;;  %v994_v16 = vld [vmem:[#allocation3 + $0x1a0] sm:$0xff] }
  0x77   : > { %7503 = vst [vmem:[#allocation63_spill] sm:$0xff] %v5833_v17  ;;  %7506 = vst [vmem:[#allocation64_spill] sm:$0xff] %v5839_v7  ;;  %v5870_v41 = vpack.c.bf16 %v7517_v12, %v7516_v3  ;;  %v2064_v5 = vand.u32 4294901760, %v993_v59  ;;  %v2068_v27 = vand.u32 4294901760, %v997_v53  ;;  %v1084_v60 = vand.u32 4294901760, %v990_v15  ;;  %v1003_v3 = vld [vmem:[#allocation3 + $0x1e8] sm:$0xff] }
  0x78   : > { %7512 = vst [vmem:[#allocation66_spill] sm:$0xff] %v5855_v51  ;;  %v5891_v23 = vpack.c.bf16 %v7526_v54, %v7525_v20  ;;  %7528 = vst [vmem:[#allocation72_spill] sm:$0xff] %v5894_v28  ;;  %v1088_v37 = vand.u32 4294901760, %v994_v16  ;;  %v1001_v12 = vld [vmem:[#allocation3 + $0x1d8] sm:$0xff]  ;;  %v998_v20 = vld [vmem:[#allocation3 + $0x1c0] sm:$0xff] }
  0x79   : > { %848 = vmatmul.mubr.f32.vlgmr.msra.gmra.mrb[0].mxu0 %v5498_v11  ;;  %7518 = vst [vmem:[#allocation68_spill] sm:$0xff] %v5870_v41  ;;  %v5903_v46 = vpack.c.bf16 %v2068_v27, %v2064_v5  ;;  %v1002_v54 = vld [vmem:[#allocation3 + $0x1e0] sm:$0xff]  ;;  %v1092_v21 = vand.u32 4294901760, %v998_v20  ;;  %v5924_v1 = vsub.f32 %v993_v59, %v2064_v5  ;;  %v5929_v43 = vsub.f32 %v990_v15, %v1084_v60 }
  0x7a   : > { %853 = vmatprep.mubr.f32.mxu0 %v7466_v30  ;;  %864 = vmatpush1.msra.mxu0 %v5493_v6  ;;  %v7507_v6 = vand.u32 4294901760, %v5573_v61  ;;  %v7514_v61 = vand.u32 4294901760, %v5637_v10  ;;  %v7523_v10 = vand.u32 4294901760, %v5712_v8  ;;  %7527 = vst [vmem:[#allocation71_spill] sm:$0xff] %v5891_v23  ;;  %v991_v8 = vld [vmem:[#allocation3 + $0x188] sm:$0xff]  ;;  %v5931_v35 = vsub.f32 %v994_v16, %v1088_v37 }
  0x7b   : > { %4771 = vmatprep.subr.bf16.mxu0 %v5821_v57  ;;  %v1082_v2 = vand.u32 4294901760, %v991_v8  ;;  %7531 = vst [vmem:[#allocation75_spill] sm:$0xff] %v5903_v46  ;;  %7538 = vst [vmem:[#allocation82_spill] sm:$0xff] %v5924_v1  ;;  %v1010_v24 = vld [vmem:[#allocation3 + $0x220] sm:$0x3]  ;;  %v1100_v15 = vand.u32 4294901760, %v1006_v45 }
  0x7c   : > { %v5848_v4 = vpack.c.bf16 %v7508_v38, %v7507_v6  ;;  %v992_v6 = vld [vmem:[#allocation3 + $0x190] sm:$0xff]  ;;  %7540 = vst [vmem:[#allocation84_spill] sm:$0xff] %v5929_v43  ;;  %7541 = vst [vmem:[#allocation85_spill] sm:$0xff] %v5931_v35  ;;  %v1023_v5 = vsel %vm1021_vm1, %v1010_v24, 0 }
  0x7d   : > { %855 = vmatmul.mubr.f32.gmra.mrb[2].mxu0 %v5508_v18  ;;  %v996_v38 = vld [vmem:[#allocation3 + $0x1b0] sm:$0xff] }
  0x7e   : > { %927 = vmatprep.mubr.f32.mxu0 %v7466_v30  ;;  %7509 = vst [vmem:[#allocation65_spill] sm:$0xff] %v5848_v4  ;;  %v2070_v39 = vand.u32 4294901760, %v996_v38  ;;  %v1008_v24 = vld [vmem:[#allocation3 + $0x210] sm:$0xff] }
  0x81   : > { %929 = vmatmul.mubr.f32.vlgmr.msra.gmra.mrb[0].mxu0 %v5498_v11  ;;  %v7513_v11 = vand.u32 4294901760, %v5625_v55  ;;  %v7522_v55 = vand.u32 4294901760, %v5701_v34  ;;  %v995_v34 = vld [vmem:[#allocation3 + $0x1a8] sm:$0xff] }
  0x82   : > { %934 = vmatprep.mubr.f32.mxu0 %v7466_v30  ;;  %4773 = vmatpush1.bf16.msra.mxu0 %v5833_v17  ;;  %v1086_v22 = vand.u32 4294901760, %v995_v34  ;;  %v2072_v30 = vand.u32 4294901760, %v1001_v12  ;;  %v5920_v17 = vsub.f32 %v991_v8, %v1082_v2 }
  0x83   : > { %4775 = vmatprep.subr.bf16.mxu0 %v5839_v7  ;;  %v5863_v19 = vpack.c.bf16 %v7514_v61, %v7513_v11  ;;  %v5884_v52 = vpack.c.bf16 %v7523_v10, %v7522_v55  ;;  %v5905_v11 = vpack.c.bf16 %v1088_v37, %v1084_v60  ;;  %v999_v61 = vld [vmem:[#allocation3 + $0x1c8] sm:$0xff]  ;;  %v1094_v55 = vand.u32 4294901760, %v1003_v3  ;;  %v1005_v10 = vld [vmem:[#allocation3 + $0x1f8] sm:$0xff] }
  0x84   : > { %v1013_v7 = vld [vmem:[#allocation3 + $0x238] sm:$0x3]  ;;  %v5922_v57 = vsub.f32 %v995_v34, %v1086_v22  ;;  %v5947_v60 = vsub.f32 %v1001_v12, %v2072_v30 }
  0x85   : > { %936 = vmatmul.mubr.f32.gmra.mrb[2].mxu0 %v5508_v18  ;;  %7515 = vst [vmem:[#allocation67_spill] sm:$0xff] %v5863_v19  ;;  %v7519_v18 = vand.u32 4294901760, %v5670_v36  ;;  %7524 = vst [vmem:[#allocation70_spill] sm:$0xff] %v5884_v52  ;;  %v5897_v36 = vpack.c.bf16 %v2062_v58, %v2058_v56  ;;  %v5901_v56 = vpack.c.bf16 %v1086_v22, %v1082_v2  ;;  %v2066_v58 = vand.u32 4294901760, %v992_v6 }
  0x86   : > { %4777 = vmatpush1.bf16.msra.mxu0 %v5848_v4  ;;  %7532 = vst [vmem:[#allocation76_spill] sm:$0xff] %v5905_v11  ;;  %7537 = vst [vmem:[#allocation81_spill] sm:$0xff] %v5922_v57  ;;  %v1032_v2 = vsel %vm1021_vm1, %v1013_v7, 0  ;;  %v2080_v22 = vand.u32 4294901760, %v1009_v31 }
  0x87   : > { %4779 = vmatprep.subr.bf16.mxu0 %v5855_v51  ;;  %v5877_v29 = vpack.c.bf16 %v7520_v40, %v7519_v18  ;;  %7529 = vst [vmem:[#allocation73_spill] sm:$0xff] %v5897_v36  ;;  %7530 = vst [vmem:[#allocation74_spill] sm:$0xff] %v5901_v56  ;;  %4579 = vmatprep.subr.bf16.mxu1 %v5901_v56  ;;  %v5908_v18 = vpack.c.bf16 %v2070_v39, %v2066_v58  ;;  %v1090_v40 = vand.u32 4294901760, %v999_v61 }
  0x88   : > { %4581 = vmatpush1.bf16.msra.mxu1 %v5905_v11  ;;  %v5933_v49 = vsub.f32 %v992_v6, %v2066_v58  ;;  %7547 = vst [vmem:[#allocation91_spill] sm:$0xff] %v5947_v60  ;;  %v5952_v6 = vsub.f32 %v998_v20, %v1092_v21  ;;  %v5968_v12 = vsub.f32 %v1009_v31, %v2080_v22 }
  0x89   : > { %7521 = vst [vmem:[#allocation69_spill] sm:$0xff] %v5877_v29  ;;  %7533 = vst [vmem:[#allocation77_spill] sm:$0xff] %v5908_v18  ;;  %v5913_v56 = vpack.c.bf16 %v1094_v55, %v1090_v40  ;;  %v5943_v16 = vsub.f32 %v999_v61, %v1090_v40  ;;  %v5972_v40 = vsub.f32 %v1006_v45, %v1100_v15 }
  0x8a   : > { %4781 = vmatpush1.bf16.msra.mxu0 %v5863_v19  ;;  %v1011_v19 = vld [vmem:[#allocation3 + $0x228] sm:$0x3]  ;;  %7542 = vst [vmem:[#allocation86_spill] sm:$0xff] %v5933_v49  ;;  %7549 = vst [vmem:[#allocation93_spill] sm:$0xff] %v5952_v6 }
  0x8b   : > { %4783 = vmatprep.subr.bf16.mxu0 %v5870_v41  ;;  %7534 = vst [vmem:[#allocation78_spill] sm:$0xff] %v5913_v56  ;;  %v1026_v11 = vsel %vm1021_vm1, %v1011_v19, 0  ;;  %4583 = vmatprep.subr.bf16.mxu1 %v5913_v56  ;;  %v5935_v19 = vsub.f32 %v996_v38, %v2070_v39  ;;  %7545 = vst [vmem:[#allocation89_spill] sm:$0xff] %v5943_v16  ;;  %v1012_v39 = vld [vmem:[#allocation3 + $0x230] sm:$0x3] }
  0x8c   : > { %v1102_v59 = vand.u32 4294901760, %v1026_v11  ;;  %7557 = vst [vmem:[#allocation101_spill] sm:$0xff] %v5968_v12  ;;  %7559 = vst [vmem:[#allocation103_spill] sm:$0xff] %v5972_v40 }
  0x8d   : > { %7543 = vst [vmem:[#allocation87_spill] sm:$0xff] %v5935_v19 }
  0x8e   : > { %4785 = vmatpush1.bf16.msra.mxu0 %v5877_v29 }
  0x8f   : > { %4787 = vmatprep.subr.bf16.mxu0 %v5884_v52  ;;  %v1004_v52 = vld [vmem:[#allocation3 + $0x1f0] sm:$0xff] }
  0x90   : > { %v2078_v41 = vand.u32 4294901760, %v1004_v52 }
  0x92   : > { %4789 = vmatpush1.bf16.msra.mxu0 %v5891_v23  ;;  %v1000_v23 = vld [vmem:[#allocation3 + $0x1d0] sm:$0xff]  ;;  %v5958_v58 = vsub.f32 %v1004_v52, %v2078_v41  ;;  %v7242_v52 = vand.u32 4294901760, %v5520_v25 }
  0x93   : > { %4791 = vmatprep.subr.bf16.mxu0 %v5894_v28  ;;  %v1096_v28 = vand.u32 4294901760, %v1002_v54  ;;  %v2074_v29 = vand.u32 4294901760, %v1000_v23 }
  0x94   : > { %7552 = vst [vmem:[#allocation96_spill] sm:$0xff] %v5958_v58 }
  0x95   : > { %v5917_v4 = vpack.c.bf16 %v1096_v28, %v1092_v21  ;;  %v5939_v8 = vpack.c.bf16 %v2078_v41, %v2074_v29  ;;  %v5954_v38 = vsub.f32 %v1002_v54, %v1096_v28  ;;  %v5956_v7 = vsub.f32 %v1000_v23, %v2074_v29 }
  0x96   : > { %4793 = vmatpush1.bf16.msra.mxu0 %v5897_v36  ;;  %v2076_v36 = vand.u32 4294901760, %v1005_v10  ;;  %v1104_v28 = vand.u32 4294901760, %v1023_v5  ;;  %v1029_v41 = vsel %vm1021_vm1, %v1012_v39, 0  ;;  %v2082_v29 = vand.u32 4294901760, %v1008_v24 }
  0x97   : > { %4795 = vmatprep.subr.bf16.mxu0 %v5903_v46  ;;  %7536 = vst [vmem:[#allocation80_spill] sm:$0xff] %v5917_v4  ;;  %v1007_v46 = vld [vmem:[#allocation3 + $0x208] sm:$0xff]  ;;  %4585 = vmatpush1.bf16.msra.mxu1 %v5917_v4  ;;  %7544 = vst [vmem:[#allocation88_spill] sm:$0xff] %v5939_v8  ;;  %v7240_v23 = vand.u32 4294901760, %v5522_v26  ;;  %v7237_v54 = vand.u32 4294901760, %v5554_v42 }
  0x98   : > { %v5915_v51 = vpack.c.bf16 %v2076_v36, %v2072_v30  ;;  %v1098_v34 = vand.u32 4294901760, %v1007_v46  ;;  %v5949_v37 = vsub.f32 %v1005_v10, %v2076_v36  ;;  %7550 = vst [vmem:[#allocation94_spill] sm:$0xff] %v5954_v38  ;;  %7551 = vst [vmem:[#allocation95_spill] sm:$0xff] %v5956_v7  ;;  %v5964_v30 = vsub.f32 %v1026_v11, %v1102_v59 }
  0x99   : > { %v5981_v31 = vsub.f32 %v1023_v5, %v1104_v28  ;;  %v2086_v11 = vand.u32 4294901760, %v1029_v41  ;;  %v5984_v45 = vsub.f32 %v1008_v24, %v2082_v29  ;;  %v1170_v10 = vsub.f32 %v5520_v25, %v7242_v52 }
  0x9a   : > { %4797 = vmatpush1.bf16.msra.mxu0 %v5908_v18  ;;  %7535 = vst [vmem:[#allocation79_spill] sm:$0xff] %v5915_v51  ;;  %v5926_v18 = vsub.f32 %v997_v53, %v2068_v27  ;;  %v2084_v53 = vand.u32 4294901760, %v1032_v2  ;;  %v5945_v27 = vsub.f32 %v1003_v3, %v1094_v55  ;;  %7548 = vst [vmem:[#allocation92_spill] sm:$0xff] %v5949_v37  ;;  %v7238_v55 = vand.u32 4294901760, %v5535_v32 }
  0x9b   : > { %4799 = vmatprep.subr.bf16.mxu0 %v5915_v51  ;;  %v5960_v61 = vpack.c.bf16 %v1102_v59, %v1098_v34  ;;  %v5962_v3 = vsub.f32 %v1007_v46, %v1098_v34  ;;  %7555 = vst [vmem:[#allocation99_spill] sm:$0xff] %v5964_v30  ;;  %v5979_v46 = vpack.c.bf16 %v1104_v28, %v1100_v15  ;;  %7561 = vst [vmem:[#allocation105_spill] sm:$0xff] %v5981_v31  ;;  %v7573_v51 = vld [vmem:[#allocation26_spill] sm:$0xff] }
  0x9c   : > { %7539 = vst [vmem:[#allocation83_spill] sm:$0xff] %v5926_v18  ;;  %7546 = vst [vmem:[#allocation90_spill] sm:$0xff] %v5945_v27  ;;  %v5966_v36 = vpack.c.bf16 %v2084_v53, %v2080_v22  ;;  %v5970_v21 = vsub.f32 %v1032_v2, %v2084_v53  ;;  %v1182_v20 = vsub.f32 %v5522_v26, %v7240_v23  ;;  %v7239_v22 = vand.u32 4294901760, %v5558_v44 }
  0x9d   : > { %7553 = vst [vmem:[#allocation97_spill] sm:$0xff] %v5960_v61  ;;  %7554 = vst [vmem:[#allocation98_spill] sm:$0xff] %v5962_v3  ;;  %4587 = vmatprep.subr.bf16.mxu1 %v5960_v61  ;;  %v5994_v34 = vpack.c.bf16 %v2086_v11, %v2082_v29  ;;  %v5996_v59 = vsub.f32 %v1029_v41, %v2086_v11  ;;  %v2152_v2 = vsub.f32 %v5535_v32, %v7238_v55 }
  0x9e   : > { %4801 = vmatpush1.bf16.msra.mxu0 %v5939_v8  ;;  %7556 = vst [vmem:[#allocation100_spill] sm:$0xff] %v5966_v36  ;;  %7558 = vst [vmem:[#allocation102_spill] sm:$0xff] %v5970_v21  ;;  %4589 = vmatpush1.bf16.msra.mxu1 %v5979_v46  ;;  %v1171_v53 = vand.u32 4294901760, %v1170_v10  ;;  %v1183_v5 = vand.u32 4294901760, %v1182_v20  ;;  %v2164_v15 = vsub.f32 %v5554_v42, %v7237_v54  ;;  %v7241_v24 = vand.u32 4294901760, %v5565_v50 }
  0x9f   : > { %4803 = vmatprep.subr.bf16.mxu0 %v5966_v36  ;;  %7560 = vst [vmem:[#allocation104_spill] sm:$0xff] %v5979_v46  ;;  %7562 = vst [vmem:[#allocation106_spill] sm:$0xff] %v5984_v45  ;;  %v2153_v39 = vand.u32 4294901760, %v2152_v2  ;;  %v1176_v28 = vsub.f32 %v5558_v44, %v7239_v22  ;;  %v7243_v41 = vand.u32 4294901760, %v5578_v62  ;;  %v7246_v29 = vand.u32 4294901760, %v5583_v63  ;;  %v7570_v36 = vld [vmem:[#allocation24_spill] sm:$0xff] }
  0xa0   : > { %7563 = vst [vmem:[#allocation107_spill] sm:$0xff] %v5994_v34  ;;  %7564 = vst [vmem:[#allocation108_spill] sm:$0xff] %v5996_v59  ;;  %v4590_v11 = vpack.c.bf16 %v1183_v5, %v1171_v53  ;;  %v2165_v10 = vand.u32 4294901760, %v2164_v15  ;;  %v1188_v20 = vsub.f32 %v5565_v50, %v7241_v24  ;;  %v7248_v54 = vand.u32 4294901760, %v5585_v0 }
  0xa1   : > { %v1177_v55 = vand.u32 4294901760, %v1176_v28  ;;  %v2158_v2 = vsub.f32 %v5578_v62, %v7243_v41  ;;  %v2170_v22 = vsub.f32 %v5583_v63, %v7246_v29  ;;  %v7247_v23 = vand.u32 4294901760, %v5593_v9 }
  0xa2   : > { %4805 = vmatpush1.bf16.msra.mxu0 %v5994_v34  ;;  %4591 = vmatprep.subr.bf16.mxu1 %v4590_v11  ;;  %v4806_v53 = vpack.c.bf16 %v2165_v10, %v2153_v39  ;;  %v1189_v5 = vand.u32 4294901760, %v1188_v20  ;;  %v1194_v15 = vsub.f32 %v5585_v0, %v7248_v54  ;;  %v7249_v24 = vand.u32 4294901760, %v5601_v13  ;;  %v7642_v0 = vld [vmem:[#allocation46_spill] sm:$0xff] }
  0xa3   : > { %v2159_v28 = vand.u32 4294901760, %v2158_v2  ;;  %v2171_v52 = vand.u32 4294901760, %v2170_v22  ;;  %v1206_v41 = vsub.f32 %v5593_v9, %v7247_v23  ;;  %v7250_v34 = vand.u32 4294901760, %v5606_v14 }
  0xa4   : > { %4807 = vmatprep.subr.bf16.mxu0 %v4806_v53  ;;  %v6031_v29 = vpack.c.bf16 %v1189_v5, %v1177_v55  ;;  %v1195_v11 = vand.u32 4294901760, %v1194_v15  ;;  %v2176_v39 = vsub.f32 %v5601_v13, %v7249_v24  ;;  %v7253_v10 = vand.u32 4294901760, %v5610_v33  ;;  %v7567_v5 = vld [vmem:[#allocation21_spill] sm:$0xff] }
  0xa5   : > { %v6037_v20 = vpack.c.bf16 %v2171_v52, %v2159_v28  ;;  %v1207_v2 = vand.u32 4294901760, %v1206_v41  ;;  %v2188_v22 = vsub.f32 %v5606_v14, %v7250_v34  ;;  %v7258_v23 = vand.u32 4294901760, %v5617_v47  ;;  %v7569_v28 = vld [vmem:[#allocation23_spill] sm:$0xff]  ;;  %v7632_v14 = vld [vmem:[#allocation34_spill] sm:$0xff] }
  0xa6   : > { %7565 = vst [vmem:[#allocation109_spill] sm:$0xff] %v6031_v29  ;;  %v2177_v54 = vand.u32 4294901760, %v2176_v39  ;;  %v1200_v55 = vsub.f32 %v5610_v33, %v7253_v10  ;;  %v7263_v53 = vand.u32 4294901760, %v5622_v48  ;;  %v7268_v15 = vand.u32 4294901760, %v7567_v5 }
  0xa7   : > { %7566 = vst [vmem:[#allocation110_spill] sm:$0xff] %v6037_v20  ;;  %v6048_v24 = vpack.c.bf16 %v1207_v2, %v1195_v11  ;;  %v2189_v52 = vand.u32 4294901760, %v2188_v22  ;;  %v1212_v41 = vsub.f32 %v5617_v47, %v7258_v23  ;;  %v7269_v34 = vand.u32 4294901760, %v7569_v28  ;;  %v7572_v23 = vld [vmem:[#allocation25_spill] sm:$0xff]  ;;  %v7648_v47 = vld [vmem:[#allocation55_spill] sm:$0xff] }
  0xa8   : > { %v1201_v46 = vand.u32 4294901760, %v1200_v55  ;;  %v2182_v39 = vsub.f32 %v5622_v48, %v7263_v53  ;;  %v2194_v10 = vsub.f32 %v7567_v5, %v7268_v15  ;;  %v7270_v61 = vand.u32 4294901760, %v7570_v36  ;;  %v7635_v48 = vld [vmem:[#allocation37_spill] sm:$0xff]  ;;  %v7636_v5 = vld [vmem:[#allocation39_spill] sm:$0xff] }
  0xa9   : > { %7568 = vst [vmem:[#allocation111_spill] sm:$0xff] %v6048_v24  ;;  %v6061_v11 = vpack.c.bf16 %v2189_v52, %v2177_v54  ;;  %v1213_v2 = vand.u32 4294901760, %v1212_v41  ;;  %v1218_v22 = vsub.f32 %v7569_v28, %v7269_v34  ;;  %v7271_v8 = vand.u32 4294901760, %v7572_v23  ;;  %v7575_v52 = vld [vmem:[#allocation27_spill] sm:$0xff] }
  0xaa   : > { %v2183_v55 = vand.u32 4294901760, %v2182_v39  ;;  %v2195_v4 = vand.u32 4294901760, %v2194_v10  ;;  %v1230_v53 = vsub.f32 %v7570_v36, %v7270_v61  ;;  %v7272_v56 = vand.u32 4294901760, %v7573_v51  ;;  %v7577_v39 = vld [vmem:[#allocation29_spill] sm:$0xff] }
  0xab   : > { %7571 = vst [vmem:[#allocation112_spill] sm:$0xff] %v6061_v11  ;;  %v6071_v15 = vpack.c.bf16 %v1213_v2, %v1201_v46  ;;  %v1219_v24 = vand.u32 4294901760, %v1218_v22  ;;  %v2200_v54 = vsub.f32 %v7572_v23, %v7271_v8  ;;  %v7273_v41 = vand.u32 4294901760, %v7575_v52  ;;  %v7578_v2 = vld [vmem:[#allocation30_spill] sm:$0xff] }
  0xac   : > { %v6077_v34 = vpack.c.bf16 %v2195_v4, %v2183_v55  ;;  %v1231_v11 = vand.u32 4294901760, %v1230_v53  ;;  %v2212_v10 = vsub.f32 %v7573_v51, %v7272_v56  ;;  %v7276_v61 = vand.u32 4294901760, %v7577_v39  ;;  %v7581_v55 = vld [vmem:[#allocation33_spill] sm:$0xff] }
  0xad   : > { %7574 = vst [vmem:[#allocation113_spill] sm:$0xff] %v6071_v15  ;;  %v2201_v20 = vand.u32 4294901760, %v2200_v54  ;;  %v1224_v46 = vsub.f32 %v7575_v52, %v7273_v41  ;;  %v7278_v22 = vand.u32 4294901760, %v7578_v2  ;;  %v7579_v15 = vld [vmem:[#allocation31_spill] sm:$0xff]  ;;  %v7283_v56 = vand.u32 4294901760, %v7581_v55  ;;  %v7582_v52 = vld [vmem:[#allocation34_spill] sm:$0xff] }
  0xae   : > { %7576 = vst [vmem:[#allocation114_spill] sm:$0xff] %v6077_v34  ;;  %v7281_v8 = vand.u32 4294901760, %v7579_v15  ;;  %v6088_v29 = vpack.c.bf16 %v1231_v11, %v1219_v24  ;;  %v2213_v4 = vand.u32 4294901760, %v2212_v10  ;;  %v1236_v53 = vsub.f32 %v7577_v39, %v7276_v61  ;;  %v7584_v61 = vld [vmem:[#allocation35_spill] sm:$0xff] }
  0xaf   : > { %v1225_v34 = vand.u32 4294901760, %v1224_v46  ;;  %v2206_v54 = vsub.f32 %v7578_v2, %v7278_v22  ;;  %v7284_v51 = vand.u32 4294901760, %v7582_v52  ;;  %v1242_v10 = vsub.f32 %v7581_v55, %v7283_v56  ;;  %v7585_v2 = vld [vmem:[#allocation36_spill] sm:$0xff] }
  0xb0   : > { %7580 = vst [vmem:[#allocation115_spill] sm:$0xff] %v6088_v29  ;;  %v2218_v41 = vsub.f32 %v7579_v15, %v7281_v8  ;;  %v6101_v24 = vpack.c.bf16 %v2213_v4, %v2201_v20  ;;  %v1237_v11 = vand.u32 4294901760, %v1236_v53  ;;  %v7286_v29 = vand.u32 4294901760, %v7584_v61  ;;  %v7587_v4 = vld [vmem:[#allocation37_spill] sm:$0xff] }
  0xb1   : > { %v2207_v46 = vand.u32 4294901760, %v2206_v54  ;;  %v1254_v22 = vsub.f32 %v7582_v52, %v7284_v51  ;;  %v7288_v23 = vand.u32 4294901760, %v7585_v2  ;;  %v1243_v15 = vand.u32 4294901760, %v1242_v10  ;;  %v7589_v54 = vld [vmem:[#allocation39_spill] sm:$0xff] }
  0xb2   : > { %7583 = vst [vmem:[#allocation116_spill] sm:$0xff] %v6101_v24  ;;  %v2219_v39 = vand.u32 4294901760, %v2218_v41  ;;  %v6111_v8 = vpack.c.bf16 %v1237_v11, %v1225_v34  ;;  %v2224_v20 = vsub.f32 %v7584_v61, %v7286_v29  ;;  %v7289_v53 = vand.u32 4294901760, %v7587_v4  ;;  %v7590_v11 = vld [vmem:[#allocation40_spill] sm:$0xff] }
  0xb3   : > { %v1255_v24 = vand.u32 4294901760, %v1254_v22  ;;  %v2236_v41 = vsub.f32 %v7585_v2, %v7288_v23  ;;  %v7292_v51 = vand.u32 4294901760, %v7589_v54  ;;  %v7294_v10 = vand.u32 4294901760, %v7590_v11 }
  0xb4   : > { %7586 = vst [vmem:[#allocation117_spill] sm:$0xff] %v6111_v8  ;;  %v6117_v56 = vpack.c.bf16 %v2219_v39, %v2207_v46  ;;  %v2225_v52 = vand.u32 4294901760, %v2224_v20  ;;  %v1248_v34 = vsub.f32 %v7587_v4, %v7289_v53  ;;  %v7591_v8 = vld [vmem:[#allocation41_spill] sm:$0xff]  ;;  %v7593_v46 = vld [vmem:[#allocation43_spill] sm:$0xff]  ;;  %v7594_v4 = vld [vmem:[#allocation44_spill] sm:$0xff] }
  0xb5   : > { %v7297_v29 = vand.u32 4294901760, %v7591_v8  ;;  %v6128_v61 = vpack.c.bf16 %v1255_v24, %v1243_v15  ;;  %v2237_v39 = vand.u32 4294901760, %v2236_v41  ;;  %v1260_v22 = vsub.f32 %v7589_v54, %v7292_v51  ;;  %v7596_v51 = vld [vmem:[#allocation45_spill] sm:$0xff] }
  0xb6   : > { %7588 = vst [vmem:[#allocation118_spill] sm:$0xff] %v6117_v56  ;;  %v7299_v23 = vand.u32 4294901760, %v7593_v46  ;;  %v1249_v56 = vand.u32 4294901760, %v1248_v34  ;;  %v2230_v20 = vsub.f32 %v7590_v11, %v7294_v10  ;;  %v7300_v2 = vand.u32 4294901760, %v7594_v4  ;;  %v7597_v11 = vld [vmem:[#allocation46_spill] sm:$0xff] }
  0xb7   : > { %7592 = vst [vmem:[#allocation119_spill] sm:$0xff] %v6128_v61  ;;  %v2242_v53 = vsub.f32 %v7591_v8, %v7297_v29  ;;  %v6141_v15 = vpack.c.bf16 %v2237_v39, %v2225_v52  ;;  %v1261_v24 = vand.u32 4294901760, %v1260_v22  ;;  %v7302_v61 = vand.u32 4294901760, %v7596_v51  ;;  %v7599_v39 = vld [vmem:[#allocation48_spill] sm:$0xff] }
  0xb8   : > { %v1266_v41 = vsub.f32 %v7593_v46, %v7299_v23  ;;  %v2231_v34 = vand.u32 4294901760, %v2230_v20  ;;  %v1278_v10 = vsub.f32 %v7594_v4, %v7300_v2  ;;  %v7304_v55 = vand.u32 4294901760, %v7597_v11  ;;  %v7601_v20 = vld [vmem:[#allocation49_spill] sm:$0xff] }
  0xb9   : > { %7595 = vst [vmem:[#allocation120_spill] sm:$0xff] %v6141_v15  ;;  %v2243_v54 = vand.u32 4294901760, %v2242_v53  ;;  %v6151_v29 = vpack.c.bf16 %v1261_v24, %v1249_v56  ;;  %v2248_v52 = vsub.f32 %v7596_v51, %v7302_v61  ;;  %v7305_v22 = vand.u32 4294901760, %v7599_v39  ;;  %v7602_v24 = vld [vmem:[#allocation50_spill] sm:$0xff] }
  0xba   : > { %v1267_v8 = vand.u32 4294901760, %v1266_v41  ;;  %v1279_v15 = vand.u32 4294901760, %v1278_v10  ;;  %v2260_v53 = vsub.f32 %v7597_v11, %v7304_v55  ;;  %v7308_v2 = vand.u32 4294901760, %v7601_v20 }
  0xbb   : > { %7598 = vst [vmem:[#allocation121_spill] sm:$0xff] %v6151_v29  ;;  %v6157_v23 = vpack.c.bf16 %v2243_v54, %v2231_v34  ;;  %v2249_v4 = vand.u32 4294901760, %v2248_v52  ;;  %v1272_v56 = vsub.f32 %v7599_v39, %v7305_v22  ;;  %v7310_v41 = vand.u32 4294901760, %v7602_v24  ;;  %v7603_v29 = vld [vmem:[#allocation51_spill] sm:$0xff]  ;;  %v7605_v34 = vld [vmem:[#allocation53_spill] sm:$0xff]  ;;  %v7606_v39 = vld [vmem:[#allocation54_spill] sm:$0xff] }
  0xbc   : > { %v7313_v61 = vand.u32 4294901760, %v7603_v29  ;;  %v6168_v51 = vpack.c.bf16 %v1279_v15, %v1267_v8  ;;  %v2261_v54 = vand.u32 4294901760, %v2260_v53  ;;  %v1284_v10 = vsub.f32 %v7601_v20, %v7308_v2  ;;  %v7608_v2 = vld [vmem:[#allocation55_spill] sm:$0xff] }
  0xbd   : > { %7600 = vst [vmem:[#allocation122_spill] sm:$0xff] %v6157_v23  ;;  %v7315_v55 = vand.u32 4294901760, %v7605_v34  ;;  %v1273_v23 = vand.u32 4294901760, %v1272_v56  ;;  %v2254_v52 = vsub.f32 %v7602_v24, %v7310_v41  ;;  %v7316_v11 = vand.u32 4294901760, %v7606_v39  ;;  %v7609_v24 = vld [vmem:[#allocation56_spill] sm:$0xff] }
  0xbe   : > { %7604 = vst [vmem:[#allocation123_spill] sm:$0xff] %v6168_v51  ;;  %v2266_v22 = vsub.f32 %v7603_v29, %v7313_v61  ;;  %v6181_v8 = vpack.c.bf16 %v2261_v54, %v2249_v4  ;;  %v1285_v15 = vand.u32 4294901760, %v1284_v10  ;;  %v7318_v51 = vand.u32 4294901760, %v7608_v2  ;;  %v7611_v54 = vld [vmem:[#allocation57_spill] sm:$0xff] }
  0xbf   : > { %v1290_v53 = vsub.f32 %v7605_v34, %v7315_v55  ;;  %v2255_v56 = vand.u32 4294901760, %v2254_v52  ;;  %v1302_v41 = vsub.f32 %v7606_v39, %v7316_v11  ;;  %v7320_v46 = vand.u32 4294901760, %v7609_v24  ;;  %v7613_v52 = vld [vmem:[#allocation59_spill] sm:$0xff] }
  0xc0   : > { %7607 = vst [vmem:[#allocation53_spill] sm:$0xff] %v6181_v8  ;;  %v2267_v20 = vand.u32 4294901760, %v2266_v22  ;;  %v6191_v61 = vpack.c.bf16 %v1285_v15, %v1273_v23  ;;  %v2272_v4 = vsub.f32 %v7608_v2, %v7318_v51  ;;  %v7321_v10 = vand.u32 4294901760, %v7611_v54  ;;  %v7614_v15 = vld [vmem:[#allocation60_spill] sm:$0xff] }
  0xc1   : > { %v1291_v29 = vand.u32 4294901760, %v1290_v53  ;;  %v1303_v8 = vand.u32 4294901760, %v1302_v41  ;;  %v2284_v22 = vsub.f32 %v7609_v24, %v7320_v46  ;;  %v7322_v11 = vand.u32 4294901760, %v7613_v52 }
  0xc2   : > { %7610 = vst [vmem:[#allocation56_spill] sm:$0xff] %v6191_v61  ;;  %v6197_v55 = vpack.c.bf16 %v2267_v20, %v2255_v56  ;;  %v2273_v39 = vand.u32 4294901760, %v2272_v4  ;;  %v1296_v23 = vsub.f32 %v7611_v54, %v7321_v10  ;;  %v7323_v53 = vand.u32 4294901760, %v7614_v15  ;;  %v7615_v61 = vld [vmem:[#allocation61_spill] sm:$0xff] }
  0xc3   : > { %v7325_v51 = vand.u32 4294901760, %v7615_v61  ;;  %v6208_v2 = vpack.c.bf16 %v1303_v8, %v1291_v29  ;;  %v2285_v20 = vand.u32 4294901760, %v2284_v22  ;;  %v1308_v41 = vsub.f32 %v7613_v52, %v7322_v11 }
  0xc4   : > { %7612 = vst [vmem:[#allocation57_spill] sm:$0xff] %v6197_v55  ;;  %v7327_v56 = vand.u32 4294901760, %v5920_v17  ;;  %v1297_v46 = vand.u32 4294901760, %v1296_v23  ;;  %v2278_v4 = vsub.f32 %v7614_v15, %v7323_v53  ;;  %v7328_v55 = vand.u32 4294901760, %v5922_v57 }
  0xc5   : > { %7616 = vst [vmem:[#allocation59_spill] sm:$0xff] %v6208_v2  ;;  %v2290_v10 = vsub.f32 %v7615_v61, %v7325_v51  ;;  %v6221_v29 = vpack.c.bf16 %v2285_v20, %v2273_v39  ;;  %v1309_v8 = vand.u32 4294901760, %v1308_v41  ;;  %v7329_v11 = vand.u32 4294901760, %v5924_v1 }
  0xc6   : > { %v1314_v22 = vsub.f32 %v5920_v17, %v7327_v56  ;;  %v2279_v23 = vand.u32 4294901760, %v2278_v4  ;;  %v1326_v53 = vsub.f32 %v5922_v57, %v7328_v55  ;;  %v7330_v15 = vand.u32 4294901760, %v5926_v18 }
  0xc7   : > { %7617 = vst [vmem:[#allocation124_spill] sm:$0xff] %v6221_v29  ;;  %v2291_v2 = vand.u32 4294901760, %v2290_v10  ;;  %v6231_v51 = vpack.c.bf16 %v1309_v8, %v1297_v46  ;;  %v2296_v39 = vsub.f32 %v5924_v1, %v7329_v11  ;;  %v7331_v20 = vand.u32 4294901760, %v5929_v43 }
  0xc8   : > { %v1315_v61 = vand.u32 4294901760, %v1314_v22  ;;  %v1327_v56 = vand.u32 4294901760, %v1326_v53  ;;  %v2308_v10 = vsub.f32 %v5926_v18, %v7330_v15  ;;  %v7332_v4 = vand.u32 4294901760, %v5931_v35 }
  0xc9   : > { %7618 = vst [vmem:[#allocation125_spill] sm:$0xff] %v6231_v51  ;;  %v6237_v41 = vpack.c.bf16 %v2291_v2, %v2279_v23  ;;  %v2297_v55 = vand.u32 4294901760, %v2296_v39  ;;  %v1320_v46 = vsub.f32 %v5929_v43, %v7331_v20  ;;  %v7333_v8 = vand.u32 4294901760, %v5933_v49 }
  0xca   : > { %v7334_v22 = vand.u32 4294901760, %v5935_v19  ;;  %v6248_v11 = vpack.c.bf16 %v1327_v56, %v1315_v61  ;;  %v2309_v2 = vand.u32 4294901760, %v2308_v10  ;;  %v1332_v53 = vsub.f32 %v5931_v35, %v7332_v4 }
  0xcb   : > { %7619 = vst [vmem:[#allocation126_spill] sm:$0xff] %v6237_v41  ;;  %v7335_v23 = vand.u32 4294901760, %v5943_v16  ;;  %v1321_v15 = vand.u32 4294901760, %v1320_v46  ;;  %v2302_v39 = vsub.f32 %v5933_v49, %v7333_v8  ;;  %v7336_v41 = vand.u32 4294901760, %v5945_v27 }
  0xcc   : > { %7620 = vst [vmem:[#allocation127_spill] sm:$0xff] %v6248_v11  ;;  %v2314_v20 = vsub.f32 %v5935_v19, %v7334_v22  ;;  %v6261_v61 = vpack.c.bf16 %v2309_v2, %v2297_v55  ;;  %v1333_v56 = vand.u32 4294901760, %v1332_v53  ;;  %v7337_v4 = vand.u32 4294901760, %v5947_v60 }
  0xcd   : > { %v1338_v10 = vsub.f32 %v5943_v16, %v7335_v23  ;;  %v2303_v46 = vand.u32 4294901760, %v2302_v39  ;;  %v1350_v8 = vsub.f32 %v5945_v27, %v7336_v41  ;;  %v7338_v51 = vand.u32 4294901760, %v5949_v37 }
  0xce   : > { %7621 = vst [vmem:[#allocation128_spill] sm:$0xff] %v6261_v61  ;;  %v2315_v11 = vand.u32 4294901760, %v2314_v20  ;;  %v6271_v22 = vpack.c.bf16 %v1333_v56, %v1321_v15  ;;  %v2320_v55 = vsub.f32 %v5947_v60, %v7337_v4  ;;  %v7339_v2 = vand.u32 4294901760, %v5952_v6 }
  0xcf   : > { %v1339_v29 = vand.u32 4294901760, %v1338_v10  ;;  %v1351_v23 = vand.u32 4294901760, %v1350_v8  ;;  %v2332_v20 = vsub.f32 %v5949_v37, %v7338_v51  ;;  %v7340_v39 = vand.u32 4294901760, %v5954_v38 }
  0xd0   : > { %7622 = vst [vmem:[#allocation129_spill] sm:$0xff] %v6271_v22  ;;  %v6277_v53 = vpack.c.bf16 %v2315_v11, %v2303_v46  ;;  %v2321_v41 = vand.u32 4294901760, %v2320_v55  ;;  %v1344_v15 = vsub.f32 %v5952_v6, %v7339_v2  ;;  %v7341_v56 = vand.u32 4294901760, %v5956_v7 }
  0xd1   : > { %v7342_v10 = vand.u32 4294901760, %v5958_v58  ;;  %v6288_v4 = vpack.c.bf16 %v1351_v23, %v1339_v29  ;;  %v2333_v11 = vand.u32 4294901760, %v2332_v20  ;;  %v1356_v8 = vsub.f32 %v5954_v38, %v7340_v39 }
  0xd2   : > { %7623 = vst [vmem:[#allocation130_spill] sm:$0xff] %v6277_v53  ;;  %v7343_v46 = vand.u32 4294901760, %v5962_v3  ;;  %v1345_v51 = vand.u32 4294901760, %v1344_v15  ;;  %v2326_v55 = vsub.f32 %v5956_v7, %v7341_v56  ;;  %v7344_v53 = vand.u32 4294901760, %v5964_v30 }
  0xd3   : > { %7624 = vst [vmem:[#allocation131_spill] sm:$0xff] %v6288_v4  ;;  %v2338_v2 = vsub.f32 %v5958_v58, %v7342_v10  ;;  %v6301_v29 = vpack.c.bf16 %v2333_v11, %v2321_v41  ;;  %v1357_v23 = vand.u32 4294901760, %v1356_v8  ;;  %v7345_v39 = vand.u32 4294901760, %v5968_v12  ;;  %v7662_v58 = vld [vmem:[#allocation112_spill] sm:$0xff] }
  0xd4   : > { %v1362_v20 = vsub.f32 %v5962_v3, %v7343_v46  ;;  %v2327_v15 = vand.u32 4294901760, %v2326_v55  ;;  %v1374_v56 = vsub.f32 %v5964_v30, %v7344_v53  ;;  %v7346_v22 = vand.u32 4294901760, %v5970_v21 }
  0xd5   : > { %v2339_v4 = vand.u32 4294901760, %v2338_v2  ;;  %v6311_v10 = vpack.c.bf16 %v1357_v23, %v1345_v51  ;;  %v2344_v41 = vsub.f32 %v5968_v12, %v7345_v39  ;;  %v7347_v11 = vand.u32 4294901760, %v5972_v40 }
  0xd6   : > { %v1363_v61 = vand.u32 4294901760, %v1362_v20  ;;  %v1375_v46 = vand.u32 4294901760, %v1374_v56  ;;  %v2356_v2 = vsub.f32 %v5970_v21, %v7346_v22  ;;  %v7348_v55 = vand.u32 4294901760, %v5981_v31 }
  0xd7   : > { %v6317_v8 = vpack.c.bf16 %v2339_v4, %v2327_v15  ;;  %v2345_v53 = vand.u32 4294901760, %v2344_v41  ;;  %v1368_v51 = vsub.f32 %v5972_v40, %v7347_v11  ;;  %v7351_v23 = vand.u32 4294901760, %v5984_v45 }
  0xd8   : > { %v7352_v20 = vand.u32 4294901760, %v5996_v59  ;;  %v6328_v39 = vpack.c.bf16 %v1375_v46, %v1363_v61  ;;  %v2357_v4 = vand.u32 4294901760, %v2356_v2  ;;  %v1380_v56 = vsub.f32 %v5981_v31, %v7348_v55  ;;  %v7640_v55 = vld [vmem:[#allocation44_spill] sm:$0xff] }
  0xd9   : > { %v1369_v22 = vand.u32 4294901760, %v1368_v51  ;;  %v2350_v41 = vsub.f32 %v5984_v45, %v7351_v23  ;;  %v7643_v61 = vld [vmem:[#allocation48_spill] sm:$0xff] }
  0xda   : > { %v2362_v11 = vsub.f32 %v5996_v59, %v7352_v20  ;;  %v6343_v46 = vpack.c.bf16 %v2357_v4, %v2345_v53  ;;  %v1381_v2 = vand.u32 4294901760, %v1380_v56  ;;  %v7646_v53 = vld [vmem:[#allocation51_spill] sm:$0xff]  ;;  %v7647_v4 = vld [vmem:[#allocation54_spill] sm:$0xff] }
  0xdb   : > { %v2351_v15 = vand.u32 4294901760, %v2350_v41  ;;  %v7641_v41 = vld [vmem:[#allocation45_spill] sm:$0xff] }
  0xdc   : > { %v2363_v25 = vand.u32 4294901760, %v2362_v11  ;;  %v6353_v26 = vpack.c.bf16 %v1381_v2, %v1369_v22  ;;  %v7644_v2 = vld [vmem:[#allocation49_spill] sm:$0xff]  ;;  %v7645_v22 = vld [vmem:[#allocation50_spill] sm:$0xff] }
  0xdd   : > { %v7650_v11 = vld [vmem:[#allocation61_spill] sm:$0xff] }
  0xde   : > { %v6361_v51 = vpack.c.bf16 %v2363_v25, %v2351_v15  ;;  %v7638_v15 = vld [vmem:[#allocation41_spill] sm:$0xff]  ;;  %v7649_v25 = vld [vmem:[#allocation60_spill] sm:$0xff] }
 0x154   : > { %v930_v28 = vpop.f32.mrb[0].mxu0 }
 0x155   : > { %v6417_v60 = vand.u32 4294901760, %v930_v28  ;;  %v932_v36 = vpop.f32.mrb[1].mxu0 }
 0x156   : > { %v1016_v6 = vsel %vm1014_vm2, %v932_v36, 0 }
 0x157   : > { %7651 = vst [vmem:[#allocation34_spill] sm:$0xff] %v6417_v60  ;;  %v6420_v23 = vsub.f32 %v930_v28, %v6417_v60  ;;  %v6422_v7 = vand.u32 4294901760, %v1016_v6 }
 0x158   : > { %v937_v20 = vpop.f32.mrb[2].mxu0 }
 0x159   : > { %7652 = vst [vmem:[#allocation37_spill] sm:$0xff] %v6420_v23  ;;  %7653 = vst [vmem:[#allocation39_spill] sm:$0xff] %v6422_v7  ;;  %v6425_v13 = vsub.f32 %v1016_v6, %v6422_v7  ;;  %v6427_v12 = vand.u32 4294901760, %v937_v20  ;;  %v939_v33 = vpop.f32.mrb[3].mxu0  ;;  %v6430_v56 = vand.u32 4294901760, %v6420_v23 }
 0x15a   : > { %v1019_v45 = vsel %vm1014_vm2, %v939_v33, 0 }
 0x15b   : > { %7654 = vst [vmem:[#allocation41_spill] sm:$0xff] %v6427_v12  ;;  %7655 = vst [vmem:[#allocation44_spill] sm:$0xff] %v6430_v56  ;;  %v6433_v59 = vsub.f32 %v937_v20, %v6427_v12  ;;  %v6435_v36 = vand.u32 4294901760, %v1019_v45  ;;  %v6438_v28 = vand.u32 4294901760, %v6425_v13  ;;  %v1143_v40 = vsub.f32 %v6420_v23, %v6430_v56  ;;  %v7659_v56 = vld [vmem:[#allocation109_spill] sm:$0xff] }
 0x15d   : > { %7656 = vst [vmem:[#allocation45_spill] sm:$0xff] %v6435_v36  ;;  %7657 = vst [vmem:[#allocation46_spill] sm:$0xff] %v6438_v28  ;;  %v6443_v6 = vsub.f32 %v1019_v45, %v6435_v36  ;;  %v1137_v31 = vsub.f32 %v6425_v13, %v6438_v28  ;;  %v6448_v21 = vand.u32 4294901760, %v6433_v59  ;;  %v1144_v3 = vand.u32 4294901760, %v1143_v40  ;;  %v7660_v28 = vld [vmem:[#allocation110_spill] sm:$0xff] }
 0x15f   : > { %7658 = vst [vmem:[#allocation48_spill] sm:$0xff] %v6448_v21  ;;  %v1138_v33 = vand.u32 4294901760, %v1137_v31  ;;  %v6451_v20 = vand.u32 4294901760, %v6443_v6  ;;  %v1159_v30 = vsub.f32 %v6433_v59, %v6448_v21  ;;  %v7661_v31 = vld [vmem:[#allocation111_spill] sm:$0xff]  ;;  %v7664_v21 = vld [vmem:[#allocation114_spill] sm:$0xff] }
 0x161   : > { %1139 = vmatprep.mubr.f32.mxu1 %v1138_v33  ;;  %2121 = vmatprep.mubr.f32.mxu0 %v1138_v33  ;;  %v1153_v45 = vsub.f32 %v6443_v6, %v6451_v20  ;;  %v1160_v40 = vand.u32 4294901760, %v1159_v30  ;;  %v7663_v33 = vld [vmem:[#allocation113_spill] sm:$0xff]  ;;  %v7669_v30 = vld [vmem:[#allocation119_spill] sm:$0xff] }
 0x162   : > { %1145 = vmatmul.mubr.f32.vlgmr.msra.gmra.mrb[0].mxu1 %v1144_v3  ;;  %2127 = vmatmul.mubr.f32.vlgmr.msra.gmra.mrb[4].mxu0 %v1144_v3  ;;  %v7665_v3 = vld [vmem:[#allocation115_spill] sm:$0xff] }
 0x163   : > { %4593 = vmatpush1.bf16.msra.mxu1 %v7659_v56  ;;  %4809 = vmatpush1.bf16.msra.mxu0 %v7660_v28  ;;  %v1154_v23 = vand.u32 4294901760, %v1153_v45  ;;  %v7666_v56 = vld [vmem:[#allocation116_spill] sm:$0xff]  ;;  %v7667_v28 = vld [vmem:[#allocation117_spill] sm:$0xff] }
 0x164   : > { %4595 = vmatprep.subr.bf16.mxu1 %v7661_v31  ;;  %4811 = vmatprep.subr.bf16.mxu0 %v7662_v58  ;;  %v7668_v58 = vld [vmem:[#allocation118_spill] sm:$0xff]  ;;  %v7671_v45 = vld [vmem:[#allocation121_spill] sm:$0xff] }
 0x165   : > { %1155 = vmatprep.mubr.f32.mxu1 %v1154_v23  ;;  %2137 = vmatprep.mubr.f32.mxu0 %v1154_v23  ;;  %v7670_v23 = vld [vmem:[#allocation120_spill] sm:$0xff]  ;;  %v7672_v31 = vld [vmem:[#allocation122_spill] sm:$0xff] }
 0x166   : > { %1161 = vmatmul.mubr.f32.gmra.mrb[2].mxu1 %v1160_v40  ;;  %2143 = vmatmul.mubr.f32.gmra.mrb[6].mxu0 %v1160_v40  ;;  %v7674_v40 = vld [vmem:[#allocation53_spill] sm:$0xff] }
 0x167   : > { %4597 = vmatpush1.bf16.msra.mxu1 %v7663_v33  ;;  %4813 = vmatpush1.bf16.msra.mxu0 %v7664_v21  ;;  %v7673_v21 = vld [vmem:[#allocation123_spill] sm:$0xff]  ;;  %v7675_v33 = vld [vmem:[#allocation56_spill] sm:$0xff] }
 0x168   : > { %1412 = vmatprep.mubr.f32.mxu1 %v6422_v7  ;;  %2394 = vmatprep.mubr.f32.mxu0 %v6422_v7 }
 0x169   : > { %4599 = vmatprep.subr.bf16.mxu1 %v7665_v3  ;;  %4815 = vmatprep.subr.bf16.mxu0 %v7666_v56  ;;  %v7676_v3 = vld [vmem:[#allocation57_spill] sm:$0xff]  ;;  %v7677_v56 = vld [vmem:[#allocation59_spill] sm:$0xff] }
 0x16b   : > { %4601 = vmatpush1.bf16.msra.mxu1 %v7667_v28  ;;  %4817 = vmatpush1.bf16.msra.mxu0 %v7668_v58  ;;  %v7678_v28 = vld [vmem:[#allocation124_spill] sm:$0xff]  ;;  %v7679_v58 = vld [vmem:[#allocation125_spill] sm:$0xff] }
 0x16c   : > { %4603 = vmatprep.subr.bf16.mxu1 %v7669_v30  ;;  %4819 = vmatprep.subr.bf16.mxu0 %v7670_v23  ;;  %v7680_v30 = vld [vmem:[#allocation126_spill] sm:$0xff]  ;;  %v7681_v23 = vld [vmem:[#allocation127_spill] sm:$0xff] }
 0x16f   : > { %4605 = vmatpush1.bf16.msra.mxu1 %v7671_v45  ;;  %4821 = vmatpush1.bf16.msra.mxu0 %v7672_v31  ;;  %v7682_v45 = vld [vmem:[#allocation128_spill] sm:$0xff]  ;;  %v7683_v31 = vld [vmem:[#allocation129_spill] sm:$0xff] }
 0x170   : > { %4607 = vmatprep.subr.bf16.mxu1 %v7673_v21  ;;  %4823 = vmatprep.subr.bf16.mxu0 %v7674_v40  ;;  %v7684_v21 = vld [vmem:[#allocation130_spill] sm:$0xff]  ;;  %v7685_v40 = vld [vmem:[#allocation131_spill] sm:$0xff] }
 0x173   : > { %4609 = vmatpush1.bf16.msra.mxu1 %v7675_v33  ;;  %4825 = vmatpush1.bf16.msra.mxu0 %v7676_v3  ;;  %v7686_v33 = vld [vmem:[#allocation11_spill] sm:$0xff]  ;;  %v7687_v3 = vld [vmem:[#allocation10_spill] sm:$0xff] }
 0x174   : > { %4611 = vmatprep.subr.bf16.mxu1 %v7677_v56  ;;  %4827 = vmatprep.subr.bf16.mxu0 %v7678_v28  ;;  %v7688_v56 = vpack.c.bf16 %v7686_v33, %v7687_v3  ;;  %v7689_v28 = vpack.c.bf16 %v5554_v42, %v5535_v32 }
 0x177   : > { %4613 = vmatpush1.bf16.msra.mxu1 %v7679_v58  ;;  %4829 = vmatpush1.bf16.msra.mxu0 %v7680_v30  ;;  %v7697_v58 = vld [vmem:[#allocation19_spill] sm:$0xff]  ;;  %v7698_v30 = vld [vmem:[#allocation17_spill] sm:$0xff] }
 0x178   : > { %4615 = vmatprep.subr.bf16.mxu1 %v7681_v23  ;;  %4831 = vmatprep.subr.bf16.mxu0 %v7682_v45  ;;  %v7699_v23 = vpack.c.bf16 %v7697_v58, %v7698_v30  ;;  %v7700_v45 = vld [vmem:[#allocation21_spill] sm:$0xff] }
 0x17b   : > { %4617 = vmatpush1.bf16.msra.mxu1 %v7683_v31  ;;  %4833 = vmatpush1.bf16.msra.mxu0 %v7684_v21  ;;  %v7701_v31 = vld [vmem:[#allocation20_spill] sm:$0xff] }
 0x17c   : > { %4619 = vmatprep.subr.bf16.mxu1 %v7685_v40  ;;  %4835 = vmatprep.subr.bf16.mxu0 %v6301_v29  ;;  %v7702_v21 = vpack.c.bf16 %v7700_v45, %v7701_v31  ;;  %v7703_v40 = vld [vmem:[#allocation24_spill] sm:$0xff]  ;;  %v7718_v31 = vld [vmem:[#allocation35_spill] sm:$0xff] }
 0x17f   : > { %4621 = vmatpush1.bf16.msra.mxu1 %v6311_v10  ;;  %4837 = vmatpush1.bf16.msra.mxu0 %v6317_v8  ;;  %v7692_v10 = vld [vmem:[#allocation13_spill] sm:$0xff]  ;;  %v7694_v8 = vld [vmem:[#allocation16_spill] sm:$0xff] }
 0x180   : > { %4623 = vmatprep.subr.bf16.mxu1 %v6328_v39  ;;  %4839 = vmatprep.subr.bf16.mxu0 %v6343_v46  ;;  %v7690_v39 = vpack.c.bf16 %v5565_v50, %v5558_v44  ;;  %v7693_v29 = vpack.c.bf16 %v5593_v9, %v7692_v10  ;;  %v7695_v46 = vld [vmem:[#allocation15_spill] sm:$0xff] }
 0x183   : > { %4625 = vmatpush1.bf16.msra.mxu1 %v6353_v26  ;;  %4841 = vmatpush1.bf16.msra.mxu0 %v6361_v51  ;;  %v7691_v26 = vpack.c.bf16 %v5583_v63, %v5578_v62  ;;  %v7696_v51 = vpack.c.bf16 %v7694_v8, %v7695_v46 }
 0x184   : > { %4627 = vmatprep.subr.bf16.mxu1 %v7688_v56  ;;  %4843 = vmatprep.subr.bf16.mxu0 %v7689_v28  ;;  %v7704_v56 = vld [vmem:[#allocation23_spill] sm:$0xff] }
 0x185   : > { %v7705_v28 = vpack.c.bf16 %v7703_v40, %v7704_v56 }
 0x186   : > { %1414 = vmatmul.mubr.f32.vlgmr.msra.gmra.mrb[0].mxu1 %v6417_v60  ;;  %2396 = vmatmul.mubr.f32.vlgmr.msra.gmra.mrb[4].mxu0 %v6417_v60  ;;  %v7713_v60 = vld [vmem:[#allocation30_spill] sm:$0xff] }
 0x187   : > { %1420 = vmatprep.mubr.f32.mxu1 %v6435_v36  ;;  %4629 = vmatpush1.bf16.msra.mxu1 %v7690_v39  ;;  %v7706_v39 = vld [vmem:[#allocation26_spill] sm:$0xff] }
 0x188   : > { %2402 = vmatprep.mubr.f32.mxu0 %v6435_v36  ;;  %4845 = vmatpush1.bf16.msra.mxu0 %v7691_v26  ;;  %v7707_v26 = vld [vmem:[#allocation25_spill] sm:$0xff] }
 0x189   : > { %4631 = vmatprep.subr.bf16.mxu1 %v7693_v29  ;;  %4847 = vmatprep.subr.bf16.mxu0 %v7696_v51  ;;  %v7708_v29 = vpack.c.bf16 %v7706_v39, %v7707_v26  ;;  %v7709_v51 = vld [vmem:[#allocation29_spill] sm:$0xff] }
 0x18a   : > { %1422 = vmatmul.mubr.f32.gmra.mrb[2].mxu1 %v6427_v12  ;;  %2404 = vmatmul.mubr.f32.gmra.mrb[6].mxu0 %v6427_v12  ;;  %v7710_v12 = vld [vmem:[#allocation27_spill] sm:$0xff] }
 0x18b   : > { %4633 = vmatpush1.bf16.msra.mxu1 %v7699_v23  ;;  %1566 = vmatprep.mubr.f32.mxu1 %v6425_v13  ;;  %v7711_v36 = vpack.c.bf16 %v7709_v51, %v7710_v12  ;;  %v7712_v23 = vld [vmem:[#allocation31_spill] sm:$0xff] }
 0x18c   : > { %4849 = vmatpush1.bf16.msra.mxu0 %v7702_v21  ;;  %2548 = vmatprep.mubr.f32.mxu0 %v6425_v13  ;;  %v7714_v7 = vpack.c.bf16 %v7712_v23, %v7713_v60  ;;  %v7715_v21 = vld [vmem:[#allocation33_spill] sm:$0xff]  ;;  %v7717_v13 = vld [vmem:[#allocation36_spill] sm:$0xff] }
 0x18d   : > { %4635 = vmatprep.subr.bf16.mxu1 %v7705_v28  ;;  %4851 = vmatprep.subr.bf16.mxu0 %v7708_v29  ;;  %v7716_v45 = vpack.c.bf16 %v7632_v14, %v7715_v21  ;;  %v7719_v40 = vpack.c.bf16 %v7717_v13, %v7718_v31  ;;  %v7720_v28 = vpack.c.bf16 %v7636_v5, %v7635_v48  ;;  %v7721_v29 = vld [vmem:[#allocation40_spill] sm:$0xff] }
 0x18e   : > { %v7722_v51 = vpack.c.bf16 %v7638_v15, %v7721_v29 }
 0x18f   : > { %4637 = vmatpush1.bf16.msra.mxu1 %v7711_v36  ;;  %v7723_v36 = vld [vmem:[#allocation43_spill] sm:$0xff] }
 0x190   : > { %4853 = vmatpush1.bf16.msra.mxu0 %v7714_v7  ;;  %4639 = vmatprep.subr.bf16.mxu1 %v7716_v45  ;;  %v7724_v23 = vpack.c.bf16 %v7640_v55, %v7723_v36  ;;  %v7725_v7 = vpack.c.bf16 %v7642_v0, %v7641_v41  ;;  %v7726_v45 = vpack.c.bf16 %v7644_v2, %v7643_v61 }
 0x191   : > { %4855 = vmatprep.subr.bf16.mxu0 %v7719_v40  ;;  %v7727_v40 = vpack.c.bf16 %v7646_v53, %v7645_v22 }
 0x193   : > { %4641 = vmatpush1.bf16.msra.mxu1 %v7720_v28  ;;  %v7728_v28 = vpack.c.bf16 %v7647_v4, %v7605_v34 }
 0x194   : > { %4857 = vmatpush1.bf16.msra.mxu0 %v7722_v51  ;;  %4643 = vmatprep.subr.bf16.mxu1 %v7724_v23  ;;  %v7729_v51 = vpack.c.bf16 %v7609_v24, %v7648_v47  ;;  %v7730_v23 = vpack.c.bf16 %v7613_v52, %v7611_v54 }
 0x195   : > { %4859 = vmatprep.subr.bf16.mxu0 %v7725_v7  ;;  %v7731_v7 = vpack.c.bf16 %v7650_v11, %v7649_v25 }
 0x197   : > { %4645 = vmatpush1.bf16.msra.mxu1 %v7726_v45  ;;  %v7732_v45 = vpack.c.bf16 %v5922_v57, %v5920_v17 }
 0x198   : > { %4861 = vmatpush1.bf16.msra.mxu0 %v7727_v40  ;;  %4647 = vmatprep.subr.bf16.mxu1 %v7728_v28  ;;  %v7733_v40 = vpack.c.bf16 %v5926_v18, %v5924_v1  ;;  %v2998_v28 = vld [vmem:[%s7114_s3] sm:$0xff]  ;;  %v7750_v1 = vld [vmem:[#allocation105_spill] sm:$0xff] }
 0x199   : > { %4863 = vmatprep.subr.bf16.mxu0 %v7729_v51  ;;  %v7734_v51 = vpack.c.bf16 %v5931_v35, %v5929_v43  ;;  %v7421_v35 = vmov 1  }
 0x19a   : > { %5178 = vset.pattern.permute.xlu1 %v7421_v35  ;;  %v7751_v35 = vld [vmem:[#allocation103_spill] sm:$0xff] }
 0x19b   : > { %4649 = vmatpush1.bf16.msra.mxu1 %v7730_v23  ;;  %v7412_v23 = vmov 0   ;;  %3013 = vperm.xlu1 %5178, %v2998_v28   ;;  %v7752_v57 = vpack.c.bf16 %v7750_v1, %v7751_v35  ;;  %v7785_v1 = vld [vmem:[#allocation74_spill] sm:$0xff]  ;;  %v7796_v35 = vld [vmem:[#allocation100_spill] sm:$0xff] }
 0x19c   : > { %4865 = vmatpush1.bf16.msra.mxu0 %v7731_v7  ;;  %4651 = vmatprep.subr.bf16.mxu1 %v7732_v45  ;;  %v7735_v7 = vpack.c.bf16 %v5935_v19, %v5933_v49  ;;  %v7736_v45 = vpack.c.bf16 %v5945_v27, %v5943_v16  ;;  %v7742_v27 = vld [vmem:[#allocation95_spill] sm:$0xff]  ;;  %v7748_v49 = vld [vmem:[#allocation101_spill] sm:$0xff] }
 0x19d   : > { %4867 = vmatprep.subr.bf16.mxu0 %v7733_v40  ;;  %5177 = vset.pattern.permute.xlu0 %v7412_v23  ;;  %v7737_v40 = vld [vmem:[#allocation91_spill] sm:$0xff]  ;;  %v7739_v23 = vld [vmem:[#allocation93_spill] sm:$0xff] }
 0x19e   : > { %v7738_v18 = vpack.c.bf16 %v5949_v37, %v7737_v40  ;;  %3002 = vperm.xlu0 %5177, %v2998_v28   ;;  %v7740_v19 = vpack.c.bf16 %v5954_v38, %v7739_v23  ;;  %v7744_v16 = vld [vmem:[#allocation99_spill] sm:$0xff]  ;;  %v7745_v37 = vld [vmem:[#allocation98_spill] sm:$0xff] }
 0x19f   : > { %4653 = vmatpush1.bf16.msra.mxu1 %v7734_v51  ;;  %v2999_v51 = vld [vmem:[%s7114_s3 + $0x8] sm:$0xff]  ;;  %v7747_v40 = vld [vmem:[#allocation102_spill] sm:$0xff] }
 0x1a0   : > { %4869 = vmatpush1.bf16.msra.mxu0 %v7735_v7  ;;  %4655 = vmatprep.subr.bf16.mxu1 %v7736_v45  ;;  %v7741_v7 = vld [vmem:[#allocation96_spill] sm:$0xff]  ;;  %v7749_v43 = vpack.c.bf16 %v7747_v40, %v7748_v49  ;;  %v7754_v38 = vld [vmem:[#allocation106_spill] sm:$0xff] }
 0x1a1   : > { %4871 = vmatprep.subr.bf16.mxu0 %v7738_v18  ;;  %v7743_v45 = vpack.c.bf16 %v7741_v7, %v7742_v27  ;;  %v7746_v18 = vpack.c.bf16 %v7744_v16, %v7745_v37  ;;  %3017 = vperm.xlu1 %5178, %v2999_v51   ;;  %v7756_v7 = vld [vmem:[#allocation9_spill] sm:$0xff]  ;;  %v7425_v16 = vmov 3  }
 0x1a2   : > { %3007 = vperm.xlu0 %5177, %v2999_v51  }
 0x1a3   : > { %4657 = vmatpush1.bf16.msra.mxu1 %v7740_v19  ;;  %v7753_v19 = vld [vmem:[#allocation108_spill] sm:$0xff] }
 0x1a4   : > { %4873 = vmatpush1.bf16.msra.mxu0 %v7743_v45  ;;  %4659 = vmatprep.subr.bf16.mxu1 %v7746_v18  ;;  %v7755_v23 = vpack.c.bf16 %v7753_v19, %v7754_v38  ;;  %v7757_v45 = vld [vmem:[#allocation62_spill] sm:$0xff]  ;;  %v7758_v18 = vld [vmem:[#allocation37_spill] sm:$0xff]  ;;  %v7772_v19 = vld [vmem:[#allocation68_spill] sm:$0xff] }
 0x1a5   : > { %4875 = vmatprep.subr.bf16.mxu0 %v7749_v43  ;;  %v7759_v43 = vld [vmem:[#allocation12_spill] sm:$0xff] }
 0x1a6   : > { %5181 = vset.pattern.permute.xlu0 %v7425_v16  ;;  %v7763_v16 = vld [vmem:[#allocation46_spill] sm:$0xff]  ;;  %v6653_v38 = vld [vmem:[%s7116_s5 + $0x8] sm:$0xff] }
 0x1a7   : > { %4661 = vmatpush1.bf16.msra.mxu1 %v7752_v57  ;;  %3041 = vperm.xlu0 %5181, %v2999_v51   ;;  %v7760_v57 = vld [vmem:[#allocation63_spill] sm:$0xff] }
 0x1a8   : > { %4877 = vmatpush1.bf16.msra.mxu0 %v7755_v23  ;;  %4663 = vmatprep.subr.bf16.mxu1 %v7756_v7  ;;  %v7761_v23 = vld [vmem:[#allocation14_spill] sm:$0xff] }
 0x1a9   : > { %4879 = vmatprep.subr.bf16.mxu0 %v7757_v45  ;;  %v7762_v45 = vld [vmem:[#allocation64_spill] sm:$0xff]  ;;  %v7764_v7 = vld [vmem:[#allocation18_spill] sm:$0xff] }
 0x1aa   : > { %1569 = vmatmul.mubr.f32.vlgmr.msra.gmra.mrb[0].mxu1 %v7758_v18 }
 0x1ab   : > { %2551 = vmatmul.mubr.f32.vlgmr.msra.gmra.mrb[4].mxu0 %v7758_v18  ;;  %1576 = vmatprep.mubr.f32.mxu1 %v6443_v6  ;;  %v7765_v18 = vld [vmem:[#allocation65_spill] sm:$0xff] }
 0x1ac   : > { %4665 = vmatpush1.bf16.msra.mxu1 %v7759_v43  ;;  %2558 = vmatprep.mubr.f32.mxu0 %v6443_v6  ;;  %v6636_v6 = vld [vmem:[%s7116_s5] sm:$0xff]  ;;  %v7771_v43 = vld [vmem:[#allocation32_spill] sm:$0xff] }
 0x1ad   : > { %4881 = vmatpush1.bf16.msra.mxu0 %v7760_v57  ;;  %4667 = vmatprep.subr.bf16.mxu1 %v7761_v23  ;;  %v7766_v23 = vld [vmem:[#allocation22_spill] sm:$0xff] }
 0x1ae   : > { %1579 = vmatmul.mubr.f32.gmra.mrb[2].mxu1 %v6433_v59  ;;  %4883 = vmatprep.subr.bf16.mxu0 %v7762_v45  ;;  %v7767_v57 = vld [vmem:[#allocation66_spill] sm:$0xff]  ;;  %v7768_v45 = vmov 1  }
 0x1af   : > { %2561 = vmatmul.mubr.f32.gmra.mrb[6].mxu0 %v6433_v59  ;;  %1688 = vmatprep.mubr.f32.mxu1 %v7763_v16  ;;  %v5304_v59 = vmov 2  }
 0x1b0   : > { %4669 = vmatpush1.bf16.msra.mxu1 %v7764_v7  ;;  %2670 = vmatprep.mubr.f32.mxu0 %v7763_v16  ;;  %v7769_v7 = vld [vmem:[#allocation28_spill] sm:$0xff]  ;;  %v7770_v16 = vld [vmem:[#allocation67_spill] sm:$0xff] }
 0x1b1   : > { %4885 = vmatpush1.bf16.msra.mxu0 %v7765_v18  ;;  %4671 = vmatprep.subr.bf16.mxu1 %v7766_v23  ;;  %v7773_v18 = vld [vmem:[#allocation38_spill] sm:$0xff] }
 0x1b2   : > { %4887 = vmatprep.subr.bf16.mxu0 %v7767_v57  ;;  %5183 = vset.pattern.permute.xlu0 %v7768_v45  ;;  %v7774_v57 = vld [vmem:[#allocation69_spill] sm:$0xff]  ;;  %v7775_v23 = vld [vmem:[#allocation42_spill] sm:$0xff] }
 0x1b3   : > { %3083 = vperm.xlu0 %5183, %v6636_v6   ;;  %5179 = vset.pattern.permute.xlu1 %v5304_v59 }
 0x1b4   : > { %4673 = vmatpush1.bf16.msra.mxu1 %v7769_v7  ;;  %3029 = vperm.xlu1 %5179, %v2999_v51   ;;  %v7776_v51 = vld [vmem:[#allocation70_spill] sm:$0xff] }
 0x1b5   : > { %4889 = vmatpush1.bf16.msra.mxu0 %v7770_v16  ;;  %4675 = vmatprep.subr.bf16.mxu1 %v7771_v43  ;;  %v7777_v16 = vmov 3   ;;  %v7778_v43 = vld [vmem:[#allocation47_spill] sm:$0xff]  ;;  %v7783_v7 = vld [vmem:[#allocation58_spill] sm:$0xff] }
 0x1b6   : > { %4891 = vmatprep.subr.bf16.mxu0 %v7772_v19  ;;  %v7780_v19 = vld [vmem:[#allocation52_spill] sm:$0xff] }
 0x1b7   : > { %5184 = vset.pattern.permute.xlu0 %v5304_v59 }
 0x1b8   : > { %4677 = vmatpush1.bf16.msra.mxu1 %v7773_v18  ;;  %3025 = vperm.xlu0 %5184, %v2998_v28   ;;  %v7779_v18 = vld [vmem:[#allocation71_spill] sm:$0xff] }
 0x1b9   : > { %4893 = vmatpush1.bf16.msra.mxu0 %v7774_v57  ;;  %4679 = vmatprep.subr.bf16.mxu1 %v7775_v23  ;;  %v7781_v57 = vld [vmem:[#allocation72_spill] sm:$0xff]  ;;  %v7782_v23 = vmov 0  }
 0x1ba   : > { %4895 = vmatprep.subr.bf16.mxu0 %v7776_v51  ;;  %5180 = vset.pattern.permute.xlu1 %v7777_v16  ;;  %v7784_v51 = vld [vmem:[#allocation73_spill] sm:$0xff] }
 0x1bb   : > { %3037 = vperm.xlu1 %5180, %v2998_v28   ;;  %v7786_v28 = vld [vmem:[#allocation75_spill] sm:$0xff] }
 0x1bc   : > { %4681 = vmatpush1.bf16.msra.mxu1 %v7778_v43  ;;  %3103 = vperm.xlu0 %5184, %v6653_v38   ;;  %v7427_v43 = vmov 4  }
 0x1bd   : > { %4897 = vmatpush1.bf16.msra.mxu0 %v7779_v18  ;;  %4683 = vmatprep.subr.bf16.mxu1 %v7780_v19  ;;  %v7787_v19 = vld [vmem:[#allocation76_spill] sm:$0xff]  ;;  %v7795_v18 = vand.u32 4294901760, %v7686_v33  ;;  %v7802_v33 = vand.u32 4294901760, %v5565_v50 }
 0x1be   : > { %4899 = vmatprep.subr.bf16.mxu0 %v7781_v57  ;;  %v7790_v57 = vld [vmem:[#allocation79_spill] sm:$0xff] }
 0x1bf   : > { %5182 = vset.pattern.permute.xlu1 %v7782_v23  ;;  %v7788_v23 = vld [vmem:[#allocation77_spill] sm:$0xff] }
 0x1c0   : > { %4685 = vmatpush1.bf16.msra.mxu1 %v7783_v7  ;;  %3068 = vperm.xlu1 %5182, %v6636_v6   ;;  %v7789_v7 = vld [vmem:[#allocation78_spill] sm:$0xff] }
 0x1c1   : > { %4901 = vmatpush1.bf16.msra.mxu0 %v7784_v51  ;;  %4687 = vmatprep.subr.bf16.mxu1 %v7785_v1  ;;  %v7428_v51 = vmov 5   ;;  %v7791_v1 = vld [vmem:[#allocation80_spill] sm:$0xff] }
 0x1c2   : > { %4903 = vmatprep.subr.bf16.mxu0 %v7786_v28  ;;  %5188 = vset.pattern.permute.xlu0 %v7427_v43  ;;  %v7792_v43 = vld [vmem:[#allocation88_spill] sm:$0xff]  ;;  %v7793_v28 = vld [vmem:[#allocation97_spill] sm:$0xff] }
 0x1c3   : > { %3131 = vperm.xlu0 %5188, %v6636_v6  }
 0x1c4   : > { %4689 = vmatpush1.bf16.msra.mxu1 %v7787_v19  ;;  %3073 = vperm.xlu1 %5182, %v6653_v38   ;;  %v7794_v19 = vand.u32 4294901760, %v7687_v3  ;;  %v7801_v3 = vand.u32 4294901760, %v5558_v44  ;;  %v7809_v44 = vand.u32 4294901760, %v7694_v8  ;;  %v7814_v8 = vld [vmem:[#allocation21_spill] sm:$0xff] }
 0x1c5   : > { %4905 = vmatpush1.bf16.msra.mxu0 %v7788_v23  ;;  %4691 = vmatprep.subr.bf16.mxu1 %v7789_v7  ;;  %v7798_v7 = vand.u32 4294901760, %v5554_v42  ;;  %v7804_v42 = vand.u32 4294901760, %v5583_v63  ;;  %v7811_v63 = vand.u32 4294901760, %v7697_v58  ;;  %v7821_v58 = vand.u32 4294901760, %v7706_v39 }
 0x1c6   : > { %4907 = vmatprep.subr.bf16.mxu0 %v7790_v57  ;;  %v4698_v23 = vpack.c.bf16 %v7795_v18, %v7794_v19  ;;  %v7797_v57 = vand.u32 4294901760, %v5535_v32  ;;  %v4700_v19 = vpack.c.bf16 %v7802_v33, %v7801_v3  ;;  %v7803_v32 = vand.u32 4294901760, %v5578_v62 }
 0x1c7   : > { %5191 = vset.pattern.permute.xlu0 %v7428_v51  ;;  %v7806_v18 = vand.u32 4294901760, %v5593_v9  ;;  %v7810_v62 = vand.u32 4294901760, %v7698_v30  ;;  %v7816_v3 = vand.u32 4294901760, %v7704_v56  ;;  %v7823_v56 = vand.u32 4294901760, %v7710_v12 }
 0x1c8   : > { %4693 = vmatpush1.bf16.msra.mxu1 %v7791_v1  ;;  %5185 = vset.pattern.permute.xlu1 %v7768_v45  ;;  %v4914_v51 = vpack.c.bf16 %v7798_v7, %v7797_v57  ;;  %v7799_v45 = vld [vmem:[#allocation104_spill] sm:$0xff]  ;;  %v4916_v7 = vpack.c.bf16 %v7804_v42, %v7803_v32  ;;  %v7805_v57 = vand.u32 4294901760, %v7692_v10  ;;  %v7824_v42 = vld [vmem:[#allocation29_spill] sm:$0xff]  ;;  %v7832_v12 = vand.u32 4294901760, %v7717_v13 }
 0x1c9   : > { %4909 = vmatpush1.bf16.msra.mxu0 %v7792_v43  ;;  %4695 = vmatprep.subr.bf16.mxu1 %v7793_v28  ;;  %v7800_v43 = vld [vmem:[#allocation107_spill] sm:$0xff]  ;;  %v4704_v9 = vpack.c.bf16 %v7811_v63, %v7810_v62  ;;  %v7812_v10 = vld [vmem:[#allocation20_spill] sm:$0xff]  ;;  %v7831_v63 = vand.u32 4294901760, %v7718_v31  ;;  %v7836_v31 = vand.u32 4294901760, %v7638_v15 }
 0x1ca   : > { %4911 = vmatprep.subr.bf16.mxu0 %v7796_v35  ;;  %3087 = vperm.xlu1 %5185, %v6653_v38   ;;  %v4702_v35 = vpack.c.bf16 %v7806_v18, %v7805_v57  ;;  %v7826_v18 = vand.u32 4294901760, %v7713_v60  ;;  %v7833_v60 = vand.u32 4294901760, %v7635_v48  ;;  %v7839_v48 = vand.u32 4294901760, %v7641_v41 }
 0x1cb   : > { %3151 = vperm.xlu0 %5191, %v6653_v38  }
 0x1cc   : > { %4697 = vmatpush1.bf16.msra.mxu1 %v7799_v45  ;;  %v7807_v45 = vld [vmem:[#allocation44_spill] sm:$0xff] }
 0x1cd   : > { %4913 = vmatpush1.bf16.msra.mxu0 %v7800_v43  ;;  %4699 = vmatprep.subr.bf16.mxu1 %v4698_v23  ;;  %v7808_v23 = vand.u32 4294901760, %v7695_v46  ;;  %v7813_v46 = vand.u32 4294901760, %v7812_v10  ;;  %v5307_v10 = vmov 6  }
 0x1ce   : > { %4915 = vmatprep.subr.bf16.mxu0 %v4914_v51  ;;  %5186 = vset.pattern.permute.xlu1 %v5304_v59  ;;  %v7815_v59 = vand.u32 4294901760, %v7814_v8  ;;  %v7838_v8 = vand.u32 4294901760, %v7640_v55  ;;  %v7843_v55 = vand.u32 4294901760, %v7645_v22  ;;  %v7850_v22 = vand.u32 4294901760, %v7611_v54 }
 0x1cf   : > { %1692 = vmatmul.mubr.f32.vlgmr.msra.gmra.mrb[0].mxu1 %v7807_v45  ;;  %v4918_v50 = vpack.c.bf16 %v7809_v44, %v7808_v23  ;;  %3099 = vperm.xlu1 %5186, %v6636_v6   ;;  %v7829_v44 = vand.u32 4294901760, %v7715_v21  ;;  %v7834_v21 = vand.u32 4294901760, %v7636_v5  ;;  %v7840_v5 = vand.u32 4294901760, %v7642_v0 }
 0x1d0   : > { %2674 = vmatmul.mubr.f32.vlgmr.msra.gmra.mrb[4].mxu0 %v7807_v45  ;;  %1700 = vmatprep.mubr.f32.mxu1 %v6451_v20  ;;  %v4920_v51 = vpack.c.bf16 %v7815_v59, %v7813_v46  ;;  %v7817_v45 = vld [vmem:[#allocation24_spill] sm:$0xff]  ;;  %v7845_v0 = vand.u32 4294901760, %v7605_v34  ;;  %v7852_v34 = vand.u32 4294901760, %v7649_v25 }
 0x1d1   : > { %4701 = vmatpush1.bf16.msra.mxu1 %v4700_v19  ;;  %2682 = vmatprep.mubr.f32.mxu0 %v6451_v20  ;;  %v7818_v33 = vand.u32 4294901760, %v7817_v45  ;;  %v7819_v19 = vld [vmem:[#allocation48_spill] sm:$0xff]  ;;  %v7820_v20 = vand.u32 4294901760, %v7707_v26  ;;  %v7827_v26 = vld [vmem:[#allocation31_spill] sm:$0xff]  ;;  %v4712_v46 = vpack.c.bf16 %v7834_v21, %v7833_v60  ;;  %v5308_v45 = vmov 7   ;;  %v7870_v60 = vld [vmem:[#allocation89_spill] sm:$0xff] }
 0x1d2   : > { %4917 = vmatpush1.bf16.msra.mxu0 %v4916_v7  ;;  %4703 = vmatprep.subr.bf16.mxu1 %v4702_v35  ;;  %v7822_v35 = vld [vmem:[#allocation39_spill] sm:$0xff]  ;;  %v7825_v7 = vand.u32 4294901760, %v7824_v42  ;;  %v7828_v23 = vand.u32 4294901760, %v7827_v26  ;;  %v5309_v26 = vmov 8   ;;  %v7861_v25 = vld [vmem:[#allocation84_spill] sm:$0xff]  ;;  %v7871_v21 = vand.u32 4294901760, %v7870_v60 }
 0x1d3   : > { %v4706_v32 = vpack.c.bf16 %v7818_v33, %v7816_v3  ;;  %1704 = vmatmul.mubr.f32.gmra.mrb[2].mxu1 %v7819_v19  ;;  %4919 = vmatprep.subr.bf16.mxu0 %v4918_v50  ;;  %v4922_v30 = vpack.c.bf16 %v7821_v58, %v7820_v20  ;;  %v7830_v50 = vand.u32 4294901760, %v7632_v14  ;;  %v7835_v14 = vand.u32 4294901760, %v7721_v29  ;;  %v7917_v60 = vld [vmem:[#allocation42_spill] sm:$0xff] }
 0x1d4   : > { %2686 = vmatmul.mubr.f32.gmra.mrb[6].mxu0 %v7819_v19  ;;  %1883 = vmatprep.mubr.f32.mxu1 %v7822_v35  ;;  %v4708_v57 = vpack.c.bf16 %v7825_v7, %v7823_v56  ;;  %v4924_v39 = vpack.c.bf16 %v7828_v23, %v7826_v18  ;;  %v7841_v3 = vand.u32 4294901760, %v7643_v61  ;;  %v7842_v29 = vand.u32 4294901760, %v7644_v2  ;;  %v7857_v7 = vld [vmem:[#allocation82_spill] sm:$0xff] }
 0x1d5   : > { %4705 = vmatpush1.bf16.msra.mxu1 %v4704_v9  ;;  %2865 = vmatprep.mubr.f32.mxu0 %v7822_v35  ;;  %v4710_v62 = vpack.c.bf16 %v7830_v50, %v7829_v44  ;;  %v4926_v9 = vpack.c.bf16 %v7832_v12, %v7831_v63  ;;  %v4928_v13 = vpack.c.bf16 %v7836_v31, %v7835_v14  ;;  %v7846_v33 = vand.u32 4294901760, %v7647_v4  ;;  %v7866_v50 = vld [vmem:[#allocation86_spill] sm:$0xff]  ;;  %v7868_v63 = vld [vmem:[#allocation87_spill] sm:$0xff] }
 0x1d6   : > { %4921 = vmatpush1.bf16.msra.mxu0 %v4920_v51  ;;  %4707 = vmatprep.subr.bf16.mxu1 %v4706_v32  ;;  %v4930_v51 = vpack.c.bf16 %v7840_v5, %v7839_v48  ;;  %v4716_v15 = vpack.c.bf16 %v7842_v29, %v7841_v3  ;;  %v7847_v61 = vand.u32 4294901760, %v7648_v47  ;;  %v7848_v2 = vand.u32 4294901760, %v7609_v24  ;;  %v7880_v29 = vld [vmem:[#allocation94_spill] sm:$0xff] }
 0x1d7   : > { %4923 = vmatprep.subr.bf16.mxu0 %v4922_v30  ;;  %5187 = vset.pattern.permute.xlu1 %v7777_v16  ;;  %v7837_v16 = vand.u32 4294901760, %v7723_v36  ;;  %v7844_v36 = vand.u32 4294901760, %v7646_v53  ;;  %v4718_v32 = vpack.c.bf16 %v7846_v33, %v7845_v0  ;;  %v7849_v20 = vmov 4   ;;  %v7855_v30 = vld [vmem:[#allocation81_spill] sm:$0xff] }
 0x1d8   : > { %3115 = vperm.xlu1 %5187, %v6636_v6   ;;  %5192 = vset.pattern.permute.xlu0 %v5307_v10  ;;  %v4934_v19 = vpack.c.bf16 %v7848_v2, %v7847_v61  ;;  %v7851_v53 = vand.u32 4294901760, %v7613_v52  ;;  %v7853_v47 = vand.u32 4294901760, %v7650_v11  ;;  %v7854_v4 = vand.u32 4294901760, %v5920_v17  ;;  %v7863_v11 = vld [vmem:[#allocation85_spill] sm:$0xff]  ;;  %v7886_v61 = vld [vmem:[#allocation99_spill] sm:$0xff] }
 0x1d9   : > { %4709 = vmatpush1.bf16.msra.mxu1 %v4708_v57  ;;  %3163 = vperm.xlu0 %5192, %v6636_v6   ;;  %v4714_v59 = vpack.c.bf16 %v7838_v8, %v7837_v16  ;;  %v4932_v41 = vpack.c.bf16 %v7844_v36, %v7843_v55  ;;  %v7856_v56 = vand.u32 4294901760, %v7855_v30  ;;  %v7858_v54 = vand.u32 4294901760, %v7857_v7  ;;  %v7859_v57 = vld [vmem:[#allocation83_spill] sm:$0xff]  ;;  %v7876_v8 = vld [vmem:[#allocation92_spill] sm:$0xff] }
 0x1da   : > { %4925 = vmatpush1.bf16.msra.mxu0 %v4924_v39  ;;  %4711 = vmatprep.subr.bf16.mxu1 %v4710_v62  ;;  %v4720_v58 = vpack.c.bf16 %v7851_v53, %v7850_v22  ;;  %v4936_v24 = vpack.c.bf16 %v7853_v47, %v7852_v34  ;;  %v7860_v52 = vand.u32 4294901760, %v7859_v57  ;;  %v7862_v23 = vand.u32 4294901760, %v7861_v25  ;;  %v7892_v34 = vld [vmem:[#allocation105_spill] sm:$0xff] }
 0x1db   : > { %4927 = vmatprep.subr.bf16.mxu0 %v4926_v9  ;;  %v4722_v42 = vpack.c.bf16 %v7856_v56, %v7854_v4  ;;  %v7864_v39 = vand.u32 4294901760, %v7863_v11  ;;  %v7865_v17 = vmov 5   ;;  %v7867_v62 = vand.u32 4294901760, %v7866_v50  ;;  %v7896_v56 = vld [vmem:[#allocation108_spill] sm:$0xff]  ;;  %v7901_v57 = vld [vmem:[#allocation45_spill] sm:$0xff]  ;;  %v7907_v11 = vld [vmem:[#allocation18_spill] sm:$0xff] }
 0x1dc   : > { %3119 = vperm.xlu1 %5187, %v6653_v38   ;;  %v4938_v18 = vpack.c.bf16 %v7860_v52, %v7858_v54  ;;  %v7869_v12 = vand.u32 4294901760, %v7868_v63  ;;  %v5310_v5 = vmov 9   ;;  %v7882_v36 = vand.u32 4294901760, %v7742_v27  ;;  %v7900_v54 = vld [vmem:[#allocation34_spill] sm:$0xff]  ;;  %v7902_v52 = vld [vmem:[#allocation12_spill] sm:$0xff]  ;;  %v7905_v25 = vld [vmem:[#allocation41_spill] sm:$0xff] }
 0x1dd   : > { %4713 = vmatpush1.bf16.msra.mxu1 %v4712_v46  ;;  %5195 = vset.pattern.permute.xlu0 %v5308_v45  ;;  %v4724_v44 = vpack.c.bf16 %v7864_v39, %v7862_v23  ;;  %v7872_v46 = vld [vmem:[#allocation90_spill] sm:$0xff]  ;;  %v7887_v2 = vand.u32 4294901760, %v7886_v61  ;;  %v7889_v22 = vand.u32 4294901760, %v7747_v40  ;;  %v7893_v47 = vand.u32 4294901760, %v7892_v34  ;;  %v7898_v40 = vld [vmem:[#allocation9_spill] sm:$0xff]  ;;  %v7906_v23 = vld [vmem:[#allocation64_spill] sm:$0xff] }
 0x1de   : > { %4929 = vmatpush1.bf16.msra.mxu0 %v4928_v13  ;;  %4715 = vmatprep.subr.bf16.mxu1 %v4714_v59  ;;  %v4940_v9 = vpack.c.bf16 %v7869_v12, %v7867_v62  ;;  %v7873_v14 = vand.u32 4294901760, %v7872_v46  ;;  %v7874_v13 = vld [vmem:[#allocation91_spill] sm:$0xff]  ;;  %v7877_v59 = vand.u32 4294901760, %v7876_v8  ;;  %v5311_v4 = vmov 10   ;;  %v7908_v39 = vld [vmem:[#allocation65_spill] sm:$0xff]  ;;  %v7911_v62 = vld [vmem:[#allocation28_spill] sm:$0xff] }
 0x1df   : > { %4931 = vmatprep.subr.bf16.mxu0 %v4930_v51  ;;  %3183 = vperm.xlu0 %5195, %v6653_v38   ;;  %v7875_v16 = vand.u32 4294901760, %v7874_v13  ;;  %v7878_v51 = vld [vmem:[#allocation93_spill] sm:$0xff]  ;;  %v5312_v7 = vmov 11   ;;  %v5313_v50 = vmov 12   ;;  %v7912_v63 = vld [vmem:[#allocation67_spill] sm:$0xff]  ;;  %v7913_v12 = vld [vmem:[#allocation32_spill] sm:$0xff] }
 0x1e0   : > { %5189 = vset.pattern.permute.xlu1 %v7849_v20  ;;  %v4726_v31 = vpack.c.bf16 %v7873_v14, %v7871_v21  ;;  %v7879_v3 = vand.u32 4294901760, %v7878_v51  ;;  %v7888_v20 = vand.u32 4294901760, %v7748_v49  ;;  %v7897_v49 = vand.u32 4294901760, %v7896_v56  ;;  %v7918_v21 = vld [vmem:[#allocation70_spill] sm:$0xff]  ;;  %v7919_v46 = vld [vmem:[#allocation47_spill] sm:$0xff]  ;;  %v7922_v13 = vld [vmem:[#allocation72_spill] sm:$0xff] }
 0x1e1   : > { %4717 = vmatpush1.bf16.msra.mxu1 %v4716_v15  ;;  %3135 = vperm.xlu1 %5189, %v6653_v38   ;;  %v4942_v48 = vpack.c.bf16 %v7877_v59, %v7875_v16  ;;  %v7881_v15 = vand.u32 4294901760, %v7880_v29  ;;  %v7920_v14 = vld [vmem:[#allocation71_spill] sm:$0xff]  ;;  %v7923_v16 = vld [vmem:[#allocation58_spill] sm:$0xff]  ;;  %v7924_v8 = vld [vmem:[#allocation73_spill] sm:$0xff] }
 0x1e2   : > { %4933 = vmatpush1.bf16.msra.mxu0 %v4932_v41  ;;  %4719 = vmatprep.subr.bf16.mxu1 %v4718_v32  ;;  %v7883_v41 = vld [vmem:[#allocation96_spill] sm:$0xff]  ;;  %v7885_v32 = vand.u32 4294901760, %v7745_v37  ;;  %v4946_v53 = vpack.c.bf16 %v7889_v22, %v7888_v20  ;;  %v7894_v37 = vld [vmem:[#allocation106_spill] sm:$0xff]  ;;  %v7928_v51 = vld [vmem:[#allocation77_spill] sm:$0xff] }
 0x1e3   : > { %4935 = vmatprep.subr.bf16.mxu0 %v4934_v19  ;;  %5196 = vset.pattern.permute.xlu0 %v5309_v26  ;;  %v4728_v55 = vpack.c.bf16 %v7881_v15, %v7879_v3  ;;  %v7884_v0 = vand.u32 4294901760, %v7883_v41  ;;  %v7895_v30 = vand.u32 4294901760, %v7894_v37  ;;  %v7925_v59 = vld [vmem:[#allocation74_spill] sm:$0xff]  ;;  %v7930_v29 = vld [vmem:[#allocation79_spill] sm:$0xff]  ;;  %v7931_v15 = vld [vmem:[#allocation88_spill] sm:$0xff]  ;;  %v7934_v41 = vmov 0  }
 0x1e4   : > { %3195 = vperm.xlu0 %5196, %v6636_v6   ;;  %v4730_v19 = vpack.c.bf16 %v7887_v2, %v7885_v32  ;;  %v7929_v3 = vld [vmem:[#allocation78_spill] sm:$0xff] }
 0x1e5   : > { %4721 = vmatpush1.bf16.msra.mxu1 %v4720_v58  ;;  %5190 = vset.pattern.permute.xlu1 %v7865_v17  ;;  %v4944_v33 = vpack.c.bf16 %v7884_v0, %v7882_v36  ;;  %v7890_v58 = vld [vmem:[#allocation103_spill] sm:$0xff]  ;;  %v7910_v17 = vld [vmem:[#allocation66_spill] sm:$0xff]  ;;  %v7933_v36 = vld [vmem:[#allocation104_spill] sm:$0xff] }
 0x1e6   : > { %4937 = vmatpush1.bf16.msra.mxu0 %v4936_v24  ;;  %4723 = vmatprep.subr.bf16.mxu1 %v4722_v42  ;;  %v7891_v27 = vand.u32 4294901760, %v7890_v58  ;;  %v4948_v42 = vpack.c.bf16 %v7897_v49, %v7895_v30 }
 0x1e7   : > { %4939 = vmatprep.subr.bf16.mxu0 %v4938_v18  ;;  %3147 = vperm.xlu1 %5190, %v6636_v6   ;;  %v7904_v18 = vld [vmem:[#allocation14_spill] sm:$0xff] }
 0x1e8   : > { %5199 = vset.pattern.permute.xlu0 %v5310_v5  ;;  %v4732_v24 = vpack.c.bf16 %v7893_v47, %v7891_v27 }
 0x1e9   : > { %4725 = vmatpush1.bf16.msra.mxu1 %v4724_v44  ;;  %3215 = vperm.xlu0 %5199, %v6653_v38   ;;  %v7909_v44 = vld [vmem:[#allocation22_spill] sm:$0xff] }
 0x1ea   : > { %4941 = vmatpush1.bf16.msra.mxu0 %v4940_v9  ;;  %4727 = vmatprep.subr.bf16.mxu1 %v4726_v31  ;;  %v7915_v9 = vld [vmem:[#allocation38_spill] sm:$0xff]  ;;  %v7921_v31 = vld [vmem:[#allocation52_spill] sm:$0xff] }
 0x1eb   : > { %4943 = vmatprep.subr.bf16.mxu0 %v4942_v48  ;;  %5193 = vset.pattern.permute.xlu1 %v5307_v10  ;;  %v7899_v10 = vld [vmem:[#allocation62_spill] sm:$0xff]  ;;  %v7926_v48 = vld [vmem:[#allocation75_spill] sm:$0xff] }
 0x1ec   : > { %3167 = vperm.xlu1 %5193, %v6653_v38  }
 0x1ed   : > { %4729 = vmatpush1.bf16.msra.mxu1 %v4728_v55  ;;  %5200 = vset.pattern.permute.xlu0 %v5311_v4  ;;  %v7932_v55 = vld [vmem:[#allocation100_spill] sm:$0xff] }
 0x1ee   : > { %4945 = vmatpush1.bf16.msra.mxu0 %v4944_v33  ;;  %4731 = vmatprep.subr.bf16.mxu1 %v4730_v19 }
 0x1ef   : > { %4947 = vmatprep.subr.bf16.mxu0 %v4946_v53  ;;  %3227 = vperm.xlu0 %5200, %v6636_v6  }
 0x1f0   : > { %5194 = vset.pattern.permute.xlu1 %v5308_v45  ;;  %v7903_v45 = vld [vmem:[#allocation63_spill] sm:$0xff] }
 0x1f1   : > { %4733 = vmatpush1.bf16.msra.mxu1 %v4732_v24  ;;  %3179 = vperm.xlu1 %5194, %v6636_v6  }
 0x1f2   : > { %4949 = vmatpush1.bf16.msra.mxu0 %v4948_v42  ;;  %4735 = vmatprep.subr.bf16.mxu1 %v7898_v40 }
 0x1f3   : > { %4951 = vmatprep.subr.bf16.mxu0 %v7899_v10  ;;  %5203 = vset.pattern.permute.xlu0 %v5312_v7 }
 0x1f4   : > { %1885 = vmatmul.mubr.f32.vlgmr.msra.gmra.mrb[0].mxu1 %v7900_v54  ;;  %3247 = vperm.xlu0 %5203, %v6653_v38  }
 0x1f5   : > { %2867 = vmatmul.mubr.f32.vlgmr.msra.gmra.mrb[4].mxu0 %v7900_v54  ;;  %1891 = vmatprep.mubr.f32.mxu1 %v7901_v57 }
 0x1f6   : > { %4737 = vmatpush1.bf16.msra.mxu1 %v7902_v52  ;;  %2873 = vmatprep.mubr.f32.mxu0 %v7901_v57 }
 0x1f7   : > { %4953 = vmatpush1.bf16.msra.mxu0 %v7903_v45  ;;  %4739 = vmatprep.subr.bf16.mxu1 %v7904_v18 }
 0x1f8   : > { %1893 = vmatmul.mubr.f32.gmra.mrb[2].mxu1 %v7905_v25  ;;  %4955 = vmatprep.subr.bf16.mxu0 %v7906_v23 }
 0x1f9   : > { %2875 = vmatmul.mubr.f32.gmra.mrb[6].mxu0 %v7905_v25  ;;  %2000 = vmatprep.mubr.f32.mxu1 %v7822_v35 }
 0x1fa   : > { %4741 = vmatpush1.bf16.msra.mxu1 %v7907_v11  ;;  %2982 = vmatprep.mubr.f32.mxu0 %v7822_v35  ;;  %v7914_v35 = vld [vmem:[#allocation68_spill] sm:$0xff] }
 0x1fb   : > { %4957 = vmatpush1.bf16.msra.mxu0 %v7908_v39  ;;  %4743 = vmatprep.subr.bf16.mxu1 %v7909_v44  ;;  %v3049_v11 = vld [vmem:[%s7115_s4 + $0x8] sm:$0xff] }
 0x1fc   : > { %4959 = vmatprep.subr.bf16.mxu0 %v7910_v17  ;;  %5197 = vset.pattern.permute.xlu1 %v5309_v26  ;;  %v7916_v26 = vld [vmem:[#allocation69_spill] sm:$0xff] }
 0x1fd   : > { %3199 = vperm.xlu1 %5197, %v6653_v38   ;;  %5204 = vset.pattern.permute.xlu0 %v5313_v50 }
 0x1fe   : > { %4745 = vmatpush1.bf16.msra.mxu1 %v7911_v62  ;;  %3259 = vperm.xlu0 %5204, %v6636_v6  }
 0x1ff   : > { %4961 = vmatpush1.bf16.msra.mxu0 %v7912_v63  ;;  %4747 = vmatprep.subr.bf16.mxu1 %v7913_v12 }
 0x200   : > { %4963 = vmatprep.subr.bf16.mxu0 %v7914_v35 }
 0x201   : > { %5198 = vset.pattern.permute.xlu1 %v5310_v5  ;;  %v7927_v5 = vld [vmem:[#allocation76_spill] sm:$0xff] }
 0x202   : > { %4749 = vmatpush1.bf16.msra.mxu1 %v7915_v9  ;;  %3211 = vperm.xlu1 %5198, %v6636_v6  }
 0x203   : > { %4965 = vmatpush1.bf16.msra.mxu0 %v7916_v26  ;;  %4751 = vmatprep.subr.bf16.mxu1 %v7917_v60 }
 0x204   : > { %4967 = vmatprep.subr.bf16.mxu0 %v7918_v21 }
 0x206   : > { %4753 = vmatpush1.bf16.msra.mxu1 %v7919_v46  ;;  %5201 = vset.pattern.permute.xlu1 %v5311_v4 }
 0x207   : > { %4969 = vmatpush1.bf16.msra.mxu0 %v7920_v14  ;;  %4755 = vmatprep.subr.bf16.mxu1 %v7921_v31 }
 0x208   : > { %4971 = vmatprep.subr.bf16.mxu0 %v7922_v13  ;;  %3231 = vperm.xlu1 %5201, %v6653_v38  }
 0x20a   : > { %4757 = vmatpush1.bf16.msra.mxu1 %v7923_v16 }
 0x20b   : > { %4973 = vmatpush1.bf16.msra.mxu0 %v7924_v8  ;;  %4759 = vmatprep.subr.bf16.mxu1 %v7925_v59 }
 0x20c   : > { %4975 = vmatprep.subr.bf16.mxu0 %v7926_v48  ;;  %5202 = vset.pattern.permute.xlu1 %v5312_v7 }
 0x20d   : > { %3243 = vperm.xlu1 %5202, %v6636_v6  }
 0x20e   : > { %4761 = vmatpush1.bf16.msra.mxu1 %v7927_v5 }
 0x20f   : > { %4977 = vmatpush1.bf16.msra.mxu0 %v7928_v51  ;;  %4763 = vmatprep.subr.bf16.mxu1 %v7929_v3 }
 0x210   : > { %4979 = vmatprep.subr.bf16.mxu0 %v7930_v29 }
 0x211   : > { %5205 = vset.pattern.permute.xlu1 %v5313_v50 }
 0x212   : > { %4765 = vmatpush1.bf16.msra.mxu1 %v7791_v1  ;;  %3263 = vperm.xlu1 %5205, %v6653_v38   ;;  %v5314_v1 = vmov 13  }
 0x213   : > { %4981 = vmatpush1.bf16.msra.mxu0 %v7931_v15  ;;  %4767 = vmatprep.subr.bf16.mxu1 %v7793_v28  ;;  %v5316_v28 = vmov 15  }
 0x214   : > { %4983 = vmatprep.subr.bf16.mxu0 %v7932_v55  ;;  %5207 = vset.pattern.permute.xlu0 %v5314_v1 }
 0x215   : > { %3279 = vperm.xlu0 %5207, %v6653_v38  }
 0x216   : > { %4769 = vmatpush1.bf16.msra.mxu1 %v7933_v36  ;;  %5206 = vset.pattern.permute.xlu1 %v5314_v1 }
 0x217   : > { %4985 = vmatpush1.bf16.msra.mxu0 %v7800_v43  ;;  %3275 = vperm.xlu1 %5206, %v6636_v6   ;;  %v5315_v43 = vmov 14  }
 0x219   : > { %2002 = vmatmul.mubr.f32.vlgmr.msra.gmra.mrb[0].mxu1 %v7900_v54  ;;  %5208 = vset.pattern.permute.xlu0 %v5315_v43 }
 0x21a   : > { %2984 = vmatmul.mubr.f32.vlgmr.msra.gmra.mrb[4].mxu0 %v7900_v54  ;;  %2008 = vmatprep.mubr.f32.mxu1 %v7901_v57  ;;  %v3014_v32 = vpop.permute.xlu1 %3013  ;;  %v3048_v54 = vld [vmem:[%s7115_s4] sm:$0xff] }
 0x21b   : > { %2990 = vmatprep.mubr.f32.mxu0 %v7901_v57  ;;  %5209 = vset.pattern.permute.xlu1 %v5315_v43 }
 0x21c   : > { %3295 = vperm.xlu1 %5209, %v6653_v38   ;;  %3291 = vperm.xlu0 %5208, %v6636_v6  }
 0x21d   : > { %2010 = vmatmul.mubr.f32.gmra.mrb[2].mxu1 %v7905_v25  ;;  %v3003_v0 = vpop.permute.xlu0 %3002 }
 0x21e   : > { %2992 = vmatmul.mubr.f32.gmra.mrb[6].mxu0 %v7905_v25 }
 0x220   : > { %5210 = vset.pattern.permute.xlu1 %v5316_v28  ;;  %5211 = vset.pattern.permute.xlu0 %v5316_v28  ;;  %v3018_v2 = vpop.permute.xlu1 %3017 }
 0x221   : > { %3307 = vperm.xlu1 %5210, %v6636_v6   ;;  %3311 = vperm.xlu0 %5211, %v6653_v38   ;;  %v3008_v33 = vpop.permute.xlu0 %3007 }
 0x225   : > { %5213 = vset.pattern.permute.xlu1 %v7934_v41  ;;  %5212 = vset.pattern.permute.xlu0 %v7934_v41 }
 0x226   : > { %v3042_v61 = vpop.permute.xlu0 %3041 }
 0x232   : > { %v6917_v19 = vpop.permute.xlu0 %3083 }
 0x233   : > { %v3030_v20 = vpop.permute.xlu1 %3029 }
 0x237   : > { %v3026_v22 = vpop.permute.xlu0 %3025 }
 0x23a   : > { %v3038_v38 = vpop.permute.xlu1 %3037 }
 0x23b   : > { %v6964_v8 = vpop.permute.xlu0 %3103 }
 0x23f   : > { %v6937_v46 = vpop.permute.xlu1 %3068 }
 0x242   : > { %v6971_v5 = vpop.permute.xlu0 %3131 }
 0x243   : > { %v6942_v14 = vpop.permute.xlu1 %3073 }
 0x249   : > { %v6949_v31 = vpop.permute.xlu1 %3087 }
 0x24a   : > { %v6978_v3 = vpop.permute.xlu0 %3151 }
 0x24e   : > { %v6953_v13 = vpop.permute.xlu1 %3099 }
 0x257   : > { %v6961_v16 = vpop.permute.xlu1 %3115 }
 0x258   : > { %v6984_v15 = vpop.permute.xlu0 %3163 }
 0x25b   : > { %v6966_v59 = vpop.permute.xlu1 %3119 }
 0x25e   : > { %v6991_v36 = vpop.permute.xlu0 %3183 }
 0x260   : > { %v6969_v48 = vpop.permute.xlu1 %3135 }
 0x263   : > { %v3196_v43 = vpop.permute.xlu0 %3195 }
 0x266   : > { %v6976_v51 = vpop.permute.xlu1 %3147 }
 0x268   : > { %v7001_v41 = vpop.permute.xlu0 %3215 }
 0x26b   : > { %v6982_v29 = vpop.permute.xlu1 %3167 }
 0x270   : > { %v6989_v55 = vpop.permute.xlu1 %3179 }
 0x27c   : > { %v6994_v1 = vpop.permute.xlu1 %3199 }
 0x281   : > { %v6999_v28 = vpop.permute.xlu1 %3211 }
 0x2ec   : > { %v2003_v53 = vpop.f32.mrb[0].mxu1 }
 0x2ed   : > { %v3010_v58 = vmul.f32 %v3003_v0, %v2003_v53  ;;  %v2985_v27 = vpop.f32.mrb[4].mxu0  ;;  %v2005_v34 = vpop.f32.mrb[1].mxu1 }
 0x2ee   : > { %v3020_v6 = vmul.f32 %v3014_v32, %v2005_v34  ;;  %v2987_v47 = vpop.f32.mrb[5].mxu0  ;;  %v3032_v24 = vmul.f32 %v3026_v22, %v2985_v27  ;;  %v7005_v0 = vpop.permute.xlu1 %3231  ;;  %v3318_v32 = vld [vmem:[%s7117_s6] sm:$0xff] }
 0x2ef   : > { %v3044_v40 = vmul.f32 %v3038_v38, %v2987_v47 }
 0x2f0   : > { %v3022_v4 = vadd.f32 %v3020_v6, %v3010_v58  ;;  %v2011_v37 = vpop.f32.mrb[2].mxu1 }
 0x2f1   : > { %v3011_v30 = vmul.f32 %v3008_v33, %v2011_v37  ;;  %v2993_v56 = vpop.f32.mrb[6].mxu0  ;;  %v2013_v49 = vpop.f32.mrb[3].mxu1 }
 0x2f2   : > { %v3034_v42 = vadd.f32 %v3032_v24, %v3022_v4  ;;  %v3021_v10 = vmul.f32 %v3018_v2, %v2013_v49  ;;  %v2995_v7 = vpop.f32.mrb[7].mxu0  ;;  %v3033_v52 = vmul.f32 %v3030_v20, %v2993_v56  ;;  %v3228_v33 = vpop.permute.xlu0 %3227  ;;  %v3334_v20 = vsel %vm3332_vm5, %v3318_v32, 0 }
 0x2f3   : > { %v3045_v23 = vmul.f32 %v3042_v61, %v2995_v7  ;;  %v3244_v61 = vpop.permute.xlu1 %3243  ;;  %v7015_v22 = vand.u32 4294901760, %v3334_v20  ;;  %v3320_v7 = vld [vmem:[%s7118_s7] sm:$0xff] }
 0x2f4   : > { %v3046_v57 = vadd.f32 %v3044_v40, %v3034_v42  ;;  %v3023_v45 = vadd.f32 %v3021_v10, %v3011_v30  ;;  %v3321_v10 = vld [vmem:[%s7118_s7 + $0x8] sm:$0xff] }
 0x2f5   : > { %4481 = vmatprep.mubr.f32.mxu1 %v7015_v22  ;;  %v7031_v4 = vsub.f32 %v3334_v20, %v7015_v22 }
 0x2f6   : > { %v3050_v18 = vadd.f32 %v3048_v54, %v3046_v57  ;;  %v3035_v25 = vadd.f32 %v3033_v52, %v3023_v45  ;;  %v7012_v2 = vpop.permute.xlu0 %3247 }
 0x2f7   : > { %v7018_v53 = vpop.permute.xlu1 %3263  ;;  %v3408_v37 = vand.u32 4294901760, %v7031_v4 }
 0x2f8   : > { %v3054_v39 = vmin.f32 %v3050_v18, 0.0  ;;  %v3047_v44 = vadd.f32 %v3045_v23, %v3035_v25  ;;  %vm3052_vm3 = vcmp.gt.f32.partialorder %v3050_v18, 0.0 }
 0x2f9   : > { %v3409_v30 = vsub.f32 %v7031_v4, %v3408_v37 }
 0x2fa   : > { %v3056_v17 = vmul.f32 1.442695, %v3054_v39  ;;  %v3051_v50 = vadd.f32 %v3049_v11, %v3047_v44  ;;  %v3260_v58 = vpop.permute.xlu0 %3259 }
 0x2fb   : > { %v3276_v27 = vpop.permute.xlu1 %3275  ;;  %v3410_v42 = vand.u32 4294901760, %v3409_v30 }
 0x2fc   : > { %5214 = vpow2.f32 %v3056_v17  ;;  %v3055_v62 = vmin.f32 %v3051_v50, 0.0  ;;  %vm3053_vm4 = vcmp.gt.f32.partialorder %v3051_v50, 0.0 }
 0x2fd   : > { %4474 = vmatprep.mubr.f32.mxu0 %v3410_v42 }
 0x2fe   : > { %v3058_v63 = vmul.f32 1.442695, %v3055_v62  ;;  %v7020_v34 = vpop.permute.xlu0 %3279 }
 0x2ff   : > { %v7022_v6 = vpop.permute.xlu1 %3295 }
 0x300   : > { %5216 = vpow2.f32 %v3058_v63 }
 0x302   : > { %v7024_v47 = vpop.permute.xlu0 %3291 }
 0x303   : > { %v7026_v38 = vpop.permute.xlu1 %3307 }
 0x306   : > { %v5215_v12 = vpop.eup %5214  ;;  %v7028_v24 = vpop.permute.xlu0 %3311 }
 0x307   : > { %v4420_v35 = vadd.f32 -1.0, %v5215_v12 }
 0x309   : > { %v6925_v9 = vsel %vm3052_vm3, %v3050_v18, %v4420_v35 }
 0x30a   : > { %v5217_v26 = vpop.eup %5216  ;;  %3270 = vrot.lane.b32.xlu0 %v6925_v9, %s5317_s25  ;;  %3078 = vrot.lane.b32.xlu1 %v6925_v9, %s5318_s16  ;;  %v3076_v39 = vmul.f32 %v6937_v46, %v6925_v9 }
 0x30b   : > { %v4421_v60 = vadd.f32 -1.0, %v5217_v26 }
 0x30d   : > { %v6930_v21 = vsel %vm3053_vm4, %v3051_v50, %v4421_v60 }
 0x30e   : > { %3094 = vrot.lane.b32.xlu1 %v6925_v9, %s5319_s17  ;;  %3080 = vrot.lane.b32.xlu0 %v6930_v21, %s5318_s16 }
 0x312   : > { %3110 = vrot.lane.b32.xlu1 %v6925_v9, %s5320_s18  ;;  %3112 = vrot.lane.b32.xlu0 %v6930_v21, %s5320_s18 }
 0x316   : > { %3126 = vrot.lane.b32.xlu1 %v6925_v9, %s5321_s20  ;;  %3144 = vrot.lane.b32.xlu0 %v6930_v21, %s5322_s23 }
 0x31a   : > { %3142 = vrot.lane.b32.xlu1 %v6925_v9, %s5322_s23  ;;  %3176 = vrot.lane.b32.xlu0 %v6930_v21, %s5323_s26 }
 0x31e   : > { %3158 = vrot.lane.b32.xlu1 %v6925_v9, %s5324_s27  ;;  %3208 = vrot.lane.b32.xlu0 %v6930_v21, %s5325_s28 }
 0x322   : > { %3174 = vrot.lane.b32.xlu1 %v6925_v9, %s5323_s26  ;;  %3240 = vrot.lane.b32.xlu0 %v6930_v21, %s5326_s29 }
 0x326   : > { %3190 = vrot.lane.b32.xlu1 %v6925_v9, %s5327_s30  ;;  %3286 = vrot.lane.b32.xlu0 %v6925_v9, %s5328_s21 }
 0x32a   : > { %3206 = vrot.lane.b32.xlu1 %v6925_v9, %s5325_s28  ;;  %3302 = vrot.lane.b32.xlu0 %v6925_v9, %s5329_s12 }
 0x32e   : > { %3222 = vrot.lane.b32.xlu1 %v6925_v9, %s5330_s13  ;;  %3324 = vperm.xlu0 %5212, %v3320_v7  }
 0x332   : > { %3238 = vrot.lane.b32.xlu1 %v6925_v9, %s5326_s29 }
 0x336   : > { %3254 = vrot.lane.b32.xlu1 %v6925_v9, %s5331_s14 }
 0x33a   : > { %3096 = vrot.lane.b32.xlu1 %v6930_v21, %s5319_s17 }
 0x33e   : > { %3128 = vrot.lane.b32.xlu1 %v6930_v21, %s5321_s20 }
 0x342   : > { %3160 = vrot.lane.b32.xlu1 %v6930_v21, %s5324_s27  ;;  %s4419_s27 = sshll.u32 %s7937_s22, 1 }
 0x346   : > { %3192 = vrot.lane.b32.xlu1 %v6930_v21, %s5327_s30  ;;  %s416_s30 = scalar_lea.vmem %s7122_s11, %s4419_s27 }
 0x34a   : > { %3224 = vrot.lane.b32.xlu1 %v6930_v21, %s5330_s13 }
 0x34e   : > { %3256 = vrot.lane.b32.xlu1 %v6930_v21, %s5331_s14 }
 0x352   : > { %3272 = vrot.lane.b32.xlu1 %v6930_v21, %s5317_s25 }
 0x356   : > { %3288 = vrot.lane.b32.xlu1 %v6930_v21, %s5328_s21 }
 0x35a   : > { %3304 = vrot.lane.b32.xlu1 %v6930_v21, %s5329_s12 }
 0x35e   : > { %3329 = vperm.xlu1 %5213, %v3321_v10  }
 0x37c   : > { %v3271_v56 = vpop.permute.xlu0 %3270  ;;  %v3079_v49 = vpop.permute.xlu1 %3078 }
 0x37d   : > { %v3090_v11 = vmul.f32 %v6917_v19, %v3079_v49 }
 0x37f   : > { %v3092_v62 = vadd.f32 %v3090_v11, %v3076_v39 }
 0x380   : > { %v3095_v40 = vpop.permute.xlu1 %3094  ;;  %v3081_v54 = vpop.permute.xlu0 %3080 }
 0x381   : > { %v3106_v44 = vmul.f32 %v6953_v13, %v3095_v40 }
 0x383   : > { %v3108_v12 = vadd.f32 %v3106_v44, %v3092_v62 }
 0x384   : > { %v3111_v57 = vpop.permute.xlu1 %3110  ;;  %v3113_v52 = vpop.permute.xlu0 %3112 }
 0x385   : > { %v3122_v63 = vmul.f32 %v6961_v16, %v3111_v57 }
 0x387   : > { %v3124_v60 = vadd.f32 %v3122_v63, %v3108_v12 }
 0x388   : > { %v3127_v45 = vpop.permute.xlu1 %3126  ;;  %v3145_v25 = vpop.permute.xlu0 %3144 }
 0x389   : > { %v3138_v35 = vmul.f32 %v6971_v5, %v3127_v45 }
 0x38b   : > { %v3140_v30 = vadd.f32 %v3138_v35, %v3124_v60 }
 0x38c   : > { %v3143_v18 = vpop.permute.xlu1 %3142  ;;  %v3177_v17 = vpop.permute.xlu0 %3176 }
 0x38d   : > { %v3154_v32 = vmul.f32 %v6976_v51, %v3143_v18 }
 0x38f   : > { %v3156_v9 = vadd.f32 %v3154_v32, %v3140_v30 }
 0x390   : > { %v3159_v23 = vpop.permute.xlu1 %3158  ;;  %v3209_v20 = vpop.permute.xlu0 %3208 }
 0x391   : > { %v3170_v19 = vmul.f32 %v6984_v15, %v3159_v23  ;;  %v3091_v15 = vmul.f32 %v6949_v31, %v3081_v54 }
 0x393   : > { %v3172_v13 = vadd.f32 %v3170_v19, %v3156_v9  ;;  %v3219_v9 = vmul.f32 %v7001_v41, %v3209_v20 }
 0x394   : > { %v3175_v50 = vpop.permute.xlu1 %3174  ;;  %v3241_v40 = vpop.permute.xlu0 %3240 }
 0x395   : > { %v3186_v46 = vmul.f32 %v6989_v55, %v3175_v50  ;;  %v3077_v55 = vmul.f32 %v6942_v14, %v6930_v21  ;;  %v3155_v14 = vmul.f32 %v6978_v3, %v3145_v25 }
 0x397   : > { %v3188_v16 = vadd.f32 %v3186_v46, %v3172_v13 }
 0x398   : > { %v3191_v26 = vpop.permute.xlu1 %3190  ;;  %v3287_v18 = vpop.permute.xlu0 %3286 }
 0x399   : > { %v3202_v42 = vmul.f32 %v3196_v43, %v3191_v26  ;;  %v3282_v43 = vmul.f32 %v3276_v27, %v3271_v56  ;;  %v3123_v26 = vmul.f32 %v6966_v59, %v3113_v52 }
 0x39b   : > { %v3204_v5 = vadd.f32 %v3202_v42, %v3188_v16 }
 0x39c   : > { %v3207_v49 = vpop.permute.xlu1 %3206  ;;  %v3303_v63 = vpop.permute.xlu0 %3302 }
 0x39d   : > { %v3218_v7 = vmul.f32 %v6999_v28, %v3207_v49  ;;  %v3093_v28 = vadd.f32 %v3091_v15, %v3077_v55  ;;  %v3314_v60 = vmul.f32 %v7026_v38, %v3303_v63 }
 0x39f   : > { %v3220_v11 = vadd.f32 %v3218_v7, %v3204_v5 }
 0x3a0   : > { %v3223_v10 = vpop.permute.xlu1 %3222 }
 0x3a1   : > { %v3234_v57 = vmul.f32 %v3228_v33, %v3223_v10  ;;  %v3298_v33 = vmul.f32 %v7024_v47, %v3287_v18  ;;  %v3251_v10 = vmul.f32 %v7012_v2, %v3241_v40 }
 0x3a3   : > { %v3236_v39 = vadd.f32 %v3234_v57, %v3220_v11 }
 0x3a4   : > { %v3239_v45 = vpop.permute.xlu1 %3238 }
 0x3a5   : > { %v3250_v51 = vmul.f32 %v3244_v61, %v3239_v45 }
 0x3a7   : > { %v3252_v23 = vadd.f32 %v3250_v51, %v3236_v39 }
 0x3a8   : > { %v3255_v44 = vpop.permute.xlu1 %3254 }
 0x3a9   : > { %v3266_v62 = vmul.f32 %v3260_v58, %v3255_v44 }
 0x3ab   : > { %v3268_v50 = vadd.f32 %v3266_v62, %v3252_v23 }
 0x3ac   : > { %v3097_v12 = vpop.permute.xlu1 %3096 }
 0x3ad   : > { %v3284_v35 = vadd.f32 %v3282_v43, %v3268_v50  ;;  %v3107_v61 = vmul.f32 %v6964_v8, %v3097_v12  ;;  %v3187_v8 = vmul.f32 %v6991_v36, %v3177_v17  ;;  %v3319_v17 = vld [vmem:[%s7117_s6 + $0x8] sm:$0xff] }
 0x3ae   : > { %v3337_v20 = vsel %vm3332_vm5, %v3319_v17, 0 }
 0x3af   : > { %v3300_v31 = vadd.f32 %v3298_v33, %v3284_v35  ;;  %v3109_v54 = vadd.f32 %v3107_v61, %v3093_v28  ;;  %v3416_v45 = vand.u32 4294901760, %v3337_v20  ;;  %v5332_v35 = vmov 0.0|0.0  }
 0x3b0   : > { %v3129_v58 = vpop.permute.xlu1 %3128  ;;  %v7935_v61 = vmov 0.0  }
 0x3b1   : > { %v3316_v32 = vadd.f32 %v3314_v60, %v3300_v31  ;;  %v3125_v30 = vadd.f32 %v3123_v26, %v3109_v54  ;;  %v3139_v21 = vmul.f32 %v6969_v48, %v3129_v58  ;;  %v3417_v51 = vsub.f32 %v3337_v20, %v3416_v45  ;;  %v3325_v60 = vpop.permute.xlu0 %3324 }
 0x3b3   : > { %v3141_v27 = vadd.f32 %v3139_v21, %v3125_v30  ;;  %v3340_v5 = vand.u32 4294901760, %v3316_v32  ;;  %v3418_v39 = vand.u32 4294901760, %v3417_v51 }
 0x3b4   : > { %v3161_v56 = vpop.permute.xlu1 %3160 }
 0x3b5   : > { %v3157_v19 = vadd.f32 %v3155_v14, %v3141_v27  ;;  %v3171_v47 = vmul.f32 %v6982_v29, %v3161_v56  ;;  %v3857_v27 = vld [vmem:[%s7120_s9] sm:$0x3] }
 0x3b7   : > { %v3173_v49 = vadd.f32 %v3171_v47, %v3157_v19  ;;  %v3859_v47 = vsel %vm3332_vm5, %v3857_v27, 0 }
 0x3b8   : > { %v3193_v59 = vpop.permute.xlu1 %3192 }
 0x3b9   : > { %v3189_v52 = vadd.f32 %v3187_v8, %v3173_v49  ;;  %v3203_v38 = vmul.f32 %v6994_v1, %v3193_v59  ;;  %v3928_v8 = vand.u32 4294901760, %v3859_v47 }
 0x3bb   : > { %v3205_v46 = vadd.f32 %v3203_v38, %v3189_v52  ;;  %v3929_v49 = vsub.f32 %v3859_v47, %v3928_v8 }
 0x3bc   : > { %v3225_v13 = vpop.permute.xlu1 %3224 }
 0x3bd   : > { %v3221_v42 = vadd.f32 %v3219_v9, %v3205_v46  ;;  %v3235_v48 = vmul.f32 %v7005_v0, %v3225_v13  ;;  %v3854_v9 = vld [vmem:[#allocation5 + $0x8] sm:$0xff]  ;;  %v3853_v13 = vld [vmem:[#allocation5] sm:$0xff] }
 0x3bf   : > { %v3237_v25 = vadd.f32 %v3235_v48, %v3221_v42  ;;  %v3930_v42 = vand.u32 4294901760, %v3929_v49 }
 0x3c0   : > { %v3257_v3 = vpop.permute.xlu1 %3256 }
 0x3c1   : > { %v3253_v29 = vadd.f32 %v3251_v10, %v3237_v25  ;;  %v3267_v36 = vmul.f32 %v7018_v53, %v3257_v3  ;;  %v3428_v53 = vsub.f32 %v3316_v32, %v3340_v5 }
 0x3c3   : > { %v3269_v7 = vadd.f32 %v3267_v36, %v3253_v29  ;;  %v3429_v15 = vand.u32 4294901760, %v3428_v53  ;;  %v3931_v29 = vsub.f32 %v3929_v49, %v3930_v42 }
 0x3c4   : > { %v3273_v16 = vpop.permute.xlu1 %3272 }
 0x3c5   : > { %v3283_v1 = vmul.f32 %v7020_v34, %v3273_v16  ;;  %v3419_v34 = vsub.f32 %v3417_v51, %v3418_v39  ;;  %v3430_v55 = vsub.f32 %v3428_v53, %v3429_v15  ;;  %v3932_v20 = vand.u32 4294901760, %v3931_v29 }
 0x3c7   : > { %v3285_v57 = vadd.f32 %v3283_v1, %v3269_v7  ;;  %v3431_v63 = vand.u32 4294901760, %v3430_v55 }
 0x3c8   : > { %v3289_v41 = vpop.permute.xlu1 %3288 }
 0x3c9   : > { %v3299_v0 = vmul.f32 %v7022_v6, %v3289_v41  ;;  %v3420_v6 = vand.u32 4294901760, %v3419_v34 }
 0x3cb   : > { %v3301_v40 = vadd.f32 %v3299_v0, %v3285_v57 }
 0x3cc   : > { %v3305_v2 = vpop.permute.xlu1 %3304 }
 0x3cd   : > { %v3315_v11 = vmul.f32 %v7028_v24, %v3305_v2 }
 0x3cf   : > { %v3317_v18 = vadd.f32 %v3315_v11, %v3301_v40 }
 0x3d1   : > { %v3343_v44 = vand.u32 4294901760, %v3317_v18 }
 0x3d3   : > { %v4986_v23 = vpack.c.bf16 %v3343_v44, %v3340_v5  ;;  %v3435_v62 = vsub.f32 %v3317_v18, %v3343_v44  ;;  %v4424_v44 = vld [vmem:[#allocation2] ss:$0 sm:$0xff] }
 0x3d5   : > { %4987 = vmatprep.subr.bf16.mxu0 %v4986_v23  ;;  %v3436_v43 = vand.u32 4294901760, %v3435_v62  ;;  %v4994_v24 = vpack.c.bf16 %v3435_v62, %v3428_v53 }
 0x3d6   : > { %4989 = vmatpush3.bf16.msra.mxu0 %v4986_v23 }
 0x3d7   : > { %v3437_v50 = vsub.f32 %v3435_v62, %v3436_v43  ;;  %v5002_v33 = vpack.c.bf16 %v3436_v43, %v3429_v15 }
 0x3d9   : > { %v3438_v12 = vand.u32 4294901760, %v3437_v50  ;;  %4475 = vmatmul.mubr.f32.vlgmr.msra.gmra.mrb[8].mxu0 %v3420_v6 }
 0x3db   : > { %v4990_v28 = vpack.c.bf16 %v3438_v12, %v3431_v63 }
 0x3dd   : > { %4991 = vmatprep.subr.bf16.mxu1 %v4990_v28  ;;  %v3330_v26 = vpop.permute.xlu1 %3329 }
 0x3de   : > { %4993 = vmatpush3.bf16.msra.mxu1 %v4990_v28 }
 0x3df   : > { %4995 = vmatprep.subr.bf16.mxu1 %v4994_v24 }
 0x3e1   : > { %4482 = vmatmul.mubr.f32.vlgmr.msra.gmra.mrb[4].mxu1 %v3416_v45 }
 0x3e2   : > { %4997 = vmatpush3.bf16.msra.mxu1 %v4994_v24  ;;  %4488 = vmatprep.mubr.f32.mxu1 %v7031_v4 }
 0x3e3   : > { %4999 = vmatprep.subr.bf16.mxu1 %v4986_v23 }
 0x3e9   : > { %4489 = vmatmul.mubr.f32.vlgmr.msra.gmra.mrb[4].mxu1 %v3417_v51 }
 0x3ea   : > { %5001 = vmatpush3.bf16.msra.mxu1 %v4986_v23  ;;  %4495 = vmatprep.mubr.f32.mxu1 %v3408_v37 }
 0x3eb   : > { %5003 = vmatprep.subr.bf16.mxu1 %v5002_v33 }
 0x3f1   : > { %4496 = vmatmul.mubr.f32.vlgmr.msra.gmra.mrb[4].mxu1 %v3418_v39 }
 0x3f2   : > { %5005 = vmatpush3.bf16.msra.mxu1 %v5002_v33  ;;  %4502 = vmatprep.mubr.f32.mxu1 %v7015_v22 }
 0x3f3   : > { %5007 = vmatprep.subr.bf16.mxu1 %v4986_v23 }
 0x3f9   : > { %4503 = vmatmul.mubr.f32.vlgmr.msra.gmra.mrb[4].mxu1 %v3416_v45 }
 0x3fa   : > { %5009 = vmatpush3.bf16.msra.mxu1 %v4986_v23  ;;  %4509 = vmatprep.mubr.f32.mxu1 %v7015_v22 }
 0x3fb   : > { %5010 = vmatprep.subr.bf16.mxu1 %v5332_v35 }
 0x401   : > { %4510 = vmatmul.mubr.f32.vlgmr.msra.gmra.mrb[4].mxu1 %v3416_v45 }
 0x402   : > { %4516 = vmatprep.mubr.msk.f32.mxu1 %vm5333_vm6, %v7935_v61 }
 0x4ac   : > { %v4476_v4 = vpop.f32.mrb[8].mxu0 }
 0x4ad   : > { %v3412_v37 = vpop.f32.mrb[9].mxu0  ;;  %v3423_v31 = vadd.f32 %v4476_v4, %v3330_v26 }
 0x4ae   : > { %v3413_v54 = vadd.f32 %v3412_v37, %v3325_v60 }
 0x4d4   : > { %v4511_v58 = vpop.f32.mrb[4].mxu1 }
 0x4d5   : > { %v5029_v32 = vadd.f32 %v4511_v58, %v3423_v31  ;;  %v3831_v30 = vpop.f32.mrb[5].mxu1 }
 0x4d6   : > { %v5031_v21 = vadd.f32 %v3831_v30, %v3413_v54 }
 0x4d7   : > { %v3844_v14 = vmin.f32 %v5029_v32, 0.0  ;;  %vm3842_vm7 = vcmp.gt.f32.partialorder %v5029_v32, 0.0 }
 0x4d8   : > { %v3843_v22 = vmin.f32 %v5031_v21, 0.0  ;;  %vm3841_vm8 = vcmp.gt.f32.partialorder %v5031_v21, 0.0 }
 0x4d9   : > { %v3847_v56 = vmul.f32 1.442695, %v3844_v14 }
 0x4da   : > { %v3845_v19 = vmul.f32 1.442695, %v3843_v22 }
 0x4db   : > { %5218 = vpow2.f32 %v3847_v56 }
 0x4dc   : > { %5220 = vpow2.f32 %v3845_v19 }
 0x4e5   : > { %v5219_v59 = vpop.eup %5218 }
 0x4e6   : > { %v5221_v52 = vpop.eup %5220  ;;  %v4423_v38 = vadd.f32 -1.0, %v5219_v59 }
 0x4e7   : > { %v4422_v46 = vadd.f32 -1.0, %v5221_v52 }
 0x4e8   : > { %v3852_v48 = vsel %vm3842_vm7, %v5029_v32, %v4423_v38 }
 0x4e9   : > { %v3856_v3 = vmul.f32 %v3854_v9, %v3852_v48  ;;  %v3851_v25 = vsel %vm3841_vm8, %v5031_v21, %v4422_v46 }
 0x4ea   : > { %v3855_v10 = vmul.f32 %v3853_v13, %v3851_v25 }
 0x4eb   : > { %v3865_v16 = vand.u32 4294901760, %v3856_v3 }
 0x4ec   : > { %v3862_v36 = vand.u32 4294901760, %v3855_v10 }
 0x4ed   : > { %v3947_v17 = vsub.f32 %v3856_v3, %v3865_v16 }
 0x4ee   : > { %v3940_v1 = vsub.f32 %v3855_v10, %v3862_v36  ;;  %v5011_v41 = vpack.c.bf16 %v3865_v16, %v3862_v36 }
 0x4ef   : > { %v3948_v7 = vand.u32 4294901760, %v3947_v17 }
 0x4f0   : > { %5012 = vmatpush3.bf16.msra.mxu1 %v5011_v41  ;;  %v3941_v0 = vand.u32 4294901760, %v3940_v1  ;;  %v5017_v5 = vpack.c.bf16 %v3947_v17, %v3940_v1 }
 0x4f1   : > { %5013 = vmatprep.subr.bf16.mxu1 %v5332_v35  ;;  %v3949_v57 = vsub.f32 %v3947_v17, %v3948_v7 }
 0x4f2   : > { %v3942_v45 = vsub.f32 %v3940_v1, %v3941_v0  ;;  %v5023_v2 = vpack.c.bf16 %v3948_v7, %v3941_v0 }
 0x4f3   : > { %4517 = vmatmul.mubr.f32.vlgmr.msra.gmra.mrb[6].mxu1 %v3932_v20  ;;  %v3950_v40 = vand.u32 4294901760, %v3949_v57 }
 0x4f4   : > { %v3943_v11 = vand.u32 4294901760, %v3942_v45  ;;  %4523 = vmatprep.mubr.msk.f32.mxu1 %vm5333_vm6, %v7935_v61 }
 0x4f6   : > { %v5014_v53 = vpack.c.bf16 %v3950_v40, %v3943_v11 }
 0x4f8   : > { %5015 = vmatpush3.bf16.msra.mxu1 %v5014_v53 }
 0x4f9   : > { %5016 = vmatprep.subr.bf16.mxu1 %v5332_v35 }
 0x4fb   : > { %4524 = vmatmul.mubr.f32.vlgmr.msra.gmra.mrb[6].mxu1 %v3928_v8 }
 0x4fc   : > { %5018 = vmatpush3.bf16.msra.mxu1 %v5017_v5  ;;  %4530 = vmatprep.mubr.msk.f32.mxu1 %vm5333_vm6, %v7935_v61 }
 0x4fd   : > { %5019 = vmatprep.subr.bf16.mxu1 %v5332_v35 }
 0x503   : > { %4531 = vmatmul.mubr.f32.vlgmr.msra.gmra.mrb[6].mxu1 %v3929_v49 }
 0x504   : > { %5021 = vmatpush3.bf16.msra.mxu1 %v5011_v41  ;;  %4537 = vmatprep.mubr.msk.f32.mxu1 %vm5333_vm6, %v7935_v61 }
 0x505   : > { %5022 = vmatprep.subr.bf16.mxu1 %v5332_v35 }
 0x50b   : > { %4538 = vmatmul.mubr.f32.vlgmr.msra.gmra.mrb[6].mxu1 %v3930_v42 }
 0x50c   : > { %5024 = vmatpush3.bf16.msra.mxu1 %v5023_v2  ;;  %4544 = vmatprep.mubr.msk.f32.mxu1 %vm5333_vm6, %v7935_v61 }
 0x50d   : > { %5025 = vmatprep.subr.bf16.mxu1 %v5332_v35 }
 0x513   : > { %4545 = vmatmul.mubr.f32.vlgmr.msra.gmra.mrb[6].mxu1 %v3928_v8 }
 0x514   : > { %5027 = vmatpush3.bf16.msra.mxu1 %v5011_v41  ;;  %4551 = vmatprep.mubr.msk.f32.mxu1 %vm5333_vm6, %v7935_v61 }
 0x51b   : > { %4552 = vmatmul.mubr.f32.vlgmr.msra.gmra.mrb[6].mxu1 %v3928_v8 }
 0x5ee   : > { %v4316_v51 = vpop.f32.mrb[6].mxu1 }
 0x5ef   : > { %v4553_v18 = vpop.f32.mrb[7].mxu1  ;;  %v4320_v39 = vsel %vm1021_vm1, %v4316_v51, 0.0 }
 0x5f0   : > { %4321 = vadd.xlane.f32.xlu1 %v4320_v39 }
 0x67d   : > { %v4322_v15 = vpop.xlane.xlu1 %4321 }
 0x67e   : > { %v4330_v34 = vadd.f32 %v4424_v44, %v4322_v15 }
 0x680   : > { %4332 = vst.msk [vmem:[%s416_s30] sm:$0x3] %vm4331_vm9, %v4330_v34 }
 0x681 PF: > { %s25_s19 = sadd.s32 1, %s5292_s19  }
 0x682   : > { %p22_p5 = scmp.ge.s32.totalorder %s25_s19, 4  }
 0x684   :  { %24 = sbr.rel (!%p22_p5) target bundleno = 5 (0x5), region = 103 }
 0x68b   :  { %4352 = vsyncpa [#allocation4], 1 }
 0x68c   :  { %4354 = vsyncpa [#allocation4 + $0x1], 1 }
 0x68d   :  { %4355 = vsyncpa [#allocation6], 1 }

</bundles_post_ra>
